<compile_context>
chip_gen: v7x
topology: tpu7x:2x2x1
jax: 0.10.0
libtpu: 0.0.40
codegen_flags: <defaults>
</compile_context>

<pallas_src>
import jax
import jax.numpy as jnp
from jax.experimental import pallas as pl
from jax.experimental.pallas import tpu as pltpu


def _dense_kernel(x_ref, w_ref, b_ref, o_ref):
    """Single-shot y = x @ W_t + b; all operands resident in VMEM.

    x_ref : (B, K) f32   -> cast to bf16 in-register (hides under weight DMA)
    w_ref : (K, N) bf16  -> fed to the MXU as-is (no f32 upcast / copy)
    b_ref : (1, N) f32
    o_ref : (B, N) f32
    """
    x_bf16 = x_ref[...].astype(jnp.bfloat16)
    acc = jnp.dot(x_bf16, w_ref[...], preferred_element_type=jnp.float32)
    o_ref[...] = (acc + b_ref[...]).astype(o_ref.dtype)


@jax.jit
def dense_forward(x, w_t, b):
    """y = flatten(x) @ w_t + b.

    x   : (B, C, 64, 64) float32
    w_t : (K, N)         bfloat16 (transposed PyTorch weight)
    b   : (N,)           float32
    """
    B = x.shape[0]
    K, N = w_t.shape
    x2d = x.reshape(B, K)        # same semantics as torch .view(-1, C*64*64)
    b2d = b.reshape(1, N)

    return pl.pallas_call(
        _dense_kernel,
        out_shape=jax.ShapeDtypeStruct((B, N), x.dtype),
        in_specs=[
            pl.BlockSpec(memory_space=pltpu.MemorySpace.VMEM),  # x slab
            pl.BlockSpec(memory_space=pltpu.MemorySpace.VMEM),  # weight
            pl.BlockSpec(memory_space=pltpu.MemorySpace.VMEM),  # bias
        ],
        out_specs=pl.BlockSpec(memory_space=pltpu.MemorySpace.VMEM),
    )(x2d, w_t, b2d)


if __name__ == "__main__":
    # Small, deterministic configuration consistent with the module
    # (spatial size is fixed to 64x64 by the Linear's fan-in).
    img_channels = 3
    latent_size = 32
    batch = 2
    K = img_channels * 64 * 64  # 12288

    key = jax.random.PRNGKey(0)
    kx, kw, kb = jax.random.split(key, 3)

    x = jax.random.normal(kx, (batch, img_channels, 64, 64), dtype=jnp.float32)

    # Deterministic "synthetic checkpoint": PyTorch Linear default init range.
    bound = 1.0 / (K ** 0.5)
    w = jax.random.uniform(kw, (latent_size, K), minval=-bound, maxval=bound,
                           dtype=jnp.float32)     # PyTorch layout (out, in)
    b = jax.random.uniform(kb, (latent_size,), minval=-bound, maxval=bound,
                           dtype=jnp.float32)

    # Weight prepared once: transpose to (K, N), store bf16.  Halves the
    # dominant HBM stream; accumulation stays f32 on the MXU.
    w_t = jnp.transpose(w).astype(jnp.bfloat16)

    latent = dense_forward(x, w_t, b)
    jax.block_until_ready(latent)

    # Cross-check against a plain-JAX reference using the same bf16-rounded
    # operands (matches the kernel's bf16 x bf16 -> f32-accumulate matmul).
    x_rounded = x.reshape(batch, K).astype(jnp.bfloat16).astype(jnp.float32)
    ref = x_rounded @ w_t.astype(jnp.float32) + b
    assert latent.shape == (batch, latent_size)
    assert jnp.allclose(latent, ref, atol=5e-3, rtol=5e-3)

    print("KERNEL_OK")
</pallas_src>

<mosaic_0001>
module attributes {stable_mosaic.version = 11 : i64} {
  func.func @_dense_kernel(%arg0: memref<2x12288xf32, #tpu.memory_space<vmem>>, %arg1: memref<12288x32xbf16, #tpu.memory_space<vmem>>, %arg2: memref<1x32xf32, #tpu.memory_space<vmem>>, %arg3: memref<2x32xf32, #tpu.memory_space<vmem>>) attributes {dimension_semantics = [], scalar_prefetch = 0 : i64, scratch_operands = 0 : i64, tpu.core_type = #tpu.core_type<tc>} {
    %c0 = arith.constant 0 : index
    %c0_0 = arith.constant 0 : index
    %0 = vector.load %arg0[%c0, %c0_0] : memref<2x12288xf32, #tpu.memory_space<vmem>>, vector<2x12288xf32>
    %1 = arith.truncf %0 : vector<2x12288xf32> to vector<2x12288xbf16>
    %c0_1 = arith.constant 0 : index
    %c0_2 = arith.constant 0 : index
    %2 = vector.load %arg1[%c0_1, %c0_2] : memref<12288x32xbf16, #tpu.memory_space<vmem>>, vector<12288x32xbf16>
    %cst = arith.constant dense<0.000000e+00> : vector<2x32xf32>
    %3 = tpu.matmul %1, %2, %cst {dimension_numbers = #tpu.dot_dimension_numbers<[1], [0], [0], [1], [0, 0, 1, 1], [], []>} : vector<2x12288xbf16>, vector<12288x32xbf16>, vector<2x32xf32> -> vector<2x32xf32>
    %c0_3 = arith.constant 0 : index
    %c0_4 = arith.constant 0 : index
    %4 = vector.load %arg2[%c0_3, %c0_4] : memref<1x32xf32, #tpu.memory_space<vmem>>, vector<1x32xf32>
    %5 = vector.broadcast %4 : vector<1x32xf32> to vector<2x32xf32>
    %6 = arith.addf %3, %5 : vector<2x32xf32>
    %c0_5 = arith.constant 0 : index
    %c0_6 = arith.constant 0 : index
    %7 = vector.load %arg3[%c0_5, %c0_6] : memref<2x32xf32, #tpu.memory_space<vmem>>, vector<2x32xf32>
    tpu.vector_store %arg3[%c0_5, %c0_6], %6 {strides = array<i32>} : memref<2x32xf32, #tpu.memory_space<vmem>>, vector<2x32xf32>,
    return
  }
}

</mosaic_0001>

<bundles_post_ra>
// kernel: dense_forward.1
= control target key start
LH: loop header
LB: loop body
LE: loop exit
PB: predicated region body
PF: predicated region fallthrough
CT: control target
= control target key end

     0   :  { %v68_v28 = vlaneseq  ;;  %v11394_v36 = vmov 1983009808   ;;  %s13905_s0 = inlined_call_operand.vmem [shape: f32[2,12288], index: 0, kind: input, shape index: {}]   ;;  %s13906_s1 = inlined_call_operand.vmem [shape: bf16[12288,32], index: 1, kind: input, shape index: {}]   ;;  %s13907_s2 = inlined_call_operand.vmem [shape: f32[1,32], index: 2, kind: input, shape index: {}]   ;;  %s13908_s3 = inlined_call_operand.hbm [shape: f32[2,32], index: 3, kind: output, shape index: {}]  }
   0x1   :  { %v10578_v0 = vld [vmem:[%s13906_s1 + $0x40] sm:$0xff]   ;;  %v10582_v4 = vld [vmem:[%s13906_s1 + $0x48] sm:$0xff]   ;;  %v10586_v8 = vld [vmem:[%s13906_s1 + $0x50] sm:$0xff]   ;;  %v66_v37 = vunpack.c.l.s4 %v11394_v36 }
   0x2   :  { %v10579_v1 = vld [vmem:[%s13906_s1 + $0xc0] sm:$0xff]   ;;  %9520 = vmatprep.subr.bf16.mxu0 %v10578_v0  ;;  %v10583_v5 = vld [vmem:[%s13906_s1 + $0xc8] sm:$0xff]   ;;  %v10587_v9 = vld [vmem:[%s13906_s1 + $0xd0] sm:$0xff]   ;;  %v69_v33 = vshrl.u32 %v68_v28, 7 }
   0x3   :  { %v10580_v2 = vld [vmem:[%s13906_s1] sm:$0xff]   ;;  %9542 = vmatprep.subr.bf16.mxu1 %v10579_v1  ;;  %v10584_v6 = vld [vmem:[%s13906_s1 + $0x8] sm:$0xff]   ;;  %v10588_v10 = vld [vmem:[%s13906_s1 + $0x10] sm:$0xff]   ;;  %v67_v39 = vunpack.c.0.s8 %v66_v37 }
   0x4   :  { %v10581_v3 = vld [vmem:[%s13906_s1 + $0x80] sm:$0xff]   ;;  %9521 = vmatpush3.bf16.msra.mxu0 %v10580_v2  ;;  %v10585_v7 = vld [vmem:[%s13906_s1 + $0x88] sm:$0xff]   ;;  %v10589_v11 = vld [vmem:[%s13906_s1 + $0x90] sm:$0xff]  }
   0x5   :  { %9543 = vmatpush3.bf16.msra.mxu1 %v10581_v3  ;;  %9522 = vmatprep.subr.bf16.mxu0 %v10582_v4  ;;  %v10590_v12 = vld [vmem:[%s13906_s1 + $0x58] sm:$0xff]   ;;  %v10594_v16 = vld [vmem:[%s13906_s1 + $0x60] sm:$0xff]   ;;  %v10598_v20 = vld [vmem:[%s13906_s1 + $0x68] sm:$0xff]   ;;  %v11521_v41 = vsub.s32 %v67_v39, %v69_v33 }
   0x6   :  { %9544 = vmatprep.subr.bf16.mxu1 %v10583_v5  ;;  %v10591_v13 = vld [vmem:[%s13906_s1 + $0xd8] sm:$0xff]   ;;  %v10595_v17 = vld [vmem:[%s13906_s1 + $0xe0] sm:$0xff]   ;;  %v10599_v21 = vld [vmem:[%s13906_s1 + $0xe8] sm:$0xff]  }
   0x7   :  { %v10592_v14 = vld [vmem:[%s13906_s1 + $0x18] sm:$0xff]   ;;  %v10596_v18 = vld [vmem:[%s13906_s1 + $0x20] sm:$0xff]   ;;  %v10600_v22 = vld [vmem:[%s13906_s1 + $0x28] sm:$0xff]  }
   0x8   :  { %9523 = vmatpush3.bf16.msra.mxu0 %v10584_v6  ;;  %v10593_v15 = vld [vmem:[%s13906_s1 + $0x98] sm:$0xff]   ;;  %v10597_v19 = vld [vmem:[%s13906_s1 + $0xa0] sm:$0xff]   ;;  %v10601_v23 = vld [vmem:[%s13906_s1 + $0xa8] sm:$0xff]  }
   0x9   :  { %9545 = vmatpush3.bf16.msra.mxu1 %v10585_v7  ;;  %9524 = vmatprep.subr.bf16.mxu0 %v10586_v8  ;;  %v10602_v24 = vld [vmem:[%s13906_s1 + $0x70] sm:$0xff]   ;;  %v10606_v29 = vld [vmem:[%s13906_s1 + $0x78] sm:$0xff]   ;;  %v16_v34 = vld [vmem:[%s13905_s0] sm:$0xff] }
   0xa   :  { %9546 = vmatprep.subr.bf16.mxu1 %v10587_v9  ;;  %v10603_v25 = vld [vmem:[%s13906_s1 + $0xf0] sm:$0xff]   ;;  %v10607_v30 = vld [vmem:[%s13906_s1 + $0xf8] sm:$0xff]   ;;  %v10611_v35 = vld [vmem:[%s13906_s1 + $0x140] sm:$0xff]   ;;  %v64_v40 = vcombine.high %v16_v34, %v16_v34  ;;  %v71_v42 = vrot.slane %v16_v34, %v11521_v41 }
   0xb   :  { %v10604_v26 = vld [vmem:[%s13906_s1 + $0x30] sm:$0xff]   ;;  %v10608_v31 = vld [vmem:[%s13906_s1 + $0x38] sm:$0xff]   ;;  %v10612_v38 = vld [vmem:[%s13906_s1 + $0x1c0] sm:$0xff]  }
   0xc   :  { %9525 = vmatpush3.bf16.msra.mxu0 %v10588_v10  ;;  %v10605_v27 = vld [vmem:[%s13906_s1 + $0xb0] sm:$0xff]   ;;  %v10609_v32 = vld [vmem:[%s13906_s1 + $0xb8] sm:$0xff]   ;;  %v78_v43 = vrot.slane %v64_v40, %v11521_v41  ;;  %v79_v44 = vcombine.high %v71_v42, %v71_v42  ;;  %v10613_v46 = vld [vmem:[%s13906_s1 + $0x100] sm:$0xff]   ;;  %v568_v47 = vpack.c.bf16 %v71_v42, %v71_v42 }
   0xd   :  { %9547 = vmatpush3.bf16.msra.mxu1 %v10589_v11  ;;  %9526 = vmatprep.subr.bf16.mxu0 %v10590_v12  ;;  %v10614_v49 = vld [vmem:[%s13906_s1 + $0x180] sm:$0xff]   ;;  %v10615_v52 = vld [vmem:[%s13906_s1 + $0x148] sm:$0xff]   ;;  %v10619_v56 = vld [vmem:[%s13906_s1 + $0x150] sm:$0xff]  }
   0xe   :  { %9548 = vmatprep.subr.bf16.mxu1 %v10591_v13  ;;  %v80_v45 = vcombine.high %v78_v43, %v78_v43  ;;  %v570_v48 = vpack.c.bf16 %v78_v43, %v78_v43  ;;  %v569_v50 = vpack.c.bf16 %v79_v44, %v79_v44  ;;  %v10616_v53 = vld [vmem:[%s13906_s1 + $0x1c8] sm:$0xff]   ;;  %v10620_v57 = vld [vmem:[%s13906_s1 + $0x1d0] sm:$0xff]   ;;  %v10623_v60 = vld [vmem:[%s13906_s1 + $0x158] sm:$0xff]  }
   0xf   :  { %v10617_v54 = vld [vmem:[%s13906_s1 + $0x108] sm:$0xff]   ;;  %v10621_v58 = vld [vmem:[%s13906_s1 + $0x110] sm:$0xff]   ;;  %v10624_v61 = vld [vmem:[%s13906_s1 + $0x1d8] sm:$0xff]  }
  0x10   :  { %9527 = vmatpush3.bf16.msra.mxu0 %v10592_v14  ;;  %v571_v51 = vpack.c.bf16 %v80_v45, %v80_v45  ;;  %6847 = vmatprep.mubr.bf16.mxu0 %v569_v50  ;;  %v10618_v55 = vld [vmem:[%s13906_s1 + $0x188] sm:$0xff]   ;;  %v10622_v59 = vld [vmem:[%s13906_s1 + $0x190] sm:$0xff]   ;;  %v10625_v62 = vld [vmem:[%s13906_s1 + $0x118] sm:$0xff]  }
  0x11   :  { %9549 = vmatpush3.bf16.msra.mxu1 %v10593_v15  ;;  %9528 = vmatprep.subr.bf16.mxu0 %v10594_v16  ;;  %v10626_v63 = vld [vmem:[%s13906_s1 + $0x198] sm:$0xff]   ;;  %v10627_v0 = vld [vmem:[%s13906_s1 + $0x160] sm:$0xff]   ;;  %v10631_v4 = vld [vmem:[%s13906_s1 + $0x168] sm:$0xff]  }
  0x12   :  { %9550 = vmatprep.subr.bf16.mxu1 %v10595_v17  ;;  %6887 = vmatprep.mubr.bf16.mxu1 %v571_v51  ;;  %v10628_v1 = vld [vmem:[%s13906_s1 + $0x1e0] sm:$0xff]   ;;  %v10632_v5 = vld [vmem:[%s13906_s1 + $0x1e8] sm:$0xff]   ;;  %v10635_v8 = vld [vmem:[%s13906_s1 + $0x170] sm:$0xff]  }
  0x13   :  { %v10629_v2 = vld [vmem:[%s13906_s1 + $0x120] sm:$0xff]   ;;  %v10633_v6 = vld [vmem:[%s13906_s1 + $0x128] sm:$0xff]   ;;  %v10636_v9 = vld [vmem:[%s13906_s1 + $0x1f0] sm:$0xff]  }
  0x14   :  { %9529 = vmatpush3.bf16.msra.mxu0 %v10596_v18  ;;  %v10630_v3 = vld [vmem:[%s13906_s1 + $0x1a0] sm:$0xff]   ;;  %v10634_v7 = vld [vmem:[%s13906_s1 + $0x1a8] sm:$0xff]   ;;  %v10637_v11 = vld [vmem:[%s13906_s1 + $0x130] sm:$0xff]  }
  0x15   :  { %9551 = vmatpush3.bf16.msra.mxu1 %v10597_v19  ;;  %9530 = vmatprep.subr.bf16.mxu0 %v10598_v20  ;;  %v17_v10 = vld [vmem:[%s13905_s0 + $0x8] sm:$0xff]  ;;  %v10638_v14 = vld [vmem:[%s13906_s1 + $0x1b0] sm:$0xff]   ;;  %v10639_v15 = vld [vmem:[%s13906_s1 + $0x178] sm:$0xff]  }
  0x16   :  { %9552 = vmatprep.subr.bf16.mxu1 %v10599_v21  ;;  %v88_v12 = vrot.slane %v17_v10, %v11521_v41  ;;  %v81_v13 = vcombine.high %v17_v10, %v17_v10  ;;  %v10640_v18 = vld [vmem:[%s13906_s1 + $0x1f8] sm:$0xff]   ;;  %v10651_v33 = vld [vmem:[%s13906_s1 + $0x288] sm:$0xff]   ;;  %v10652_v34 = vld [vmem:[%s13906_s1 + $0x250] sm:$0xff]  }
  0x17   :  { %v10641_v19 = vld [vmem:[%s13906_s1 + $0x138] sm:$0xff]   ;;  %v10654_v36 = vld [vmem:[%s13906_s1 + $0x210] sm:$0xff]   ;;  %v10660_v43 = vld [vmem:[%s13906_s1 + $0x260] sm:$0xff]  }
  0x18   :  { %9531 = vmatpush3.bf16.msra.mxu0 %v10600_v22  ;;  %v96_v16 = vcombine.high %v88_v12, %v88_v12  ;;  %v95_v17 = vrot.slane %v81_v13, %v11521_v41  ;;  %v10642_v22 = vld [vmem:[%s13906_s1 + $0x1b8] sm:$0xff]   ;;  %v10655_v37 = vld [vmem:[%s13906_s1 + $0x290] sm:$0xff]   ;;  %v10661_v44 = vld [vmem:[%s13906_s1 + $0x2e0] sm:$0xff]  }
  0x19   :  { %9553 = vmatpush3.bf16.msra.mxu1 %v10601_v23  ;;  %9532 = vmatprep.subr.bf16.mxu0 %v10602_v24  ;;  %v10644_v24 = vld [vmem:[%s13906_s1 + $0x240] sm:$0xff]   ;;  %v10657_v39 = vld [vmem:[%s13906_s1 + $0x2d8] sm:$0xff]   ;;  %v10667_v50 = vld [vmem:[%s13906_s1 + $0x2a8] sm:$0xff]  }
  0x1a   :  { %9554 = vmatprep.subr.bf16.mxu1 %v10603_v25  ;;  %v573_v20 = vpack.c.bf16 %v96_v16, %v96_v16  ;;  %v97_v21 = vcombine.high %v95_v17, %v95_v17  ;;  %v10645_v25 = vld [vmem:[%s13906_s1 + $0x2c0] sm:$0xff]   ;;  %v574_v28 = vpack.c.bf16 %v95_v17, %v95_v17  ;;  %v10658_v40 = vld [vmem:[%s13906_s1 + $0x218] sm:$0xff]   ;;  %v10668_v51 = vld [vmem:[%s13906_s1 + $0x270] sm:$0xff]  }
  0x1b   :  { %v10659_v42 = vld [vmem:[%s13906_s1 + $0x298] sm:$0xff]   ;;  %v10662_v45 = vld [vmem:[%s13906_s1 + $0x220] sm:$0xff]   ;;  %v10682_v10 = vld [vmem:[%s13906_s1 + $0x3c8] sm:$0xff]  }
  0x1c   :  { %9533 = vmatpush3.bf16.msra.mxu0 %v10604_v26  ;;  %v575_v23 = vpack.c.bf16 %v97_v21, %v97_v21  ;;  %v10646_v26 = vld [vmem:[%s13906_s1 + $0x200] sm:$0xff]   ;;  %v10685_v13 = vld [vmem:[%s13906_s1 + $0x350] sm:$0xff]   ;;  %v10689_v17 = vld [vmem:[%s13906_s1 + $0x358] sm:$0xff]  }
  0x1d   :  { %9555 = vmatpush3.bf16.msra.mxu1 %v10605_v27  ;;  %9534 = vmatprep.subr.bf16.mxu0 %v10606_v29  ;;  %v572_v27 = vpack.c.bf16 %v88_v12, %v88_v12  ;;  %v10647_v29 = vld [vmem:[%s13906_s1 + $0x280] sm:$0xff]   ;;  %v10684_v12 = vld [vmem:[%s13906_s1 + $0x388] sm:$0xff]   ;;  %v10688_v16 = vld [vmem:[%s13906_s1 + $0x390] sm:$0xff]  }
  0x1e   :  { %9556 = vmatprep.subr.bf16.mxu1 %v10607_v30  ;;  %v10648_v30 = vld [vmem:[%s13906_s1 + $0x248] sm:$0xff]   ;;  %v10693_v21 = vld [vmem:[%s13906_s1 + $0x360] sm:$0xff]  }
  0x20   :  { %9535 = vmatpush3.bf16.msra.mxu0 %v10608_v31  ;;  %v10649_v31 = vld [vmem:[%s13906_s1 + $0x2c8] sm:$0xff]  }
  0x21   :  { %9557 = vmatpush3.bf16.msra.mxu1 %v10609_v32  ;;  %9564 = vmatprep.subr.bf16.mxu0 %v10611_v35  ;;  %v10650_v32 = vld [vmem:[%s13906_s1 + $0x208] sm:$0xff]   ;;  %v10653_v35 = vld [vmem:[%s13906_s1 + $0x2d0] sm:$0xff]  }
  0x22   :  { %9586 = vmatprep.subr.bf16.mxu1 %v10612_v38  ;;  %v10656_v38 = vld [vmem:[%s13906_s1 + $0x258] sm:$0xff]  }
  0x23   :  { %6848 = vmatmul.mubr.bf16.vlgmr.msra.gmra.mrb[0].mxu0 %v568_v47  ;;  %v10664_v47 = vld [vmem:[%s13906_s1 + $0x268] sm:$0xff]  }
  0x24   :  { %6888 = vmatmul.mubr.bf16.vlgmr.msra.gmra.mrb[0].mxu1 %v570_v48  ;;  %9565 = vmatpush3.bf16.msra.mxu0 %v10613_v46  ;;  %v10663_v46 = vld [vmem:[%s13906_s1 + $0x2a0] sm:$0xff]   ;;  %v10665_v48 = vld [vmem:[%s13906_s1 + $0x2e8] sm:$0xff]  }
  0x25   :  { %9587 = vmatpush3.bf16.msra.mxu1 %v10614_v49  ;;  %9566 = vmatprep.subr.bf16.mxu0 %v10615_v52  ;;  %v10666_v49 = vld [vmem:[%s13906_s1 + $0x228] sm:$0xff]   ;;  %v10669_v52 = vld [vmem:[%s13906_s1 + $0x2f0] sm:$0xff]  }
  0x26   :  { %9588 = vmatprep.subr.bf16.mxu1 %v10616_v53  ;;  %6927 = vmatprep.mubr.bf16.mxu0 %v573_v20  ;;  %v18_v53 = vld [vmem:[%s13905_s0 + $0x10] sm:$0xff]  ;;  %v10692_v20 = vld [vmem:[%s13906_s1 + $0x398] sm:$0xff]  }
  0x27   :  { %6967 = vmatprep.mubr.bf16.mxu1 %v575_v23  ;;  %v10695_v23 = vld [vmem:[%s13906_s1 + $0x320] sm:$0xff]  }
  0x28   :  { %9567 = vmatpush3.bf16.msra.mxu0 %v10617_v54  ;;  %v10670_v54 = vld [vmem:[%s13906_s1 + $0x230] sm:$0xff]  }
  0x29   :  { %9589 = vmatpush3.bf16.msra.mxu1 %v10618_v55  ;;  %9568 = vmatprep.subr.bf16.mxu0 %v10619_v56  ;;  %v105_v55 = vrot.slane %v18_v53, %v11521_v41  ;;  %v98_v56 = vcombine.high %v18_v53, %v18_v53  ;;  %v10715_v53 = vld [vmem:[%s13906_s1 + $0x4c8] sm:$0xff]  }
  0x2a   :  { %9590 = vmatprep.subr.bf16.mxu1 %v10620_v57  ;;  %v10671_v57 = vld [vmem:[%s13906_s1 + $0x2b0] sm:$0xff]  }
  0x2c   :  { %9569 = vmatpush3.bf16.msra.mxu0 %v10621_v58  ;;  %v10672_v58 = vld [vmem:[%s13906_s1 + $0x278] sm:$0xff]  }
  0x2d   :  { %9591 = vmatpush3.bf16.msra.mxu1 %v10622_v59  ;;  %9570 = vmatprep.subr.bf16.mxu0 %v10623_v60  ;;  %v113_v59 = vcombine.high %v105_v55, %v105_v55  ;;  %v112_v60 = vrot.slane %v98_v56, %v11521_v41  ;;  %v10718_v56 = vld [vmem:[%s13906_s1 + $0x450] sm:$0xff]  }
  0x2e   :  { %9592 = vmatprep.subr.bf16.mxu1 %v10624_v61  ;;  %v10673_v61 = vld [vmem:[%s13906_s1 + $0x2f8] sm:$0xff]  }
  0x30   :  { %9571 = vmatpush3.bf16.msra.mxu0 %v10625_v62  ;;  %v10674_v62 = vld [vmem:[%s13906_s1 + $0x238] sm:$0xff]  }
  0x31   :  { %9593 = vmatpush3.bf16.msra.mxu1 %v10626_v63  ;;  %9572 = vmatprep.subr.bf16.mxu0 %v10627_v0  ;;  %v577_v63 = vpack.c.bf16 %v113_v59, %v113_v59  ;;  %v114_v0 = vcombine.high %v112_v60, %v112_v60  ;;  %v10721_v59 = vld [vmem:[%s13906_s1 + $0x490] sm:$0xff]  }
  0x32   :  { %9594 = vmatprep.subr.bf16.mxu1 %v10628_v1  ;;  %v10675_v1 = vld [vmem:[%s13906_s1 + $0x2b8] sm:$0xff]  }
  0x34   :  { %9573 = vmatpush3.bf16.msra.mxu0 %v10629_v2  ;;  %v579_v2 = vpack.c.bf16 %v114_v0, %v114_v0  ;;  %v10726_v0 = vld [vmem:[%s13906_s1 + $0x460] sm:$0xff]  }
  0x35   :  { %9595 = vmatpush3.bf16.msra.mxu1 %v10630_v3  ;;  %9574 = vmatprep.subr.bf16.mxu0 %v10631_v4  ;;  %v10677_v3 = vld [vmem:[%s13906_s1 + $0x340] sm:$0xff]  }
  0x36   :  { %9596 = vmatprep.subr.bf16.mxu1 %v10632_v5  ;;  %v10678_v4 = vld [vmem:[%s13906_s1 + $0x3c0] sm:$0xff]  }
  0x37   :  { %v10679_v5 = vld [vmem:[%s13906_s1 + $0x300] sm:$0xff]  }
  0x38   :  { %9575 = vmatpush3.bf16.msra.mxu0 %v10633_v6  ;;  %v576_v6 = vpack.c.bf16 %v105_v55, %v105_v55  ;;  %v10717_v55 = vld [vmem:[%s13906_s1 + $0x488] sm:$0xff]  }
  0x39   :  { %9597 = vmatpush3.bf16.msra.mxu1 %v10634_v7  ;;  %9576 = vmatprep.subr.bf16.mxu0 %v10635_v8  ;;  %v578_v7 = vpack.c.bf16 %v112_v60, %v112_v60  ;;  %v10680_v8 = vld [vmem:[%s13906_s1 + $0x380] sm:$0xff]   ;;  %v10722_v60 = vld [vmem:[%s13906_s1 + $0x458] sm:$0xff]  }
  0x3a   :  { %9598 = vmatprep.subr.bf16.mxu1 %v10636_v9  ;;  %v10681_v9 = vld [vmem:[%s13906_s1 + $0x348] sm:$0xff]  }
  0x3c   :  { %9577 = vmatpush3.bf16.msra.mxu0 %v10637_v11  ;;  %v10683_v11 = vld [vmem:[%s13906_s1 + $0x308] sm:$0xff]  }
  0x3d   :  { %9599 = vmatpush3.bf16.msra.mxu1 %v10638_v14  ;;  %9578 = vmatprep.subr.bf16.mxu0 %v10639_v15  ;;  %v10686_v14 = vld [vmem:[%s13906_s1 + $0x3d0] sm:$0xff]  }
  0x3e   :  { %9600 = vmatprep.subr.bf16.mxu1 %v10640_v18  ;;  %v10687_v15 = vld [vmem:[%s13906_s1 + $0x310] sm:$0xff]   ;;  %v10690_v18 = vld [vmem:[%s13906_s1 + $0x3d8] sm:$0xff]  }
  0x40   :  { %9579 = vmatpush3.bf16.msra.mxu0 %v10641_v19  ;;  %v10691_v19 = vld [vmem:[%s13906_s1 + $0x318] sm:$0xff]  }
  0x41   :  { %9601 = vmatpush3.bf16.msra.mxu1 %v10642_v22  ;;  %9608 = vmatprep.subr.bf16.mxu0 %v10644_v24  ;;  %v10694_v22 = vld [vmem:[%s13906_s1 + $0x3e0] sm:$0xff]  }
  0x42   :  { %9630 = vmatprep.subr.bf16.mxu1 %v10645_v25  ;;  %v10696_v24 = vld [vmem:[%s13906_s1 + $0x3a0] sm:$0xff]   ;;  %v10697_v25 = vld [vmem:[%s13906_s1 + $0x368] sm:$0xff]  }
  0x43   :  { %6928 = vmatmul.mubr.bf16.vlgmr.msra.gmra.mrb[4].mxu0 %v572_v27  ;;  %v10699_v27 = vld [vmem:[%s13906_s1 + $0x328] sm:$0xff]  }
  0x44   :  { %6968 = vmatmul.mubr.bf16.vlgmr.msra.gmra.mrb[4].mxu1 %v574_v28  ;;  %9609 = vmatpush3.bf16.msra.mxu0 %v10646_v26  ;;  %v10698_v26 = vld [vmem:[%s13906_s1 + $0x3e8] sm:$0xff]  }
  0x45   :  { %9631 = vmatpush3.bf16.msra.mxu1 %v10647_v29  ;;  %9610 = vmatprep.subr.bf16.mxu0 %v10648_v30  ;;  %v10700_v28 = vld [vmem:[%s13906_s1 + $0x3a8] sm:$0xff]   ;;  %v10701_v29 = vld [vmem:[%s13906_s1 + $0x370] sm:$0xff]  }
  0x46   :  { %9632 = vmatprep.subr.bf16.mxu1 %v10649_v31  ;;  %7007 = vmatprep.mubr.bf16.mxu0 %v577_v63  ;;  %v10702_v30 = vld [vmem:[%s13906_s1 + $0x3f0] sm:$0xff]   ;;  %v10725_v63 = vld [vmem:[%s13906_s1 + $0x498] sm:$0xff]  }
  0x47   :  { %7047 = vmatprep.mubr.bf16.mxu1 %v579_v2  ;;  %v10703_v31 = vld [vmem:[%s13906_s1 + $0x330] sm:$0xff]   ;;  %v10728_v2 = vld [vmem:[%s13906_s1 + $0x420] sm:$0xff]  }
  0x48   :  { %9611 = vmatpush3.bf16.msra.mxu0 %v10650_v32  ;;  %v19_v32 = vld [vmem:[%s13905_s0 + $0x18] sm:$0xff] }
  0x49   :  { %9633 = vmatpush3.bf16.msra.mxu1 %v10651_v33  ;;  %9612 = vmatprep.subr.bf16.mxu0 %v10652_v34  ;;  %v10704_v33 = vld [vmem:[%s13906_s1 + $0x3b0] sm:$0xff]   ;;  %v122_v34 = vrot.slane %v19_v32, %v11521_v41 }
  0x4a   :  { %9634 = vmatprep.subr.bf16.mxu1 %v10653_v35  ;;  %v115_v35 = vcombine.high %v19_v32, %v19_v32  ;;  %v10749_v32 = vld [vmem:[%s13906_s1 + $0x508] sm:$0xff]  }
  0x4c   :  { %9613 = vmatpush3.bf16.msra.mxu0 %v10654_v36  ;;  %v10705_v36 = vld [vmem:[%s13906_s1 + $0x378] sm:$0xff]  }
  0x4d   :  { %9635 = vmatpush3.bf16.msra.mxu1 %v10655_v37  ;;  %9614 = vmatprep.subr.bf16.mxu0 %v10656_v38  ;;  %v10706_v37 = vld [vmem:[%s13906_s1 + $0x3f8] sm:$0xff]   ;;  %v130_v38 = vcombine.high %v122_v34, %v122_v34 }
  0x4e   :  { %9636 = vmatprep.subr.bf16.mxu1 %v10657_v39  ;;  %v129_v39 = vrot.slane %v115_v35, %v11521_v41  ;;  %v10752_v35 = vld [vmem:[%s13906_s1 + $0x5d0] sm:$0xff]  }
  0x50   :  { %9615 = vmatpush3.bf16.msra.mxu0 %v10658_v40  ;;  %v10707_v40 = vld [vmem:[%s13906_s1 + $0x338] sm:$0xff]  }
  0x51   :  { %9637 = vmatpush3.bf16.msra.mxu1 %v10659_v42  ;;  %9616 = vmatprep.subr.bf16.mxu0 %v10660_v43  ;;  %v10708_v42 = vld [vmem:[%s13906_s1 + $0x3b8] sm:$0xff]   ;;  %v581_v43 = vpack.c.bf16 %v130_v38, %v130_v38 }
  0x52   :  { %9638 = vmatprep.subr.bf16.mxu1 %v10661_v44  ;;  %v131_v44 = vcombine.high %v129_v39, %v129_v39  ;;  %v10755_v38 = vld [vmem:[%s13906_s1 + $0x558] sm:$0xff]  }
  0x54   :  { %9617 = vmatpush3.bf16.msra.mxu0 %v10662_v45  ;;  %v10710_v45 = vld [vmem:[%s13906_s1 + $0x440] sm:$0xff]  }
  0x55   :  { %9639 = vmatpush3.bf16.msra.mxu1 %v10663_v46  ;;  %9618 = vmatprep.subr.bf16.mxu0 %v10664_v47  ;;  %v583_v46 = vpack.c.bf16 %v131_v44, %v131_v44  ;;  %v10711_v47 = vld [vmem:[%s13906_s1 + $0x4c0] sm:$0xff]  }
  0x56   :  { %9640 = vmatprep.subr.bf16.mxu1 %v10665_v48  ;;  %v10712_v48 = vld [vmem:[%s13906_s1 + $0x400] sm:$0xff]  }
  0x57   :  { %v10760_v44 = vld [vmem:[%s13906_s1 + $0x5e0] sm:$0xff]  }
  0x58   :  { %9619 = vmatpush3.bf16.msra.mxu0 %v10666_v49  ;;  %v580_v49 = vpack.c.bf16 %v122_v34, %v122_v34  ;;  %v10751_v34 = vld [vmem:[%s13906_s1 + $0x550] sm:$0xff]  }
  0x59   :  { %9641 = vmatpush3.bf16.msra.mxu1 %v10667_v50  ;;  %9620 = vmatprep.subr.bf16.mxu0 %v10668_v51  ;;  %v582_v50 = vpack.c.bf16 %v129_v39, %v129_v39  ;;  %v10713_v51 = vld [vmem:[%s13906_s1 + $0x480] sm:$0xff]   ;;  %v10756_v39 = vld [vmem:[%s13906_s1 + $0x5d8] sm:$0xff]  }
  0x5a   :  { %9642 = vmatprep.subr.bf16.mxu1 %v10669_v52  ;;  %v10714_v52 = vld [vmem:[%s13906_s1 + $0x448] sm:$0xff]  }
  0x5c   :  { %9621 = vmatpush3.bf16.msra.mxu0 %v10670_v54  ;;  %v10716_v54 = vld [vmem:[%s13906_s1 + $0x408] sm:$0xff]  }
  0x5d   :  { %9643 = vmatpush3.bf16.msra.mxu1 %v10671_v57  ;;  %9622 = vmatprep.subr.bf16.mxu0 %v10672_v58  ;;  %v10719_v57 = vld [vmem:[%s13906_s1 + $0x4d0] sm:$0xff]  }
  0x5e   :  { %9644 = vmatprep.subr.bf16.mxu1 %v10673_v61  ;;  %v10720_v58 = vld [vmem:[%s13906_s1 + $0x410] sm:$0xff]   ;;  %v10723_v61 = vld [vmem:[%s13906_s1 + $0x4d8] sm:$0xff]  }
  0x60   :  { %9623 = vmatpush3.bf16.msra.mxu0 %v10674_v62  ;;  %v10724_v62 = vld [vmem:[%s13906_s1 + $0x418] sm:$0xff]  }
  0x61   :  { %9645 = vmatpush3.bf16.msra.mxu1 %v10675_v1  ;;  %9652 = vmatprep.subr.bf16.mxu0 %v10677_v3  ;;  %v10727_v1 = vld [vmem:[%s13906_s1 + $0x4e0] sm:$0xff]  }
  0x62   :  { %9674 = vmatprep.subr.bf16.mxu1 %v10678_v4  ;;  %v10729_v3 = vld [vmem:[%s13906_s1 + $0x4a0] sm:$0xff]   ;;  %v10730_v4 = vld [vmem:[%s13906_s1 + $0x468] sm:$0xff]  }
  0x63   :  { %7008 = vmatmul.mubr.bf16.vlgmr.msra.gmra.mrb[8].mxu0 %v576_v6  ;;  %v10732_v6 = vld [vmem:[%s13906_s1 + $0x428] sm:$0xff]  }
  0x64   :  { %7048 = vmatmul.mubr.bf16.vlgmr.msra.gmra.mrb[8].mxu1 %v578_v7  ;;  %9653 = vmatpush3.bf16.msra.mxu0 %v10679_v5  ;;  %v10731_v5 = vld [vmem:[%s13906_s1 + $0x4e8] sm:$0xff]  }
  0x65   :  { %9675 = vmatpush3.bf16.msra.mxu1 %v10680_v8  ;;  %9654 = vmatprep.subr.bf16.mxu0 %v10681_v9  ;;  %v10733_v7 = vld [vmem:[%s13906_s1 + $0x4a8] sm:$0xff]   ;;  %v10734_v8 = vld [vmem:[%s13906_s1 + $0x470] sm:$0xff]  }
  0x66   :  { %9676 = vmatprep.subr.bf16.mxu1 %v10682_v10  ;;  %7087 = vmatprep.mubr.bf16.mxu0 %v581_v43  ;;  %v10735_v9 = vld [vmem:[%s13906_s1 + $0x4f0] sm:$0xff]   ;;  %v10759_v43 = vld [vmem:[%s13906_s1 + $0x560] sm:$0xff]  }
  0x67   :  { %7127 = vmatprep.mubr.bf16.mxu1 %v583_v46  ;;  %v10736_v10 = vld [vmem:[%s13906_s1 + $0x430] sm:$0xff]   ;;  %v10762_v46 = vld [vmem:[%s13906_s1 + $0x5a0] sm:$0xff]  }
  0x68   :  { %9655 = vmatpush3.bf16.msra.mxu0 %v10683_v11  ;;  %v20_v11 = vld [vmem:[%s13905_s0 + $0x20] sm:$0xff] }
  0x69   :  { %9677 = vmatpush3.bf16.msra.mxu1 %v10684_v12  ;;  %9656 = vmatprep.subr.bf16.mxu0 %v10685_v13  ;;  %v10737_v12 = vld [vmem:[%s13906_s1 + $0x4b0] sm:$0xff]   ;;  %v139_v13 = vrot.slane %v20_v11, %v11521_v41 }
  0x6a   :  { %9678 = vmatprep.subr.bf16.mxu1 %v10686_v14  ;;  %v132_v14 = vcombine.high %v20_v11, %v20_v11  ;;  %v10782_v11 = vld [vmem:[%s13906_s1 + $0x608] sm:$0xff]  }
  0x6c   :  { %9657 = vmatpush3.bf16.msra.mxu0 %v10687_v15  ;;  %v10738_v15 = vld [vmem:[%s13906_s1 + $0x478] sm:$0xff]  }
  0x6d   :  { %9679 = vmatpush3.bf16.msra.mxu1 %v10688_v16  ;;  %9658 = vmatprep.subr.bf16.mxu0 %v10689_v17  ;;  %v10739_v16 = vld [vmem:[%s13906_s1 + $0x4f8] sm:$0xff]   ;;  %v147_v17 = vcombine.high %v139_v13, %v139_v13 }
  0x6e   :  { %9680 = vmatprep.subr.bf16.mxu1 %v10690_v18  ;;  %v146_v18 = vrot.slane %v132_v14, %v11521_v41  ;;  %v10785_v14 = vld [vmem:[%s13906_s1 + $0x6d0] sm:$0xff]  }
  0x70   :  { %9659 = vmatpush3.bf16.msra.mxu0 %v10691_v19  ;;  %v10740_v19 = vld [vmem:[%s13906_s1 + $0x438] sm:$0xff]  }
  0x71   :  { %9681 = vmatpush3.bf16.msra.mxu1 %v10692_v20  ;;  %9660 = vmatprep.subr.bf16.mxu0 %v10693_v21  ;;  %v10741_v20 = vld [vmem:[%s13906_s1 + $0x4b8] sm:$0xff]   ;;  %v585_v21 = vpack.c.bf16 %v147_v17, %v147_v17 }
  0x72   :  { %9682 = vmatprep.subr.bf16.mxu1 %v10694_v22  ;;  %v148_v22 = vcombine.high %v146_v18, %v146_v18  ;;  %v10788_v17 = vld [vmem:[%s13906_s1 + $0x658] sm:$0xff]  }
  0x74   :  { %9661 = vmatpush3.bf16.msra.mxu0 %v10695_v23  ;;  %v10743_v23 = vld [vmem:[%s13906_s1 + $0x540] sm:$0xff]  }
  0x75   :  { %9683 = vmatpush3.bf16.msra.mxu1 %v10696_v24  ;;  %9662 = vmatprep.subr.bf16.mxu0 %v10697_v25  ;;  %v587_v24 = vpack.c.bf16 %v148_v22, %v148_v22  ;;  %v10744_v25 = vld [vmem:[%s13906_s1 + $0x5c0] sm:$0xff]  }
  0x76   :  { %9684 = vmatprep.subr.bf16.mxu1 %v10698_v26  ;;  %v10745_v26 = vld [vmem:[%s13906_s1 + $0x500] sm:$0xff]  }
  0x77   :  { %v10793_v22 = vld [vmem:[%s13906_s1 + $0x6e0] sm:$0xff]  }
  0x78   :  { %9663 = vmatpush3.bf16.msra.mxu0 %v10699_v27  ;;  %v584_v27 = vpack.c.bf16 %v139_v13, %v139_v13  ;;  %v10784_v13 = vld [vmem:[%s13906_s1 + $0x650] sm:$0xff]  }
  0x79   :  { %9685 = vmatpush3.bf16.msra.mxu1 %v10700_v28  ;;  %9664 = vmatprep.subr.bf16.mxu0 %v10701_v29  ;;  %v586_v28 = vpack.c.bf16 %v146_v18, %v146_v18  ;;  %v10746_v29 = vld [vmem:[%s13906_s1 + $0x580] sm:$0xff]   ;;  %v10789_v18 = vld [vmem:[%s13906_s1 + $0x6d8] sm:$0xff]  }
  0x7a   :  { %9686 = vmatprep.subr.bf16.mxu1 %v10702_v30  ;;  %v10747_v30 = vld [vmem:[%s13906_s1 + $0x548] sm:$0xff]  }
  0x7c   :  { %9665 = vmatpush3.bf16.msra.mxu0 %v10703_v31  ;;  %v10748_v31 = vld [vmem:[%s13906_s1 + $0x5c8] sm:$0xff]  }
  0x7d   :  { %9687 = vmatpush3.bf16.msra.mxu1 %v10704_v33  ;;  %9666 = vmatprep.subr.bf16.mxu0 %v10705_v36  ;;  %v10750_v33 = vld [vmem:[%s13906_s1 + $0x588] sm:$0xff]   ;;  %v10753_v36 = vld [vmem:[%s13906_s1 + $0x510] sm:$0xff]  }
  0x7e   :  { %9688 = vmatprep.subr.bf16.mxu1 %v10706_v37  ;;  %v10754_v37 = vld [vmem:[%s13906_s1 + $0x590] sm:$0xff]  }
  0x80   :  { %9667 = vmatpush3.bf16.msra.mxu0 %v10707_v40  ;;  %v10757_v40 = vld [vmem:[%s13906_s1 + $0x518] sm:$0xff]  }
  0x81   :  { %9689 = vmatpush3.bf16.msra.mxu1 %v10708_v42  ;;  %9696 = vmatprep.subr.bf16.mxu0 %v10710_v45  ;;  %v10758_v42 = vld [vmem:[%s13906_s1 + $0x598] sm:$0xff]   ;;  %v10761_v45 = vld [vmem:[%s13906_s1 + $0x520] sm:$0xff]  }
  0x82   :  { %9718 = vmatprep.subr.bf16.mxu1 %v10711_v47  ;;  %v10763_v47 = vld [vmem:[%s13906_s1 + $0x568] sm:$0xff]  }
  0x83   :  { %7088 = vmatmul.mubr.bf16.vlgmr.msra.gmra.mrb[12].mxu0 %v580_v49  ;;  %v10765_v49 = vld [vmem:[%s13906_s1 + $0x528] sm:$0xff]  }
  0x84   :  { %7128 = vmatmul.mubr.bf16.vlgmr.msra.gmra.mrb[12].mxu1 %v582_v50  ;;  %9697 = vmatpush3.bf16.msra.mxu0 %v10712_v48  ;;  %v10764_v48 = vld [vmem:[%s13906_s1 + $0x5e8] sm:$0xff]  }
  0x85   :  { %9719 = vmatpush3.bf16.msra.mxu1 %v10713_v51  ;;  %9698 = vmatprep.subr.bf16.mxu0 %v10714_v52  ;;  %v10766_v50 = vld [vmem:[%s13906_s1 + $0x5a8] sm:$0xff]   ;;  %v10767_v51 = vld [vmem:[%s13906_s1 + $0x570] sm:$0xff]  }
  0x86   :  { %9720 = vmatprep.subr.bf16.mxu1 %v10715_v53  ;;  %7167 = vmatprep.mubr.bf16.mxu0 %v585_v21  ;;  %v10768_v52 = vld [vmem:[%s13906_s1 + $0x5f0] sm:$0xff]   ;;  %v10792_v21 = vld [vmem:[%s13906_s1 + $0x660] sm:$0xff]  }
  0x87   :  { %7207 = vmatprep.mubr.bf16.mxu1 %v587_v24  ;;  %v10769_v53 = vld [vmem:[%s13906_s1 + $0x530] sm:$0xff]   ;;  %v10795_v24 = vld [vmem:[%s13906_s1 + $0x6a0] sm:$0xff]  }
  0x88   :  { %9699 = vmatpush3.bf16.msra.mxu0 %v10716_v54  ;;  %v21_v54 = vld [vmem:[%s13905_s0 + $0x28] sm:$0xff] }
  0x89   :  { %9721 = vmatpush3.bf16.msra.mxu1 %v10717_v55  ;;  %9700 = vmatprep.subr.bf16.mxu0 %v10718_v56  ;;  %v10770_v55 = vld [vmem:[%s13906_s1 + $0x5b0] sm:$0xff]   ;;  %v156_v56 = vrot.slane %v21_v54, %v11521_v41 }
  0x8a   :  { %9722 = vmatprep.subr.bf16.mxu1 %v10719_v57  ;;  %v149_v57 = vcombine.high %v21_v54, %v21_v54  ;;  %v10815_v54 = vld [vmem:[%s13906_s1 + $0x708] sm:$0xff]  }
  0x8c   :  { %9701 = vmatpush3.bf16.msra.mxu0 %v10720_v58  ;;  %v10771_v58 = vld [vmem:[%s13906_s1 + $0x578] sm:$0xff]  }
  0x8d   :  { %9723 = vmatpush3.bf16.msra.mxu1 %v10721_v59  ;;  %9702 = vmatprep.subr.bf16.mxu0 %v10722_v60  ;;  %v10772_v59 = vld [vmem:[%s13906_s1 + $0x5f8] sm:$0xff]   ;;  %v164_v60 = vcombine.high %v156_v56, %v156_v56 }
  0x8e   :  { %9724 = vmatprep.subr.bf16.mxu1 %v10723_v61  ;;  %v163_v61 = vrot.slane %v149_v57, %v11521_v41  ;;  %v10818_v57 = vld [vmem:[%s13906_s1 + $0x7d0] sm:$0xff]  }
  0x90   :  { %9703 = vmatpush3.bf16.msra.mxu0 %v10724_v62  ;;  %v10773_v62 = vld [vmem:[%s13906_s1 + $0x538] sm:$0xff]  }
  0x91   :  { %9725 = vmatpush3.bf16.msra.mxu1 %v10725_v63  ;;  %9704 = vmatprep.subr.bf16.mxu0 %v10726_v0  ;;  %v10774_v63 = vld [vmem:[%s13906_s1 + $0x5b8] sm:$0xff]   ;;  %v589_v0 = vpack.c.bf16 %v164_v60, %v164_v60 }
  0x92   :  { %9726 = vmatprep.subr.bf16.mxu1 %v10727_v1  ;;  %v165_v1 = vcombine.high %v163_v61, %v163_v61  ;;  %v10821_v60 = vld [vmem:[%s13906_s1 + $0x758] sm:$0xff]  }
  0x94   :  { %9705 = vmatpush3.bf16.msra.mxu0 %v10728_v2  ;;  %v10776_v2 = vld [vmem:[%s13906_s1 + $0x640] sm:$0xff]  }
  0x95   :  { %9727 = vmatpush3.bf16.msra.mxu1 %v10729_v3  ;;  %9706 = vmatprep.subr.bf16.mxu0 %v10730_v4  ;;  %v591_v3 = vpack.c.bf16 %v165_v1, %v165_v1  ;;  %v10777_v4 = vld [vmem:[%s13906_s1 + $0x6c0] sm:$0xff]  }
  0x96   :  { %9728 = vmatprep.subr.bf16.mxu1 %v10731_v5  ;;  %v10778_v5 = vld [vmem:[%s13906_s1 + $0x600] sm:$0xff]  }
  0x97   :  { %v10826_v1 = vld [vmem:[%s13906_s1 + $0x7e0] sm:$0xff]  }
  0x98   :  { %9707 = vmatpush3.bf16.msra.mxu0 %v10732_v6  ;;  %v588_v6 = vpack.c.bf16 %v156_v56, %v156_v56  ;;  %v10817_v56 = vld [vmem:[%s13906_s1 + $0x750] sm:$0xff]  }
  0x99   :  { %9729 = vmatpush3.bf16.msra.mxu1 %v10733_v7  ;;  %9708 = vmatprep.subr.bf16.mxu0 %v10734_v8  ;;  %v590_v7 = vpack.c.bf16 %v163_v61, %v163_v61  ;;  %v10779_v8 = vld [vmem:[%s13906_s1 + $0x680] sm:$0xff]   ;;  %v10822_v61 = vld [vmem:[%s13906_s1 + $0x7d8] sm:$0xff]  }
  0x9a   :  { %9730 = vmatprep.subr.bf16.mxu1 %v10735_v9  ;;  %v10780_v9 = vld [vmem:[%s13906_s1 + $0x648] sm:$0xff]  }
  0x9c   :  { %9709 = vmatpush3.bf16.msra.mxu0 %v10736_v10  ;;  %v10781_v10 = vld [vmem:[%s13906_s1 + $0x6c8] sm:$0xff]  }
  0x9d   :  { %9731 = vmatpush3.bf16.msra.mxu1 %v10737_v12  ;;  %9710 = vmatprep.subr.bf16.mxu0 %v10738_v15  ;;  %v10783_v12 = vld [vmem:[%s13906_s1 + $0x688] sm:$0xff]   ;;  %v10786_v15 = vld [vmem:[%s13906_s1 + $0x610] sm:$0xff]  }
  0x9e   :  { %9732 = vmatprep.subr.bf16.mxu1 %v10739_v16  ;;  %v10787_v16 = vld [vmem:[%s13906_s1 + $0x690] sm:$0xff]  }
  0xa0   :  { %9711 = vmatpush3.bf16.msra.mxu0 %v10740_v19  ;;  %v10790_v19 = vld [vmem:[%s13906_s1 + $0x618] sm:$0xff]  }
  0xa1   :  { %9733 = vmatpush3.bf16.msra.mxu1 %v10741_v20  ;;  %9740 = vmatprep.subr.bf16.mxu0 %v10743_v23  ;;  %v10791_v20 = vld [vmem:[%s13906_s1 + $0x698] sm:$0xff]   ;;  %v10794_v23 = vld [vmem:[%s13906_s1 + $0x620] sm:$0xff]  }
  0xa2   :  { %9762 = vmatprep.subr.bf16.mxu1 %v10744_v25  ;;  %v10796_v25 = vld [vmem:[%s13906_s1 + $0x668] sm:$0xff]  }
  0xa3   :  { %7168 = vmatmul.mubr.bf16.vlgmr.msra.gmra.mrb[16].mxu0 %v584_v27  ;;  %v10798_v27 = vld [vmem:[%s13906_s1 + $0x628] sm:$0xff]  }
  0xa4   :  { %7208 = vmatmul.mubr.bf16.vlgmr.msra.gmra.mrb[16].mxu1 %v586_v28  ;;  %9741 = vmatpush3.bf16.msra.mxu0 %v10745_v26  ;;  %v10797_v26 = vld [vmem:[%s13906_s1 + $0x6e8] sm:$0xff]  }
  0xa5   :  { %9763 = vmatpush3.bf16.msra.mxu1 %v10746_v29  ;;  %9742 = vmatprep.subr.bf16.mxu0 %v10747_v30  ;;  %v10799_v28 = vld [vmem:[%s13906_s1 + $0x6a8] sm:$0xff]   ;;  %v10800_v29 = vld [vmem:[%s13906_s1 + $0x670] sm:$0xff]  }
  0xa6   :  { %9764 = vmatprep.subr.bf16.mxu1 %v10748_v31  ;;  %7247 = vmatprep.mubr.bf16.mxu0 %v589_v0  ;;  %v10801_v30 = vld [vmem:[%s13906_s1 + $0x6f0] sm:$0xff]   ;;  %v10825_v0 = vld [vmem:[%s13906_s1 + $0x760] sm:$0xff]  }
  0xa7   :  { %7287 = vmatprep.mubr.bf16.mxu1 %v591_v3  ;;  %v10802_v31 = vld [vmem:[%s13906_s1 + $0x630] sm:$0xff]   ;;  %v10828_v3 = vld [vmem:[%s13906_s1 + $0x7a0] sm:$0xff]  }
  0xa8   :  { %9743 = vmatpush3.bf16.msra.mxu0 %v10749_v32  ;;  %v10803_v32 = vld [vmem:[%s13906_s1 + $0x6b0] sm:$0xff]  }
  0xa9   :  { %9765 = vmatpush3.bf16.msra.mxu1 %v10750_v33  ;;  %9744 = vmatprep.subr.bf16.mxu0 %v10751_v34  ;;  %v22_v33 = vld [vmem:[%s13905_s0 + $0x30] sm:$0xff]  ;;  %v10804_v34 = vld [vmem:[%s13906_s1 + $0x678] sm:$0xff]  }
  0xaa   :  { %9766 = vmatprep.subr.bf16.mxu1 %v10752_v35  ;;  %v173_v35 = vrot.slane %v22_v33, %v11521_v41 }
  0xac   :  { %9745 = vmatpush3.bf16.msra.mxu0 %v10753_v36  ;;  %v166_v36 = vcombine.high %v22_v33, %v22_v33 }
  0xad   :  { %9767 = vmatpush3.bf16.msra.mxu1 %v10754_v37  ;;  %9746 = vmatprep.subr.bf16.mxu0 %v10755_v38  ;;  %v10805_v37 = vld [vmem:[%s13906_s1 + $0x6f8] sm:$0xff]  }
  0xae   :  { %9768 = vmatprep.subr.bf16.mxu1 %v10756_v39  ;;  %v10806_v38 = vld [vmem:[%s13906_s1 + $0x638] sm:$0xff]   ;;  %v181_v39 = vcombine.high %v173_v35, %v173_v35 }
  0xb0   :  { %9747 = vmatpush3.bf16.msra.mxu0 %v10757_v40  ;;  %v180_v40 = vrot.slane %v166_v36, %v11521_v41 }
  0xb1   :  { %9769 = vmatpush3.bf16.msra.mxu1 %v10758_v42  ;;  %9748 = vmatprep.subr.bf16.mxu0 %v10759_v43  ;;  %v10807_v42 = vld [vmem:[%s13906_s1 + $0x6b8] sm:$0xff]   ;;  %v593_v43 = vpack.c.bf16 %v181_v39, %v181_v39 }
  0xb2   :  { %9770 = vmatprep.subr.bf16.mxu1 %v10760_v44  ;;  %v182_v44 = vcombine.high %v180_v40, %v180_v40 }
  0xb4   :  { %9749 = vmatpush3.bf16.msra.mxu0 %v10761_v45  ;;  %v10809_v45 = vld [vmem:[%s13906_s1 + $0x740] sm:$0xff]  }
  0xb5   :  { %9771 = vmatpush3.bf16.msra.mxu1 %v10762_v46  ;;  %9750 = vmatprep.subr.bf16.mxu0 %v10763_v47  ;;  %v10810_v46 = vld [vmem:[%s13906_s1 + $0x7c0] sm:$0xff]   ;;  %v595_v47 = vpack.c.bf16 %v182_v44, %v182_v44  ;;  %v10846_v44 = vld [vmem:[%s13906_s1 + $0x848] sm:$0xff]  }
  0xb6   :  { %9772 = vmatprep.subr.bf16.mxu1 %v10764_v48  ;;  %v10811_v48 = vld [vmem:[%s13906_s1 + $0x700] sm:$0xff]  }
  0xb8   :  { %9751 = vmatpush3.bf16.msra.mxu0 %v10765_v49  ;;  %v592_v49 = vpack.c.bf16 %v173_v35, %v173_v35 }
  0xb9   :  { %9773 = vmatpush3.bf16.msra.mxu1 %v10766_v50  ;;  %9752 = vmatprep.subr.bf16.mxu0 %v10767_v51  ;;  %v594_v50 = vpack.c.bf16 %v180_v40, %v180_v40  ;;  %v10812_v51 = vld [vmem:[%s13906_s1 + $0x780] sm:$0xff]  }
  0xba   :  { %9774 = vmatprep.subr.bf16.mxu1 %v10768_v52  ;;  %v10813_v52 = vld [vmem:[%s13906_s1 + $0x748] sm:$0xff]  }
  0xbc   :  { %9753 = vmatpush3.bf16.msra.mxu0 %v10769_v53  ;;  %v10814_v53 = vld [vmem:[%s13906_s1 + $0x7c8] sm:$0xff]  }
  0xbd   :  { %9775 = vmatpush3.bf16.msra.mxu1 %v10770_v55  ;;  %9754 = vmatprep.subr.bf16.mxu0 %v10771_v58  ;;  %v10816_v55 = vld [vmem:[%s13906_s1 + $0x788] sm:$0xff]   ;;  %v10819_v58 = vld [vmem:[%s13906_s1 + $0x710] sm:$0xff]  }
  0xbe   :  { %9776 = vmatprep.subr.bf16.mxu1 %v10772_v59  ;;  %v10820_v59 = vld [vmem:[%s13906_s1 + $0x790] sm:$0xff]  }
  0xc0   :  { %9755 = vmatpush3.bf16.msra.mxu0 %v10773_v62  ;;  %v10823_v62 = vld [vmem:[%s13906_s1 + $0x718] sm:$0xff]  }
  0xc1   :  { %9777 = vmatpush3.bf16.msra.mxu1 %v10774_v63  ;;  %9784 = vmatprep.subr.bf16.mxu0 %v10776_v2  ;;  %v10824_v63 = vld [vmem:[%s13906_s1 + $0x798] sm:$0xff]   ;;  %v10827_v2 = vld [vmem:[%s13906_s1 + $0x720] sm:$0xff]  }
  0xc2   :  { %9806 = vmatprep.subr.bf16.mxu1 %v10777_v4  ;;  %v10829_v4 = vld [vmem:[%s13906_s1 + $0x768] sm:$0xff]  }
  0xc3   :  { %7248 = vmatmul.mubr.bf16.vlgmr.msra.gmra.mrb[20].mxu0 %v588_v6  ;;  %v10831_v6 = vld [vmem:[%s13906_s1 + $0x728] sm:$0xff]  }
  0xc4   :  { %7288 = vmatmul.mubr.bf16.vlgmr.msra.gmra.mrb[20].mxu1 %v590_v7  ;;  %9785 = vmatpush3.bf16.msra.mxu0 %v10778_v5  ;;  %v10830_v5 = vld [vmem:[%s13906_s1 + $0x7e8] sm:$0xff]  }
  0xc5   :  { %9807 = vmatpush3.bf16.msra.mxu1 %v10779_v8  ;;  %9786 = vmatprep.subr.bf16.mxu0 %v10780_v9  ;;  %v10832_v7 = vld [vmem:[%s13906_s1 + $0x7a8] sm:$0xff]   ;;  %v10833_v8 = vld [vmem:[%s13906_s1 + $0x770] sm:$0xff]   ;;  %v8751_v9 = vld [vmem:[%s13907_s2] ss:$0 sm:$0xff] }
  0xc6   :  { %9808 = vmatprep.subr.bf16.mxu1 %v10781_v10  ;;  %7327 = vmatprep.mubr.bf16.mxu0 %v593_v43  ;;  %v10834_v10 = vld [vmem:[%s13906_s1 + $0x7f0] sm:$0xff]   ;;  %v10845_v43 = vld [vmem:[%s13906_s1 + $0x880] sm:$0xff]  }
  0xc7   :  { %7367 = vmatprep.mubr.bf16.mxu1 %v595_v47  ;;  %v10849_v47 = vld [vmem:[%s13906_s1 + $0x888] sm:$0xff]  }
  0xc8   :  { %9787 = vmatpush3.bf16.msra.mxu0 %v10782_v11 }
  0xc9   :  { %9809 = vmatpush3.bf16.msra.mxu1 %v10783_v12  ;;  %9788 = vmatprep.subr.bf16.mxu0 %v10784_v13  ;;  %v10835_v13 = vld [vmem:[%s13906_s1 + $0x730] sm:$0xff]  }
  0xca   :  { %9810 = vmatprep.subr.bf16.mxu1 %v10785_v14  ;;  %v10836_v14 = vld [vmem:[%s13906_s1 + $0x7b0] sm:$0xff]  }
  0xcc   :  { %9789 = vmatpush3.bf16.msra.mxu0 %v10786_v15 }
  0xcd   :  { %9811 = vmatpush3.bf16.msra.mxu1 %v10787_v16  ;;  %9790 = vmatprep.subr.bf16.mxu0 %v10788_v17  ;;  %v10837_v17 = vld [vmem:[%s13906_s1 + $0x778] sm:$0xff]  }
  0xce   :  { %9812 = vmatprep.subr.bf16.mxu1 %v10789_v18 }
  0xd0   :  { %9791 = vmatpush3.bf16.msra.mxu0 %v10790_v19 }
  0xd1   :  { %9813 = vmatpush3.bf16.msra.mxu1 %v10791_v20  ;;  %9792 = vmatprep.subr.bf16.mxu0 %v10792_v21 }
  0xd2   :  { %9814 = vmatprep.subr.bf16.mxu1 %v10793_v22  ;;  %v10838_v22 = vld [vmem:[%s13906_s1 + $0x7f8] sm:$0xff]  }
  0xd4   :  { %9793 = vmatpush3.bf16.msra.mxu0 %v10794_v23  ;;  %v23_v23 = vld [vmem:[%s13905_s0 + $0x38] sm:$0xff] }
  0xd5   :  { %9815 = vmatpush3.bf16.msra.mxu1 %v10795_v24  ;;  %9794 = vmatprep.subr.bf16.mxu0 %v10796_v25 }
  0xd6   :  { %9816 = vmatprep.subr.bf16.mxu1 %v10797_v26  ;;  %v190_v26 = vrot.slane %v23_v23, %v11521_v41 }
  0xd8   :  { %9795 = vmatpush3.bf16.msra.mxu0 %v10798_v27  ;;  %v183_v27 = vcombine.high %v23_v23, %v23_v23  ;;  %v596_v40 = vpack.c.bf16 %v190_v26, %v190_v26 }
  0xd9   :  { %9817 = vmatpush3.bf16.msra.mxu1 %v10799_v28  ;;  %9796 = vmatprep.subr.bf16.mxu0 %v10800_v29  ;;  %v10839_v29 = vld [vmem:[%s13906_s1 + $0x738] sm:$0xff]  }
  0xda   :  { %9818 = vmatprep.subr.bf16.mxu1 %v10801_v30  ;;  %v10840_v30 = vld [vmem:[%s13906_s1 + $0x7b8] sm:$0xff]  }
  0xdc   :  { %9797 = vmatpush3.bf16.msra.mxu0 %v10802_v31  ;;  %v198_v31 = vcombine.high %v190_v26, %v190_v26  ;;  %v10876_v26 = vld [vmem:[%s13906_s1 + $0x9c0] sm:$0xff]  }
  0xdd   :  { %9819 = vmatpush3.bf16.msra.mxu1 %v10803_v32  ;;  %9798 = vmatprep.subr.bf16.mxu0 %v10804_v34  ;;  %v197_v32 = vrot.slane %v183_v27, %v11521_v41  ;;  %v10842_v34 = vld [vmem:[%s13906_s1 + $0x840] sm:$0xff]  }
  0xde   :  { %9820 = vmatprep.subr.bf16.mxu1 %v10805_v37  ;;  %v597_v35 = vpack.c.bf16 %v198_v31, %v198_v31  ;;  %v10843_v37 = vld [vmem:[%s13906_s1 + $0x8c0] sm:$0xff]  }
  0xdf   :  { %v199_v36 = vcombine.high %v197_v32, %v197_v32 }
  0xe0   :  { %9799 = vmatpush3.bf16.msra.mxu0 %v10806_v38  ;;  %v10844_v38 = vld [vmem:[%s13906_s1 + $0x800] sm:$0xff]  }
  0xe1   :  { %9821 = vmatpush3.bf16.msra.mxu1 %v10807_v42  ;;  %9828 = vmatprep.subr.bf16.mxu0 %v10809_v45  ;;  %v599_v39 = vpack.c.bf16 %v199_v36, %v199_v36  ;;  %v598_v42 = vpack.c.bf16 %v197_v32, %v197_v32  ;;  %v10847_v45 = vld [vmem:[%s13906_s1 + $0x8c8] sm:$0xff]   ;;  %v10878_v32 = vld [vmem:[%s13906_s1 + $0x980] sm:$0xff]  }
  0xe2   :  { %9850 = vmatprep.subr.bf16.mxu1 %v10810_v46  ;;  %v10848_v46 = vld [vmem:[%s13906_s1 + $0x808] sm:$0xff]  }
  0xe3   :  { %7328 = vmatmul.mubr.bf16.vlgmr.msra.gmra.mrb[24].mxu0 %v592_v49  ;;  %v10851_v49 = vld [vmem:[%s13906_s1 + $0x8d0] sm:$0xff]   ;;  %v10881_v36 = vld [vmem:[%s13906_s1 + $0x908] sm:$0xff]  }
  0xe4   :  { %7368 = vmatmul.mubr.bf16.vlgmr.msra.gmra.mrb[24].mxu1 %v594_v50  ;;  %9829 = vmatpush3.bf16.msra.mxu0 %v10811_v48  ;;  %v10850_v48 = vld [vmem:[%s13906_s1 + $0x850] sm:$0xff]  }
  0xe5   :  { %9851 = vmatpush3.bf16.msra.mxu1 %v10812_v51  ;;  %9830 = vmatprep.subr.bf16.mxu0 %v10813_v52  ;;  %v10852_v50 = vld [vmem:[%s13906_s1 + $0x810] sm:$0xff]   ;;  %v10854_v52 = vld [vmem:[%s13906_s1 + $0x858] sm:$0xff]  }
  0xe6   :  { %9852 = vmatprep.subr.bf16.mxu1 %v10814_v53  ;;  %7407 = vmatprep.mubr.bf16.mxu0 %v597_v35  ;;  %v10853_v51 = vld [vmem:[%s13906_s1 + $0x890] sm:$0xff]   ;;  %v10855_v53 = vld [vmem:[%s13906_s1 + $0x8d8] sm:$0xff]   ;;  %v10880_v35 = vld [vmem:[%s13906_s1 + $0x9c8] sm:$0xff]  }
  0xe7   :  { %7447 = vmatprep.mubr.bf16.mxu1 %v599_v39  ;;  %v10884_v39 = vld [vmem:[%s13906_s1 + $0x9d0] sm:$0xff]  }
  0xe8   :  { %9831 = vmatpush3.bf16.msra.mxu0 %v10815_v54  ;;  %v10856_v54 = vld [vmem:[%s13906_s1 + $0x818] sm:$0xff]  }
  0xe9   :  { %9853 = vmatpush3.bf16.msra.mxu1 %v10816_v55  ;;  %9832 = vmatprep.subr.bf16.mxu0 %v10817_v56  ;;  %v10857_v55 = vld [vmem:[%s13906_s1 + $0x898] sm:$0xff]   ;;  %v10858_v56 = vld [vmem:[%s13906_s1 + $0x860] sm:$0xff]  }
  0xea   :  { %9854 = vmatprep.subr.bf16.mxu1 %v10818_v57  ;;  %v10859_v57 = vld [vmem:[%s13906_s1 + $0x8e0] sm:$0xff]  }
  0xec   :  { %9833 = vmatpush3.bf16.msra.mxu0 %v10819_v58  ;;  %v10860_v58 = vld [vmem:[%s13906_s1 + $0x820] sm:$0xff]  }
  0xed   :  { %9855 = vmatpush3.bf16.msra.mxu1 %v10820_v59  ;;  %9834 = vmatprep.subr.bf16.mxu0 %v10821_v60  ;;  %v10861_v59 = vld [vmem:[%s13906_s1 + $0x8a0] sm:$0xff]   ;;  %v10862_v60 = vld [vmem:[%s13906_s1 + $0x868] sm:$0xff]  }
  0xee   :  { %9856 = vmatprep.subr.bf16.mxu1 %v10822_v61  ;;  %v10863_v61 = vld [vmem:[%s13906_s1 + $0x8e8] sm:$0xff]  }
  0xf0   :  { %9835 = vmatpush3.bf16.msra.mxu0 %v10823_v62  ;;  %v10864_v62 = vld [vmem:[%s13906_s1 + $0x828] sm:$0xff]  }
  0xf1   :  { %9857 = vmatpush3.bf16.msra.mxu1 %v10824_v63  ;;  %9836 = vmatprep.subr.bf16.mxu0 %v10825_v0  ;;  %v10865_v63 = vld [vmem:[%s13906_s1 + $0x8a8] sm:$0xff]   ;;  %v10866_v0 = vld [vmem:[%s13906_s1 + $0x870] sm:$0xff]  }
  0xf2   :  { %9858 = vmatprep.subr.bf16.mxu1 %v10826_v1  ;;  %v10867_v1 = vld [vmem:[%s13906_s1 + $0x8f0] sm:$0xff]  }
  0xf4   :  { %9837 = vmatpush3.bf16.msra.mxu0 %v10827_v2 }
  0xf5   :  { %9859 = vmatpush3.bf16.msra.mxu1 %v10828_v3  ;;  %9838 = vmatprep.subr.bf16.mxu0 %v10829_v4  ;;  %v10868_v4 = vld [vmem:[%s13906_s1 + $0x830] sm:$0xff]  }
  0xf6   :  { %9860 = vmatprep.subr.bf16.mxu1 %v10830_v5  ;;  %v9536_v11 = vpop.f32.mrb[0].mxu0  ;;  %v10869_v5 = vld [vmem:[%s13906_s1 + $0x8b0] sm:$0xff]  }
  0xf7   :  { %v9558_v12 = vpop.f32.mrb[0].mxu1  ;;  %v9537_v15 = vpop.f32.mrb[1].mxu0 }
  0xf8   :  { %v9559_v16 = vpop.f32.mrb[1].mxu1  ;;  %v9538_v18 = vadd.f32 %v9537_v15, %v9536_v11  ;;  %v9539_v20 = vpop.f32.mrb[2].mxu0  ;;  %9839 = vmatpush3.bf16.msra.mxu0 %v10831_v6  ;;  %v10871_v15 = vld [vmem:[%s13906_s1 + $0x8f8] sm:$0xff]  }
  0xf9   :  { %v9560_v19 = vadd.f32 %v9559_v16, %v9558_v12  ;;  %v9561_v21 = vpop.f32.mrb[2].mxu1  ;;  %9861 = vmatpush3.bf16.msra.mxu1 %v10832_v7  ;;  %v9540_v24 = vpop.f32.mrb[3].mxu0  ;;  %9840 = vmatprep.subr.bf16.mxu0 %v10833_v8  ;;  %v10870_v8 = vld [vmem:[%s13906_s1 + $0x878] sm:$0xff]   ;;  %v24_v16 = vld [vmem:[%s13905_s0 + $0x40] sm:$0xff] }
  0xfa   :  { %v9562_v25 = vpop.f32.mrb[3].mxu1  ;;  %9862 = vmatprep.subr.bf16.mxu1 %v10834_v10  ;;  %v6850_v28 = vadd.f32 %v9538_v18, %v8751_v9  ;;  %v10872_v18 = vld [vmem:[%s13906_s1 + $0x838] sm:$0xff]   ;;  %v200_v20 = vcombine.high %v24_v16, %v24_v16 }
  0xfb   :  { %v10873_v21 = vld [vmem:[%s13906_s1 + $0x8b8] sm:$0xff]   ;;  %v10875_v25 = vld [vmem:[%s13906_s1 + $0x940] sm:$0xff]  }
  0xfc   :  { %v12229_v33 = vadd.f32 %v9560_v19, %v6850_v28  ;;  %9841 = vmatpush3.bf16.msra.mxu0 %v10835_v13  ;;  %v207_v19 = vrot.slane %v24_v16, %v11521_v41  ;;  %v214_v24 = vrot.slane %v200_v20, %v11521_v41  ;;  %v10908_v16 = vld [vmem:[%s13906_s1 + $0xa40] sm:$0xff]  }
  0xfd   :  { %9863 = vmatpush3.bf16.msra.mxu1 %v10836_v14  ;;  %9842 = vmatprep.subr.bf16.mxu0 %v10837_v17 }
  0xfe   :  { %9864 = vmatprep.subr.bf16.mxu1 %v10838_v22  ;;  %v215_v23 = vcombine.high %v207_v19, %v207_v19  ;;  %v216_v28 = vcombine.high %v214_v24, %v214_v24  ;;  %v602_v31 = vpack.c.bf16 %v214_v24, %v214_v24 }
 0x100   :  { %9843 = vmatpush3.bf16.msra.mxu0 %v10839_v29  ;;  %v601_v27 = vpack.c.bf16 %v215_v23, %v215_v23  ;;  %v10877_v29 = vld [vmem:[%s13906_s1 + $0x900] sm:$0xff]  }
 0x101   :  { %9865 = vmatpush3.bf16.msra.mxu1 %v10840_v30  ;;  %9872 = vmatprep.subr.bf16.mxu0 %v10842_v34  ;;  %v600_v30 = vpack.c.bf16 %v207_v19, %v207_v19  ;;  %v10879_v34 = vld [vmem:[%s13906_s1 + $0x948] sm:$0xff]   ;;  %v10911_v23 = vld [vmem:[%s13906_s1 + $0xa80] sm:$0xff]  }
 0x102   :  { %9894 = vmatprep.subr.bf16.mxu1 %v10843_v37  ;;  %v10882_v37 = vld [vmem:[%s13906_s1 + $0x988] sm:$0xff]  }
 0x103   :  { %7408 = vmatmul.mubr.bf16.vlgmr.msra.gmra.mrb[28].mxu0 %v596_v40  ;;  %v10885_v40 = vld [vmem:[%s13906_s1 + $0x910] sm:$0xff]  }
 0x104   :  { %7448 = vmatmul.mubr.bf16.vlgmr.msra.gmra.mrb[28].mxu1 %v598_v42  ;;  %9873 = vmatpush3.bf16.msra.mxu0 %v10844_v38  ;;  %v10883_v38 = vld [vmem:[%s13906_s1 + $0x950] sm:$0xff]  }
 0x105   :  { %9895 = vmatpush3.bf16.msra.mxu1 %v10845_v43  ;;  %9874 = vmatprep.subr.bf16.mxu0 %v10846_v44  ;;  %v10886_v42 = vld [vmem:[%s13906_s1 + $0x990] sm:$0xff]   ;;  %v10887_v43 = vld [vmem:[%s13906_s1 + $0x958] sm:$0xff]  }
 0x106   :  { %9896 = vmatprep.subr.bf16.mxu1 %v10847_v45  ;;  %7487 = vmatprep.mubr.bf16.mxu0 %v601_v27  ;;  %v10888_v44 = vld [vmem:[%s13906_s1 + $0x9d8] sm:$0xff]   ;;  %v10914_v27 = vld [vmem:[%s13906_s1 + $0xa08] sm:$0xff]  }
 0x107   :  { %v10889_v45 = vld [vmem:[%s13906_s1 + $0x918] sm:$0xff]  }
 0x108   :  { %9875 = vmatpush3.bf16.msra.mxu0 %v10848_v46  ;;  %v10890_v46 = vld [vmem:[%s13906_s1 + $0x998] sm:$0xff]  }
 0x109   :  { %9897 = vmatpush3.bf16.msra.mxu1 %v10849_v47  ;;  %9876 = vmatprep.subr.bf16.mxu0 %v10850_v48  ;;  %v10891_v47 = vld [vmem:[%s13906_s1 + $0x960] sm:$0xff]  }
 0x10a   :  { %9898 = vmatprep.subr.bf16.mxu1 %v10851_v49  ;;  %v10892_v48 = vld [vmem:[%s13906_s1 + $0x9e0] sm:$0xff]  }
 0x10b   :  { %v10893_v49 = vld [vmem:[%s13906_s1 + $0x920] sm:$0xff]  }
 0x10c   :  { %9877 = vmatpush3.bf16.msra.mxu0 %v10852_v50  ;;  %v10894_v50 = vld [vmem:[%s13906_s1 + $0x9a0] sm:$0xff]  }
 0x10d   :  { %9899 = vmatpush3.bf16.msra.mxu1 %v10853_v51  ;;  %9878 = vmatprep.subr.bf16.mxu0 %v10854_v52  ;;  %v10895_v51 = vld [vmem:[%s13906_s1 + $0x968] sm:$0xff]  }
 0x10e   :  { %9900 = vmatprep.subr.bf16.mxu1 %v10855_v53  ;;  %v10896_v52 = vld [vmem:[%s13906_s1 + $0x9e8] sm:$0xff]  }
 0x10f   :  { %v10897_v53 = vld [vmem:[%s13906_s1 + $0x928] sm:$0xff]  }
 0x110   :  { %9879 = vmatpush3.bf16.msra.mxu0 %v10856_v54  ;;  %v10898_v54 = vld [vmem:[%s13906_s1 + $0x9a8] sm:$0xff]  }
 0x111   :  { %9901 = vmatpush3.bf16.msra.mxu1 %v10857_v55  ;;  %9880 = vmatprep.subr.bf16.mxu0 %v10858_v56  ;;  %v10899_v55 = vld [vmem:[%s13906_s1 + $0x970] sm:$0xff]  }
 0x112   :  { %9902 = vmatprep.subr.bf16.mxu1 %v10859_v57  ;;  %v10900_v56 = vld [vmem:[%s13906_s1 + $0x9f0] sm:$0xff]  }
 0x114   :  { %9881 = vmatpush3.bf16.msra.mxu0 %v10860_v58 }
 0x115   :  { %9903 = vmatpush3.bf16.msra.mxu1 %v10861_v59  ;;  %9882 = vmatprep.subr.bf16.mxu0 %v10862_v60  ;;  %v10901_v59 = vld [vmem:[%s13906_s1 + $0x930] sm:$0xff]  }
 0x116   :  { %9904 = vmatprep.subr.bf16.mxu1 %v10863_v61  ;;  %v9580_v2 = vpop.f32.mrb[4].mxu0  ;;  %v10902_v60 = vld [vmem:[%s13906_s1 + $0x9b0] sm:$0xff]  }
 0x117   :  { %v9602_v3 = vpop.f32.mrb[4].mxu1  ;;  %v9581_v6 = vpop.f32.mrb[5].mxu0 }
 0x118   :  { %v9603_v7 = vpop.f32.mrb[5].mxu1  ;;  %v9582_v9 = vadd.f32 %v9581_v6, %v9580_v2  ;;  %v9583_v11 = vpop.f32.mrb[6].mxu0  ;;  %9883 = vmatpush3.bf16.msra.mxu0 %v10864_v62  ;;  %v10904_v6 = vld [vmem:[%s13906_s1 + $0x9f8] sm:$0xff]  }
 0x119   :  { %v9604_v10 = vadd.f32 %v9603_v7, %v9602_v3  ;;  %v9605_v12 = vpop.f32.mrb[6].mxu1  ;;  %9905 = vmatpush3.bf16.msra.mxu1 %v10865_v63  ;;  %v9584_v13 = vpop.f32.mrb[7].mxu0  ;;  %9884 = vmatprep.subr.bf16.mxu0 %v10866_v0 }
 0x11a   :  { %v9606_v14 = vpop.f32.mrb[7].mxu1  ;;  %9906 = vmatprep.subr.bf16.mxu1 %v10867_v1  ;;  %v6930_v17 = vadd.f32 %v9582_v9, %v12229_v33  ;;  %v603_v33 = vpack.c.bf16 %v216_v28, %v216_v28  ;;  %v10905_v9 = vld [vmem:[%s13906_s1 + $0x938] sm:$0xff]   ;;  %v10915_v28 = vld [vmem:[%s13906_s1 + $0xa88] sm:$0xff]  }
 0x11b   :  { %v10906_v13 = vld [vmem:[%s13906_s1 + $0x9b8] sm:$0xff]  }
 0x11c   :  { %v12332_v22 = vadd.f32 %v9604_v10, %v6930_v17  ;;  %9885 = vmatpush3.bf16.msra.mxu0 %v10868_v4  ;;  %7527 = vmatprep.mubr.bf16.mxu1 %v603_v33  ;;  %v10909_v17 = vld [vmem:[%s13906_s1 + $0xac0] sm:$0xff]   ;;  %v10920_v33 = vld [vmem:[%s13906_s1 + $0xa58] sm:$0xff]  }
 0x11d   :  { %9907 = vmatpush3.bf16.msra.mxu1 %v10869_v5  ;;  %9886 = vmatprep.subr.bf16.mxu0 %v10870_v8  ;;  %v10903_v5 = vld [vmem:[%s13906_s1 + $0x978] sm:$0xff]   ;;  %v25_v8 = vld [vmem:[%s13905_s0 + $0x48] sm:$0xff] }
 0x11e   :  { %9908 = vmatprep.subr.bf16.mxu1 %v10871_v15  ;;  %v224_v10 = vrot.slane %v25_v8, %v11521_v41  ;;  %v217_v11 = vcombine.high %v25_v8, %v25_v8  ;;  %v10942_v8 = vld [vmem:[%s13906_s1 + $0xbc0] sm:$0xff]  }
 0x120   :  { %9887 = vmatpush3.bf16.msra.mxu0 %v10872_v18  ;;  %v232_v14 = vcombine.high %v224_v10, %v224_v10  ;;  %v231_v15 = vrot.slane %v217_v11, %v11521_v41  ;;  %v604_v20 = vpack.c.bf16 %v224_v10, %v224_v10  ;;  %v10943_v10 = vld [vmem:[%s13906_s1 + $0xb00] sm:$0xff]  }
 0x121   :  { %9909 = vmatpush3.bf16.msra.mxu1 %v10873_v21  ;;  %9916 = vmatprep.subr.bf16.mxu0 %v10875_v25  ;;  %v10910_v21 = vld [vmem:[%s13906_s1 + $0xa00] sm:$0xff]   ;;  %v10912_v25 = vld [vmem:[%s13906_s1 + $0xa48] sm:$0xff]  }
 0x122   :  { %9938 = vmatprep.subr.bf16.mxu1 %v10876_v26  ;;  %v605_v18 = vpack.c.bf16 %v232_v14, %v232_v14  ;;  %v233_v19 = vcombine.high %v231_v15, %v231_v15  ;;  %v10913_v26 = vld [vmem:[%s13906_s1 + $0xac8] sm:$0xff]  }
 0x123   :  { %7488 = vmatmul.mubr.bf16.vlgmr.msra.gmra.mrb[32].mxu0 %v600_v30  ;;  %v10917_v30 = vld [vmem:[%s13906_s1 + $0xad0] sm:$0xff]  }
 0x124   :  { %7528 = vmatmul.mubr.bf16.vlgmr.msra.gmra.mrb[32].mxu1 %v602_v31  ;;  %9917 = vmatpush3.bf16.msra.mxu0 %v10877_v29  ;;  %v607_v24 = vpack.c.bf16 %v233_v19, %v233_v19  ;;  %v10916_v29 = vld [vmem:[%s13906_s1 + $0xa50] sm:$0xff]   ;;  %v10948_v19 = vld [vmem:[%s13906_s1 + $0xb88] sm:$0xff]  }
 0x125   :  { %9939 = vmatpush3.bf16.msra.mxu1 %v10878_v32  ;;  %9918 = vmatprep.subr.bf16.mxu0 %v10879_v34  ;;  %v10918_v31 = vld [vmem:[%s13906_s1 + $0xa10] sm:$0xff]   ;;  %v10921_v34 = vld [vmem:[%s13906_s1 + $0xad8] sm:$0xff]  }
 0x126   :  { %9940 = vmatprep.subr.bf16.mxu1 %v10880_v35  ;;  %7567 = vmatprep.mubr.bf16.mxu0 %v605_v18  ;;  %v10919_v32 = vld [vmem:[%s13906_s1 + $0xa90] sm:$0xff]   ;;  %v10922_v35 = vld [vmem:[%s13906_s1 + $0xa18] sm:$0xff]   ;;  %v10947_v18 = vld [vmem:[%s13906_s1 + $0xb08] sm:$0xff]  }
 0x127   :  { %7607 = vmatprep.mubr.bf16.mxu1 %v607_v24  ;;  %v10953_v24 = vld [vmem:[%s13906_s1 + $0xb58] sm:$0xff]  }
 0x128   :  { %9919 = vmatpush3.bf16.msra.mxu0 %v10881_v36  ;;  %v10923_v36 = vld [vmem:[%s13906_s1 + $0xa98] sm:$0xff]  }
 0x129   :  { %9941 = vmatpush3.bf16.msra.mxu1 %v10882_v37  ;;  %9920 = vmatprep.subr.bf16.mxu0 %v10883_v38  ;;  %v10924_v37 = vld [vmem:[%s13906_s1 + $0xa60] sm:$0xff]  }
 0x12a   :  { %9942 = vmatprep.subr.bf16.mxu1 %v10884_v39  ;;  %v10925_v38 = vld [vmem:[%s13906_s1 + $0xae0] sm:$0xff]  }
 0x12b   :  { %v10926_v39 = vld [vmem:[%s13906_s1 + $0xa20] sm:$0xff]  }
 0x12c   :  { %9921 = vmatpush3.bf16.msra.mxu0 %v10885_v40  ;;  %v10927_v40 = vld [vmem:[%s13906_s1 + $0xaa0] sm:$0xff]  }
 0x12d   :  { %9943 = vmatpush3.bf16.msra.mxu1 %v10886_v42  ;;  %9922 = vmatprep.subr.bf16.mxu0 %v10887_v43  ;;  %v10928_v42 = vld [vmem:[%s13906_s1 + $0xa68] sm:$0xff]  }
 0x12e   :  { %9944 = vmatprep.subr.bf16.mxu1 %v10888_v44  ;;  %v10929_v43 = vld [vmem:[%s13906_s1 + $0xae8] sm:$0xff]  }
 0x12f   :  { %v10930_v44 = vld [vmem:[%s13906_s1 + $0xa28] sm:$0xff]  }
 0x130   :  { %9923 = vmatpush3.bf16.msra.mxu0 %v10889_v45  ;;  %v10931_v45 = vld [vmem:[%s13906_s1 + $0xaa8] sm:$0xff]  }
 0x131   :  { %9945 = vmatpush3.bf16.msra.mxu1 %v10890_v46  ;;  %9924 = vmatprep.subr.bf16.mxu0 %v10891_v47  ;;  %v10932_v46 = vld [vmem:[%s13906_s1 + $0xa70] sm:$0xff]  }
 0x132   :  { %9946 = vmatprep.subr.bf16.mxu1 %v10892_v48 }
 0x134   :  { %9925 = vmatpush3.bf16.msra.mxu0 %v10893_v49  ;;  %v10933_v49 = vld [vmem:[%s13906_s1 + $0xaf0] sm:$0xff]  }
 0x135   :  { %9947 = vmatpush3.bf16.msra.mxu1 %v10894_v50  ;;  %9926 = vmatprep.subr.bf16.mxu0 %v10895_v51  ;;  %v10934_v50 = vld [vmem:[%s13906_s1 + $0xa30] sm:$0xff]  }
 0x136   :  { %9948 = vmatprep.subr.bf16.mxu1 %v10896_v52  ;;  %v9624_v57 = vpop.f32.mrb[8].mxu0 }
 0x137   :  { %v9646_v58 = vpop.f32.mrb[8].mxu1  ;;  %v9625_v61 = vpop.f32.mrb[9].mxu0 }
 0x138   :  { %v9647_v62 = vpop.f32.mrb[9].mxu1  ;;  %v9626_v63 = vadd.f32 %v9625_v61, %v9624_v57  ;;  %v9627_v1 = vpop.f32.mrb[10].mxu0  ;;  %9927 = vmatpush3.bf16.msra.mxu0 %v10897_v53  ;;  %v10935_v53 = vld [vmem:[%s13906_s1 + $0xab0] sm:$0xff]   ;;  %v10937_v61 = vld [vmem:[%s13906_s1 + $0xaf8] sm:$0xff]  }
 0x139   :  { %v9648_v0 = vadd.f32 %v9647_v62, %v9646_v58  ;;  %v9649_v2 = vpop.f32.mrb[10].mxu1  ;;  %9949 = vmatpush3.bf16.msra.mxu1 %v10898_v54  ;;  %v9628_v3 = vpop.f32.mrb[11].mxu0  ;;  %9928 = vmatprep.subr.bf16.mxu0 %v10899_v55 }
 0x13a   :  { %v9650_v4 = vpop.f32.mrb[11].mxu1  ;;  %9950 = vmatprep.subr.bf16.mxu1 %v10900_v56  ;;  %v7010_v7 = vadd.f32 %v9626_v63, %v12332_v22  ;;  %v606_v22 = vpack.c.bf16 %v231_v15, %v231_v15  ;;  %v10938_v63 = vld [vmem:[%s13906_s1 + $0xa38] sm:$0xff]   ;;  %v10945_v15 = vld [vmem:[%s13906_s1 + $0xb48] sm:$0xff]  }
 0x13b   :  { %v10939_v2 = vld [vmem:[%s13906_s1 + $0xab8] sm:$0xff]  }
 0x13c   :  { %v12433_v12 = vadd.f32 %v9648_v0, %v7010_v7  ;;  %9929 = vmatpush3.bf16.msra.mxu0 %v10901_v59  ;;  %v26_v0 = vld [vmem:[%s13905_s0 + $0x50] sm:$0xff] }
 0x13d   :  { %9951 = vmatpush3.bf16.msra.mxu1 %v10902_v60  ;;  %9930 = vmatprep.subr.bf16.mxu0 %v10903_v5  ;;  %v10936_v60 = vld [vmem:[%s13906_s1 + $0xa78] sm:$0xff]   ;;  %v241_v3 = vrot.slane %v26_v0, %v11521_v41  ;;  %v234_v4 = vcombine.high %v26_v0, %v26_v0  ;;  %v10941_v5 = vld [vmem:[%s13906_s1 + $0xb40] sm:$0xff]  }
 0x13e   :  { %9952 = vmatprep.subr.bf16.mxu1 %v10904_v6 }
 0x13f   :  { %v249_v6 = vcombine.high %v241_v3, %v241_v3  ;;  %v248_v7 = vrot.slane %v234_v4, %v11521_v41  ;;  %v10977_v4 = vld [vmem:[%s13906_s1 + $0xc80] sm:$0xff]  }
 0x140   :  { %9931 = vmatpush3.bf16.msra.mxu0 %v10905_v9  ;;  %v608_v9 = vpack.c.bf16 %v241_v3, %v241_v3 }
 0x141   :  { %9953 = vmatpush3.bf16.msra.mxu1 %v10906_v13  ;;  %9960 = vmatprep.subr.bf16.mxu0 %v10908_v16  ;;  %v609_v11 = vpack.c.bf16 %v249_v6, %v249_v6  ;;  %v10944_v13 = vld [vmem:[%s13906_s1 + $0xb80] sm:$0xff]   ;;  %v610_v14 = vpack.c.bf16 %v248_v7, %v248_v7  ;;  %v10978_v6 = vld [vmem:[%s13906_s1 + $0xc48] sm:$0xff]  }
 0x142   :  { %9982 = vmatprep.subr.bf16.mxu1 %v10909_v17  ;;  %v10946_v17 = vld [vmem:[%s13906_s1 + $0xbc8] sm:$0xff]  }
 0x143   :  { %7568 = vmatmul.mubr.bf16.vlgmr.msra.gmra.mrb[36].mxu0 %v604_v20  ;;  %v10949_v20 = vld [vmem:[%s13906_s1 + $0xb50] sm:$0xff]  }
 0x144   :  { %7608 = vmatmul.mubr.bf16.vlgmr.msra.gmra.mrb[36].mxu1 %v606_v22  ;;  %9961 = vmatpush3.bf16.msra.mxu0 %v10910_v21  ;;  %v10950_v21 = vld [vmem:[%s13906_s1 + $0xbd0] sm:$0xff]  }
 0x145   :  { %9983 = vmatpush3.bf16.msra.mxu1 %v10911_v23  ;;  %9962 = vmatprep.subr.bf16.mxu0 %v10912_v25  ;;  %v10951_v22 = vld [vmem:[%s13906_s1 + $0xb10] sm:$0xff]   ;;  %v10954_v25 = vld [vmem:[%s13906_s1 + $0xbd8] sm:$0xff]  }
 0x146   :  { %9984 = vmatprep.subr.bf16.mxu1 %v10913_v26  ;;  %7647 = vmatprep.mubr.bf16.mxu0 %v609_v11  ;;  %v10952_v23 = vld [vmem:[%s13906_s1 + $0xb90] sm:$0xff]   ;;  %v10955_v26 = vld [vmem:[%s13906_s1 + $0xb18] sm:$0xff]  }
 0x147   :  { %v10982_v11 = vld [vmem:[%s13906_s1 + $0xc50] sm:$0xff]  }
 0x148   :  { %9963 = vmatpush3.bf16.msra.mxu0 %v10914_v27  ;;  %v10956_v27 = vld [vmem:[%s13906_s1 + $0xb98] sm:$0xff]  }
 0x149   :  { %9985 = vmatpush3.bf16.msra.mxu1 %v10915_v28  ;;  %9964 = vmatprep.subr.bf16.mxu0 %v10916_v29  ;;  %v10957_v28 = vld [vmem:[%s13906_s1 + $0xb60] sm:$0xff]  }
 0x14a   :  { %9986 = vmatprep.subr.bf16.mxu1 %v10917_v30  ;;  %v10958_v29 = vld [vmem:[%s13906_s1 + $0xbe0] sm:$0xff]  }
 0x14b   :  { %v10959_v30 = vld [vmem:[%s13906_s1 + $0xb20] sm:$0xff]  }
 0x14c   :  { %9965 = vmatpush3.bf16.msra.mxu0 %v10918_v31  ;;  %v10960_v31 = vld [vmem:[%s13906_s1 + $0xba0] sm:$0xff]  }
 0x14d   :  { %9987 = vmatpush3.bf16.msra.mxu1 %v10919_v32  ;;  %9966 = vmatprep.subr.bf16.mxu0 %v10920_v33  ;;  %v10961_v32 = vld [vmem:[%s13906_s1 + $0xb68] sm:$0xff]  }
 0x14e   :  { %9988 = vmatprep.subr.bf16.mxu1 %v10921_v34  ;;  %v10962_v33 = vld [vmem:[%s13906_s1 + $0xbe8] sm:$0xff]  }
 0x14f   :  { %v10963_v34 = vld [vmem:[%s13906_s1 + $0xb28] sm:$0xff]  }
 0x150   :  { %9967 = vmatpush3.bf16.msra.mxu0 %v10922_v35  ;;  %v10964_v35 = vld [vmem:[%s13906_s1 + $0xba8] sm:$0xff]  }
 0x151   :  { %9989 = vmatpush3.bf16.msra.mxu1 %v10923_v36  ;;  %9968 = vmatprep.subr.bf16.mxu0 %v10924_v37  ;;  %v10965_v36 = vld [vmem:[%s13906_s1 + $0xb70] sm:$0xff]  }
 0x152   :  { %9990 = vmatprep.subr.bf16.mxu1 %v10925_v38 }
 0x154   :  { %9969 = vmatpush3.bf16.msra.mxu0 %v10926_v39  ;;  %v10966_v39 = vld [vmem:[%s13906_s1 + $0xbf0] sm:$0xff]  }
 0x155   :  { %9991 = vmatpush3.bf16.msra.mxu1 %v10927_v40  ;;  %9970 = vmatprep.subr.bf16.mxu0 %v10928_v42  ;;  %v10967_v40 = vld [vmem:[%s13906_s1 + $0xb30] sm:$0xff]  }
 0x156   :  { %v9668_v47 = vpop.f32.mrb[12].mxu0  ;;  %9992 = vmatprep.subr.bf16.mxu1 %v10929_v43 }
 0x157   :  { %v9690_v48 = vpop.f32.mrb[12].mxu1  ;;  %v9669_v51 = vpop.f32.mrb[13].mxu0 }
 0x158   :  { %v9691_v52 = vpop.f32.mrb[13].mxu1  ;;  %v9670_v54 = vadd.f32 %v9669_v51, %v9668_v47  ;;  %v9671_v56 = vpop.f32.mrb[14].mxu0  ;;  %9971 = vmatpush3.bf16.msra.mxu0 %v10930_v44  ;;  %v10969_v51 = vld [vmem:[%s13906_s1 + $0xb78] sm:$0xff]  }
 0x159   :  { %v9692_v55 = vadd.f32 %v9691_v52, %v9690_v48  ;;  %v9693_v57 = vpop.f32.mrb[14].mxu1  ;;  %9993 = vmatpush3.bf16.msra.mxu1 %v10931_v45  ;;  %v9672_v58 = vpop.f32.mrb[15].mxu0  ;;  %9972 = vmatprep.subr.bf16.mxu0 %v10932_v46  ;;  %v27_v56 = vld [vmem:[%s13905_s0 + $0x58] sm:$0xff] }
 0x15a   :  { %v9694_v59 = vpop.f32.mrb[15].mxu1  ;;  %v7090_v62 = vadd.f32 %v9670_v54, %v12433_v12  ;;  %9994 = vmatprep.subr.bf16.mxu1 %v10933_v49  ;;  %v250_v12 = vcombine.high %v248_v7, %v248_v7  ;;  %v258_v57 = vrot.slane %v27_v56, %v11521_v41  ;;  %v251_v58 = vcombine.high %v27_v56, %v27_v56  ;;  %v11009_v56 = vld [vmem:[%s13906_s1 + $0xd00] sm:$0xff]  }
 0x15b   :  { %v10974_v59 = vld [vmem:[%s13906_s1 + $0xc40] sm:$0xff]  }
 0x15c   :  { %v12536_v1 = vadd.f32 %v9692_v55, %v7090_v62  ;;  %9973 = vmatpush3.bf16.msra.mxu0 %v10934_v50  ;;  %v611_v16 = vpack.c.bf16 %v250_v12, %v250_v12  ;;  %v10968_v50 = vld [vmem:[%s13906_s1 + $0xbb0] sm:$0xff]   ;;  %v10971_v55 = vld [vmem:[%s13906_s1 + $0xb38] sm:$0xff]   ;;  %v265_v62 = vrot.slane %v251_v58, %v11521_v41  ;;  %v612_v0 = vpack.c.bf16 %v258_v57, %v258_v57 }
 0x15d   :  { %9995 = vmatpush3.bf16.msra.mxu1 %v10935_v53  ;;  %9974 = vmatprep.subr.bf16.mxu0 %v10936_v60  ;;  %v10970_v53 = vld [vmem:[%s13906_s1 + $0xbf8] sm:$0xff]   ;;  %v10983_v12 = vld [vmem:[%s13906_s1 + $0xcd0] sm:$0xff]  }
 0x15e   :  { %9996 = vmatprep.subr.bf16.mxu1 %v10937_v61  ;;  %7687 = vmatprep.mubr.bf16.mxu1 %v611_v16  ;;  %v10972_v60 = vld [vmem:[%s13906_s1 + $0xbb8] sm:$0xff]   ;;  %v266_v61 = vcombine.high %v258_v57, %v258_v57  ;;  %v267_v3 = vcombine.high %v265_v62, %v265_v62 }
 0x15f   :  { %v10987_v16 = vld [vmem:[%s13906_s1 + $0xcd8] sm:$0xff]  }
 0x160   :  { %9975 = vmatpush3.bf16.msra.mxu0 %v10938_v63  ;;  %v10975_v63 = vld [vmem:[%s13906_s1 + $0xcc0] sm:$0xff]   ;;  %v615_v7 = vpack.c.bf16 %v267_v3, %v267_v3  ;;  %v11016_v3 = vld [vmem:[%s13906_s1 + $0xdd0] sm:$0xff]  }
 0x161   :  { %9997 = vmatpush3.bf16.msra.mxu1 %v10939_v2  ;;  %10004 = vmatprep.subr.bf16.mxu0 %v10941_v5  ;;  %v613_v2 = vpack.c.bf16 %v266_v61, %v266_v61  ;;  %v614_v5 = vpack.c.bf16 %v265_v62, %v265_v62  ;;  %v11011_v61 = vld [vmem:[%s13906_s1 + $0xd48] sm:$0xff]  }
 0x162   :  { %10026 = vmatprep.subr.bf16.mxu1 %v10942_v8  ;;  %v10979_v8 = vld [vmem:[%s13906_s1 + $0xcc8] sm:$0xff]  }
 0x163   :  { %7648 = vmatmul.mubr.bf16.vlgmr.msra.gmra.mrb[40].mxu0 %v608_v9  ;;  %v10980_v9 = vld [vmem:[%s13906_s1 + $0xc08] sm:$0xff]  }
 0x164   :  { %10005 = vmatpush3.bf16.msra.mxu0 %v10943_v10  ;;  %7688 = vmatmul.mubr.bf16.vlgmr.msra.gmra.mrb[40].mxu1 %v610_v14  ;;  %v10981_v10 = vld [vmem:[%s13906_s1 + $0xc88] sm:$0xff]   ;;  %v10985_v14 = vld [vmem:[%s13906_s1 + $0xc90] sm:$0xff]  }
 0x165   :  { %10006 = vmatprep.subr.bf16.mxu0 %v10945_v15  ;;  %10027 = vmatpush3.bf16.msra.mxu1 %v10944_v13  ;;  %v10984_v13 = vld [vmem:[%s13906_s1 + $0xc10] sm:$0xff]   ;;  %v10986_v15 = vld [vmem:[%s13906_s1 + $0xc58] sm:$0xff]  }
 0x166   :  { %10028 = vmatprep.subr.bf16.mxu1 %v10946_v17  ;;  %7727 = vmatprep.mubr.bf16.mxu0 %v613_v2  ;;  %v10988_v17 = vld [vmem:[%s13906_s1 + $0xc18] sm:$0xff]   ;;  %v11015_v2 = vld [vmem:[%s13906_s1 + $0xd50] sm:$0xff]  }
 0x167   :  { %7767 = vmatprep.mubr.bf16.mxu1 %v615_v7  ;;  %v11020_v7 = vld [vmem:[%s13906_s1 + $0xdd8] sm:$0xff]  }
 0x168   :  { %10007 = vmatpush3.bf16.msra.mxu0 %v10947_v18  ;;  %v10989_v18 = vld [vmem:[%s13906_s1 + $0xc98] sm:$0xff]  }
 0x169   :  { %10008 = vmatprep.subr.bf16.mxu0 %v10949_v20  ;;  %10029 = vmatpush3.bf16.msra.mxu1 %v10948_v19  ;;  %v10990_v19 = vld [vmem:[%s13906_s1 + $0xc60] sm:$0xff]  }
 0x16a   :  { %10030 = vmatprep.subr.bf16.mxu1 %v10950_v21  ;;  %v10991_v20 = vld [vmem:[%s13906_s1 + $0xce0] sm:$0xff]  }
 0x16b   :  { %v10992_v21 = vld [vmem:[%s13906_s1 + $0xc20] sm:$0xff]  }
 0x16c   :  { %10009 = vmatpush3.bf16.msra.mxu0 %v10951_v22  ;;  %v10993_v22 = vld [vmem:[%s13906_s1 + $0xca0] sm:$0xff]  }
 0x16d   :  { %10010 = vmatprep.subr.bf16.mxu0 %v10953_v24  ;;  %10031 = vmatpush3.bf16.msra.mxu1 %v10952_v23  ;;  %v10994_v23 = vld [vmem:[%s13906_s1 + $0xc68] sm:$0xff]  }
 0x16e   :  { %10032 = vmatprep.subr.bf16.mxu1 %v10954_v25  ;;  %v10995_v24 = vld [vmem:[%s13906_s1 + $0xce8] sm:$0xff]  }
 0x16f   :  { %v10996_v25 = vld [vmem:[%s13906_s1 + $0xc28] sm:$0xff]  }
 0x170   :  { %10011 = vmatpush3.bf16.msra.mxu0 %v10955_v26  ;;  %v10997_v26 = vld [vmem:[%s13906_s1 + $0xca8] sm:$0xff]  }
 0x171   :  { %10012 = vmatprep.subr.bf16.mxu0 %v10957_v28  ;;  %10033 = vmatpush3.bf16.msra.mxu1 %v10956_v27 }
 0x172   :  { %10034 = vmatprep.subr.bf16.mxu1 %v10958_v29  ;;  %v10998_v29 = vld [vmem:[%s13906_s1 + $0xc70] sm:$0xff]  }
 0x174   :  { %10013 = vmatpush3.bf16.msra.mxu0 %v10959_v30  ;;  %v10999_v30 = vld [vmem:[%s13906_s1 + $0xcf0] sm:$0xff]  }
 0x175   :  { %10014 = vmatprep.subr.bf16.mxu0 %v10961_v32  ;;  %10035 = vmatpush3.bf16.msra.mxu1 %v10960_v31 }
 0x176   :  { %v9712_v37 = vpop.f32.mrb[16].mxu0  ;;  %10036 = vmatprep.subr.bf16.mxu1 %v10962_v33 }
 0x177   :  { %v9734_v38 = vpop.f32.mrb[16].mxu1  ;;  %v9713_v42 = vpop.f32.mrb[17].mxu0 }
 0x178   :  { %v9735_v43 = vpop.f32.mrb[17].mxu1  ;;  %v9714_v44 = vadd.f32 %v9713_v42, %v9712_v37  ;;  %v9715_v46 = vpop.f32.mrb[18].mxu0  ;;  %10015 = vmatpush3.bf16.msra.mxu0 %v10963_v34 }
 0x179   :  { %v9736_v45 = vadd.f32 %v9735_v43, %v9734_v38  ;;  %v9737_v47 = vpop.f32.mrb[18].mxu1  ;;  %v9716_v48 = vpop.f32.mrb[19].mxu0  ;;  %10016 = vmatprep.subr.bf16.mxu0 %v10965_v36  ;;  %10037 = vmatpush3.bf16.msra.mxu1 %v10964_v35  ;;  %v11001_v43 = vld [vmem:[%s13906_s1 + $0xcb0] sm:$0xff]   ;;  %v11004_v46 = vld [vmem:[%s13906_s1 + $0xc38] sm:$0xff]  }
 0x17a   :  { %v9738_v49 = vpop.f32.mrb[19].mxu1  ;;  %v7170_v52 = vadd.f32 %v9714_v44, %v12536_v1  ;;  %10038 = vmatprep.subr.bf16.mxu1 %v10966_v39  ;;  %v10976_v1 = vld [vmem:[%s13906_s1 + $0xc00] sm:$0xff]   ;;  %v11000_v39 = vld [vmem:[%s13906_s1 + $0xc30] sm:$0xff]  }
 0x17b   :  { %v28_v47 = vld [vmem:[%s13905_s0 + $0x60] sm:$0xff] }
 0x17c   :  { %v12634_v54 = vadd.f32 %v9736_v45, %v7170_v52  ;;  %10017 = vmatpush3.bf16.msra.mxu0 %v10967_v40  ;;  %v11002_v40 = vld [vmem:[%s13906_s1 + $0xc78] sm:$0xff]   ;;  %v275_v48 = vrot.slane %v28_v47, %v11521_v41  ;;  %v268_v49 = vcombine.high %v28_v47, %v28_v47  ;;  %v11042_v47 = vld [vmem:[%s13906_s1 + $0xe00] sm:$0xff]  }
 0x17d   :  { %10018 = vmatprep.subr.bf16.mxu0 %v10969_v51  ;;  %10039 = vmatpush3.bf16.msra.mxu1 %v10968_v50  ;;  %v11003_v45 = vld [vmem:[%s13906_s1 + $0xcf8] sm:$0xff]   ;;  %v11007_v50 = vld [vmem:[%s13906_s1 + $0xd40] sm:$0xff]  }
 0x17e   :  { %10040 = vmatprep.subr.bf16.mxu1 %v10970_v53  ;;  %v11005_v51 = vld [vmem:[%s13906_s1 + $0xcb8] sm:$0xff]   ;;  %v283_v52 = vcombine.high %v275_v48, %v275_v48  ;;  %v282_v53 = vrot.slane %v268_v49, %v11521_v41 }
 0x180   :  { %10019 = vmatpush3.bf16.msra.mxu0 %v10971_v55  ;;  %v616_v55 = vpack.c.bf16 %v275_v48, %v275_v48  ;;  %v617_v57 = vpack.c.bf16 %v283_v52, %v283_v52  ;;  %v284_v58 = vcombine.high %v282_v53, %v282_v53  ;;  %v11044_v52 = vld [vmem:[%s13906_s1 + $0xe48] sm:$0xff]  }
 0x181   :  { %10048 = vmatprep.subr.bf16.mxu0 %v10974_v59  ;;  %10041 = vmatpush3.bf16.msra.mxu1 %v10972_v60  ;;  %v11010_v59 = vld [vmem:[%s13906_s1 + $0xd80] sm:$0xff]   ;;  %v618_v60 = vpack.c.bf16 %v282_v53, %v282_v53 }
 0x182   :  { %10070 = vmatprep.subr.bf16.mxu1 %v10975_v63  ;;  %v619_v62 = vpack.c.bf16 %v284_v58, %v284_v58  ;;  %v11012_v63 = vld [vmem:[%s13906_s1 + $0xdc8] sm:$0xff]   ;;  %v11049_v58 = vld [vmem:[%s13906_s1 + $0xed0] sm:$0xff]  }
 0x183   :  { %7728 = vmatmul.mubr.bf16.vlgmr.msra.gmra.mrb[44].mxu0 %v612_v0  ;;  %v11013_v0 = vld [vmem:[%s13906_s1 + $0xd08] sm:$0xff]  }
 0x184   :  { %10049 = vmatpush3.bf16.msra.mxu0 %v10976_v1  ;;  %7768 = vmatmul.mubr.bf16.vlgmr.msra.gmra.mrb[44].mxu1 %v614_v5  ;;  %v11014_v1 = vld [vmem:[%s13906_s1 + $0xd88] sm:$0xff]   ;;  %v11018_v5 = vld [vmem:[%s13906_s1 + $0xd90] sm:$0xff]  }
 0x185   :  { %10050 = vmatprep.subr.bf16.mxu0 %v10978_v6  ;;  %10071 = vmatpush3.bf16.msra.mxu1 %v10977_v4  ;;  %v11017_v4 = vld [vmem:[%s13906_s1 + $0xd10] sm:$0xff]   ;;  %v11019_v6 = vld [vmem:[%s13906_s1 + $0xd58] sm:$0xff]  }
 0x186   :  { %10072 = vmatprep.subr.bf16.mxu1 %v10979_v8  ;;  %7807 = vmatprep.mubr.bf16.mxu0 %v617_v57  ;;  %v11021_v8 = vld [vmem:[%s13906_s1 + $0xd18] sm:$0xff]   ;;  %v11048_v57 = vld [vmem:[%s13906_s1 + $0xe50] sm:$0xff]  }
 0x187   :  { %7847 = vmatprep.mubr.bf16.mxu1 %v619_v62  ;;  %v11053_v62 = vld [vmem:[%s13906_s1 + $0xed8] sm:$0xff]  }
 0x188   :  { %10051 = vmatpush3.bf16.msra.mxu0 %v10980_v9  ;;  %v11022_v9 = vld [vmem:[%s13906_s1 + $0xd98] sm:$0xff]  }
 0x189   :  { %10052 = vmatprep.subr.bf16.mxu0 %v10982_v11  ;;  %10073 = vmatpush3.bf16.msra.mxu1 %v10981_v10  ;;  %v11023_v10 = vld [vmem:[%s13906_s1 + $0xd60] sm:$0xff]  }
 0x18a   :  { %10074 = vmatprep.subr.bf16.mxu1 %v10983_v12  ;;  %v11024_v11 = vld [vmem:[%s13906_s1 + $0xde0] sm:$0xff]  }
 0x18b   :  { %v11025_v12 = vld [vmem:[%s13906_s1 + $0xd20] sm:$0xff]  }
 0x18c   :  { %10053 = vmatpush3.bf16.msra.mxu0 %v10984_v13  ;;  %v11026_v13 = vld [vmem:[%s13906_s1 + $0xda0] sm:$0xff]  }
 0x18d   :  { %10054 = vmatprep.subr.bf16.mxu0 %v10986_v15  ;;  %10075 = vmatpush3.bf16.msra.mxu1 %v10985_v14  ;;  %v11027_v14 = vld [vmem:[%s13906_s1 + $0xd68] sm:$0xff]  }
 0x18e   :  { %10076 = vmatprep.subr.bf16.mxu1 %v10987_v16  ;;  %v11028_v15 = vld [vmem:[%s13906_s1 + $0xde8] sm:$0xff]  }
 0x18f   :  { %v11029_v16 = vld [vmem:[%s13906_s1 + $0xd28] sm:$0xff]  }
 0x190   :  { %10055 = vmatpush3.bf16.msra.mxu0 %v10988_v17 }
 0x191   :  { %10056 = vmatprep.subr.bf16.mxu0 %v10990_v19  ;;  %10077 = vmatpush3.bf16.msra.mxu1 %v10989_v18  ;;  %v11030_v19 = vld [vmem:[%s13906_s1 + $0xda8] sm:$0xff]  }
 0x192   :  { %10078 = vmatprep.subr.bf16.mxu1 %v10991_v20  ;;  %v11031_v20 = vld [vmem:[%s13906_s1 + $0xd70] sm:$0xff]  }
 0x194   :  { %10057 = vmatpush3.bf16.msra.mxu0 %v10992_v21 }
 0x195   :  { %10058 = vmatprep.subr.bf16.mxu0 %v10994_v23  ;;  %10079 = vmatpush3.bf16.msra.mxu1 %v10993_v22 }
 0x196   :  { %v9756_v27 = vpop.f32.mrb[20].mxu0  ;;  %10080 = vmatprep.subr.bf16.mxu1 %v10995_v24 }
 0x197   :  { %v9778_v28 = vpop.f32.mrb[20].mxu1  ;;  %v9757_v31 = vpop.f32.mrb[21].mxu0 }
 0x198   :  { %v9779_v32 = vpop.f32.mrb[21].mxu1  ;;  %v9758_v33 = vadd.f32 %v9757_v31, %v9756_v27  ;;  %v9759_v35 = vpop.f32.mrb[22].mxu0  ;;  %10059 = vmatpush3.bf16.msra.mxu0 %v10996_v25 }
 0x199   :  { %v9780_v34 = vadd.f32 %v9779_v32, %v9778_v28  ;;  %v9781_v36 = vpop.f32.mrb[22].mxu1  ;;  %v9760_v37 = vpop.f32.mrb[23].mxu0  ;;  %10060 = vmatprep.subr.bf16.mxu0 %v10998_v29  ;;  %10081 = vmatpush3.bf16.msra.mxu1 %v10997_v26  ;;  %v11032_v29 = vld [vmem:[%s13906_s1 + $0xdf0] sm:$0xff]   ;;  %v11035_v32 = vld [vmem:[%s13906_s1 + $0xd78] sm:$0xff]  }
 0x19a   :  { %v9782_v38 = vpop.f32.mrb[23].mxu1  ;;  %v7250_v42 = vadd.f32 %v9758_v33, %v12634_v54  ;;  %10082 = vmatprep.subr.bf16.mxu1 %v10999_v30  ;;  %v11008_v54 = vld [vmem:[%s13906_s1 + $0xdc0] sm:$0xff]   ;;  %v11033_v30 = vld [vmem:[%s13906_s1 + $0xd30] sm:$0xff]   ;;  %v11036_v35 = vld [vmem:[%s13906_s1 + $0xdf8] sm:$0xff]  }
 0x19b   :  { %v11037_v36 = vld [vmem:[%s13906_s1 + $0xd38] sm:$0xff]   ;;  %v29_v37 = vld [vmem:[%s13905_s0 + $0x68] sm:$0xff] }
 0x19c   :  { %v12735_v44 = vadd.f32 %v9780_v34, %v7250_v42  ;;  %10061 = vmatpush3.bf16.msra.mxu0 %v11000_v39  ;;  %v11034_v34 = vld [vmem:[%s13906_s1 + $0xdb0] sm:$0xff]   ;;  %v292_v38 = vrot.slane %v29_v37, %v11521_v41  ;;  %v285_v39 = vcombine.high %v29_v37, %v29_v37  ;;  %v11038_v42 = vld [vmem:[%s13906_s1 + $0xdb8] sm:$0xff]   ;;  %v11075_v37 = vld [vmem:[%s13906_s1 + $0xf00] sm:$0xff]  }
 0x19d   :  { %10062 = vmatprep.subr.bf16.mxu0 %v11002_v40  ;;  %10083 = vmatpush3.bf16.msra.mxu1 %v11001_v43  ;;  %v11040_v40 = vld [vmem:[%s13906_s1 + $0xe40] sm:$0xff]  }
 0x19e   :  { %10084 = vmatprep.subr.bf16.mxu1 %v11003_v45  ;;  %v300_v43 = vcombine.high %v292_v38, %v292_v38  ;;  %v11041_v45 = vld [vmem:[%s13906_s1 + $0xec0] sm:$0xff]  }
 0x1a0   :  { %10063 = vmatpush3.bf16.msra.mxu0 %v11004_v46  ;;  %v620_v46 = vpack.c.bf16 %v292_v38, %v292_v38  ;;  %v621_v48 = vpack.c.bf16 %v300_v43, %v300_v43  ;;  %v11077_v43 = vld [vmem:[%s13906_s1 + $0xf48] sm:$0xff]  }
 0x1a1   :  { %10092 = vmatprep.subr.bf16.mxu0 %v11007_v50  ;;  %10085 = vmatpush3.bf16.msra.mxu1 %v11005_v51  ;;  %v11043_v50 = vld [vmem:[%s13906_s1 + $0xe80] sm:$0xff]  }
 0x1a2   :  { %10114 = vmatprep.subr.bf16.mxu1 %v11008_v54  ;;  %v11045_v54 = vld [vmem:[%s13906_s1 + $0xec8] sm:$0xff]  }
 0x1a3   :  { %7808 = vmatmul.mubr.bf16.vlgmr.msra.gmra.mrb[48].mxu0 %v616_v55  ;;  %v11046_v55 = vld [vmem:[%s13906_s1 + $0xe08] sm:$0xff]  }
 0x1a4   :  { %10093 = vmatpush3.bf16.msra.mxu0 %v11009_v56  ;;  %7848 = vmatmul.mubr.bf16.vlgmr.msra.gmra.mrb[48].mxu1 %v618_v60  ;;  %v11047_v56 = vld [vmem:[%s13906_s1 + $0xe88] sm:$0xff]   ;;  %v11051_v60 = vld [vmem:[%s13906_s1 + $0xe90] sm:$0xff]  }
 0x1a5   :  { %10094 = vmatprep.subr.bf16.mxu0 %v11011_v61  ;;  %10115 = vmatpush3.bf16.msra.mxu1 %v11010_v59  ;;  %v11050_v59 = vld [vmem:[%s13906_s1 + $0xe10] sm:$0xff]   ;;  %v11052_v61 = vld [vmem:[%s13906_s1 + $0xe58] sm:$0xff]  }
 0x1a6   :  { %10116 = vmatprep.subr.bf16.mxu1 %v11012_v63  ;;  %7887 = vmatprep.mubr.bf16.mxu0 %v621_v48  ;;  %v11054_v63 = vld [vmem:[%s13906_s1 + $0xe18] sm:$0xff]   ;;  %v11081_v48 = vld [vmem:[%s13906_s1 + $0xf50] sm:$0xff]  }
 0x1a8   :  { %10095 = vmatpush3.bf16.msra.mxu0 %v11013_v0  ;;  %v11055_v0 = vld [vmem:[%s13906_s1 + $0xe98] sm:$0xff]  }
 0x1a9   :  { %10096 = vmatprep.subr.bf16.mxu0 %v11015_v2  ;;  %10117 = vmatpush3.bf16.msra.mxu1 %v11014_v1  ;;  %v11056_v1 = vld [vmem:[%s13906_s1 + $0xe60] sm:$0xff]  }
 0x1aa   :  { %10118 = vmatprep.subr.bf16.mxu1 %v11016_v3  ;;  %v11057_v2 = vld [vmem:[%s13906_s1 + $0xee0] sm:$0xff]  }
 0x1ab   :  { %v11058_v3 = vld [vmem:[%s13906_s1 + $0xe20] sm:$0xff]  }
 0x1ac   :  { %10097 = vmatpush3.bf16.msra.mxu0 %v11017_v4  ;;  %v11059_v4 = vld [vmem:[%s13906_s1 + $0xea0] sm:$0xff]  }
 0x1ad   :  { %10098 = vmatprep.subr.bf16.mxu0 %v11019_v6  ;;  %10119 = vmatpush3.bf16.msra.mxu1 %v11018_v5  ;;  %v11060_v5 = vld [vmem:[%s13906_s1 + $0xe68] sm:$0xff]  }
 0x1ae   :  { %10120 = vmatprep.subr.bf16.mxu1 %v11020_v7  ;;  %v11061_v6 = vld [vmem:[%s13906_s1 + $0xee8] sm:$0xff]  }
 0x1b0   :  { %10099 = vmatpush3.bf16.msra.mxu0 %v11021_v8 }
 0x1b1   :  { %10100 = vmatprep.subr.bf16.mxu0 %v11023_v10  ;;  %10121 = vmatpush3.bf16.msra.mxu1 %v11022_v9  ;;  %v11062_v9 = vld [vmem:[%s13906_s1 + $0xe28] sm:$0xff]   ;;  %v11064_v10 = vld [vmem:[%s13906_s1 + $0xe70] sm:$0xff]  }
 0x1b2   :  { %10122 = vmatprep.subr.bf16.mxu1 %v11024_v11 }
 0x1b4   :  { %10101 = vmatpush3.bf16.msra.mxu0 %v11025_v12 }
 0x1b5   :  { %10102 = vmatprep.subr.bf16.mxu0 %v11027_v14  ;;  %10123 = vmatpush3.bf16.msra.mxu1 %v11026_v13 }
 0x1b6   :  { %v9800_v17 = vpop.f32.mrb[24].mxu0  ;;  %10124 = vmatprep.subr.bf16.mxu1 %v11028_v15 }
 0x1b7   :  { %v9822_v18 = vpop.f32.mrb[24].mxu1  ;;  %v9801_v21 = vpop.f32.mrb[25].mxu0 }
 0x1b8   :  { %v9823_v22 = vpop.f32.mrb[25].mxu1  ;;  %v9802_v23 = vadd.f32 %v9801_v21, %v9800_v17  ;;  %v9803_v25 = vpop.f32.mrb[26].mxu0  ;;  %10103 = vmatpush3.bf16.msra.mxu0 %v11029_v16  ;;  %v11063_v17 = vld [vmem:[%s13906_s1 + $0xea8] sm:$0xff]  }
 0x1b9   :  { %v9824_v24 = vadd.f32 %v9823_v22, %v9822_v18  ;;  %v9825_v26 = vpop.f32.mrb[26].mxu1  ;;  %v9804_v27 = vpop.f32.mrb[27].mxu0  ;;  %10104 = vmatprep.subr.bf16.mxu0 %v11031_v20  ;;  %10125 = vmatpush3.bf16.msra.mxu1 %v11030_v19  ;;  %v11065_v20 = vld [vmem:[%s13906_s1 + $0xef0] sm:$0xff]  }
 0x1ba   :  { %v9826_v28 = vpop.f32.mrb[27].mxu1  ;;  %v7330_v31 = vadd.f32 %v9802_v23, %v12735_v44  ;;  %10126 = vmatprep.subr.bf16.mxu1 %v11032_v29  ;;  %v299_v44 = vrot.slane %v285_v39, %v11521_v41  ;;  %v11066_v22 = vld [vmem:[%s13906_s1 + $0xe30] sm:$0xff]   ;;  %v11069_v26 = vld [vmem:[%s13906_s1 + $0xef8] sm:$0xff]  }
 0x1bb   :  { %v11067_v25 = vld [vmem:[%s13906_s1 + $0xeb0] sm:$0xff]   ;;  %v11070_v27 = vld [vmem:[%s13906_s1 + $0xe38] sm:$0xff]  }
 0x1bc   :  { %v12836_v33 = vadd.f32 %v9824_v24, %v7330_v31  ;;  %10105 = vmatpush3.bf16.msra.mxu0 %v11033_v30  ;;  %v301_v49 = vcombine.high %v299_v44, %v299_v44  ;;  %v622_v51 = vpack.c.bf16 %v299_v44, %v299_v44  ;;  %v11068_v24 = vld [vmem:[%s13906_s1 + $0xe78] sm:$0xff]   ;;  %v30_v28 = vld [vmem:[%s13905_s0 + $0x70] sm:$0xff]  ;;  %v11073_v31 = vld [vmem:[%s13906_s1 + $0xf40] sm:$0xff]  }
 0x1bd   :  { %10106 = vmatprep.subr.bf16.mxu0 %v11035_v32  ;;  %10127 = vmatpush3.bf16.msra.mxu1 %v11034_v34  ;;  %v309_v29 = vrot.slane %v30_v28, %v11521_v41  ;;  %v302_v30 = vcombine.high %v30_v28, %v30_v28  ;;  %v11071_v32 = vld [vmem:[%s13906_s1 + $0xeb8] sm:$0xff]   ;;  %v11108_v28 = vld [vmem:[%s13906_s1 + $0x1000] sm:$0xff]  }
 0x1be   :  { %10128 = vmatprep.subr.bf16.mxu1 %v11036_v35  ;;  %v623_v53 = vpack.c.bf16 %v301_v49, %v301_v49  ;;  %v11074_v35 = vld [vmem:[%s13906_s1 + $0xfc0] sm:$0xff]   ;;  %v11082_v49 = vld [vmem:[%s13906_s1 + $0xfd0] sm:$0xff]  }
 0x1bf   :  { %v316_v34 = vrot.slane %v302_v30, %v11521_v41 }
 0x1c0   :  { %10107 = vmatpush3.bf16.msra.mxu0 %v11037_v36  ;;  %7927 = vmatprep.mubr.bf16.mxu1 %v623_v53  ;;  %v624_v36 = vpack.c.bf16 %v309_v29, %v309_v29  ;;  %v11086_v53 = vld [vmem:[%s13906_s1 + $0xfd8] sm:$0xff]  }
 0x1c1   :  { %10136 = vmatprep.subr.bf16.mxu0 %v11040_v40  ;;  %10129 = vmatpush3.bf16.msra.mxu1 %v11038_v42  ;;  %v318_v39 = vcombine.high %v316_v34, %v316_v34  ;;  %v11076_v40 = vld [vmem:[%s13906_s1 + $0xf80] sm:$0xff]   ;;  %v626_v42 = vpack.c.bf16 %v316_v34, %v316_v34 }
 0x1c2   :  { %10158 = vmatprep.subr.bf16.mxu1 %v11041_v45  ;;  %v11078_v45 = vld [vmem:[%s13906_s1 + $0xfc8] sm:$0xff]  }
 0x1c3   :  { %7888 = vmatmul.mubr.bf16.vlgmr.msra.gmra.mrb[52].mxu0 %v620_v46  ;;  %v627_v44 = vpack.c.bf16 %v318_v39, %v318_v39  ;;  %v11079_v46 = vld [vmem:[%s13906_s1 + $0xf08] sm:$0xff]   ;;  %v11115_v39 = vld [vmem:[%s13906_s1 + $0x10d0] sm:$0xff]  }
 0x1c4   :  { %10137 = vmatpush3.bf16.msra.mxu0 %v11042_v47  ;;  %7928 = vmatmul.mubr.bf16.vlgmr.msra.gmra.mrb[52].mxu1 %v622_v51  ;;  %v11080_v47 = vld [vmem:[%s13906_s1 + $0xf88] sm:$0xff]   ;;  %v11084_v51 = vld [vmem:[%s13906_s1 + $0xf90] sm:$0xff]  }
 0x1c5   :  { %10138 = vmatprep.subr.bf16.mxu0 %v11044_v52  ;;  %10159 = vmatpush3.bf16.msra.mxu1 %v11043_v50  ;;  %v11083_v50 = vld [vmem:[%s13906_s1 + $0xf10] sm:$0xff]   ;;  %v11085_v52 = vld [vmem:[%s13906_s1 + $0xf58] sm:$0xff]  }
 0x1c6   :  { %10160 = vmatprep.subr.bf16.mxu1 %v11045_v54  ;;  %8007 = vmatprep.mubr.bf16.mxu1 %v627_v44  ;;  %v11087_v54 = vld [vmem:[%s13906_s1 + $0xf18] sm:$0xff]  }
 0x1c7   :  { %v11119_v44 = vld [vmem:[%s13906_s1 + $0x10d8] sm:$0xff]  }
 0x1c8   :  { %10139 = vmatpush3.bf16.msra.mxu0 %v11046_v55  ;;  %v11088_v55 = vld [vmem:[%s13906_s1 + $0xf98] sm:$0xff]  }
 0x1c9   :  { %10140 = vmatprep.subr.bf16.mxu0 %v11048_v57  ;;  %10161 = vmatpush3.bf16.msra.mxu1 %v11047_v56  ;;  %v11089_v56 = vld [vmem:[%s13906_s1 + $0xf60] sm:$0xff]  }
 0x1ca   :  { %10162 = vmatprep.subr.bf16.mxu1 %v11049_v58  ;;  %v11090_v57 = vld [vmem:[%s13906_s1 + $0xfe0] sm:$0xff]  }
 0x1cb   :  { %v11091_v58 = vld [vmem:[%s13906_s1 + $0xf20] sm:$0xff]  }
 0x1cc   :  { %10141 = vmatpush3.bf16.msra.mxu0 %v11050_v59  ;;  %v11092_v59 = vld [vmem:[%s13906_s1 + $0xfa0] sm:$0xff]  }
 0x1cd   :  { %10142 = vmatprep.subr.bf16.mxu0 %v11052_v61  ;;  %10163 = vmatpush3.bf16.msra.mxu1 %v11051_v60  ;;  %v11093_v60 = vld [vmem:[%s13906_s1 + $0xf68] sm:$0xff]  }
 0x1ce   :  { %10164 = vmatprep.subr.bf16.mxu1 %v11053_v62 }
 0x1d0   :  { %10143 = vmatpush3.bf16.msra.mxu0 %v11054_v63  ;;  %v11094_v63 = vld [vmem:[%s13906_s1 + $0xfe8] sm:$0xff]  }
 0x1d1   :  { %10144 = vmatprep.subr.bf16.mxu0 %v11056_v1  ;;  %10165 = vmatpush3.bf16.msra.mxu1 %v11055_v0  ;;  %v11095_v0 = vld [vmem:[%s13906_s1 + $0xf28] sm:$0xff]  }
 0x1d2   :  { %10166 = vmatprep.subr.bf16.mxu1 %v11057_v2 }
 0x1d4   :  { %10145 = vmatpush3.bf16.msra.mxu0 %v11058_v3 }
 0x1d5   :  { %10146 = vmatprep.subr.bf16.mxu0 %v11060_v5  ;;  %10167 = vmatpush3.bf16.msra.mxu1 %v11059_v4 }
 0x1d6   :  { %v9844_v7 = vpop.f32.mrb[28].mxu0  ;;  %10168 = vmatprep.subr.bf16.mxu1 %v11061_v6 }
 0x1d7   :  { %v9866_v8 = vpop.f32.mrb[28].mxu1  ;;  %v9845_v11 = vpop.f32.mrb[29].mxu0 }
 0x1d8   :  { %v9867_v12 = vpop.f32.mrb[29].mxu1  ;;  %v9846_v13 = vadd.f32 %v9845_v11, %v9844_v7  ;;  %v9847_v15 = vpop.f32.mrb[30].mxu0  ;;  %10147 = vmatpush3.bf16.msra.mxu0 %v11062_v9  ;;  %v11096_v7 = vld [vmem:[%s13906_s1 + $0xfa8] sm:$0xff]  }
 0x1d9   :  { %v9868_v14 = vadd.f32 %v9867_v12, %v9866_v8  ;;  %v9869_v16 = vpop.f32.mrb[30].mxu1  ;;  %v9848_v18 = vpop.f32.mrb[31].mxu0  ;;  %10148 = vmatprep.subr.bf16.mxu0 %v11064_v10  ;;  %10169 = vmatpush3.bf16.msra.mxu1 %v11063_v17  ;;  %v11097_v10 = vld [vmem:[%s13906_s1 + $0xf70] sm:$0xff]   ;;  %v11101_v15 = vld [vmem:[%s13906_s1 + $0xf78] sm:$0xff]  }
 0x1da   :  { %v9870_v19 = vpop.f32.mrb[31].mxu1  ;;  %v7410_v21 = vadd.f32 %v9846_v13, %v12836_v33  ;;  %10170 = vmatprep.subr.bf16.mxu1 %v11065_v20  ;;  %v317_v33 = vcombine.high %v309_v29, %v309_v29  ;;  %v11098_v12 = vld [vmem:[%s13906_s1 + $0xff0] sm:$0xff]   ;;  %v11102_v17 = vld [vmem:[%s13906_s1 + $0xff8] sm:$0xff]  }
 0x1db   :  { %v11100_v16 = vld [vmem:[%s13906_s1 + $0xfb0] sm:$0xff]   ;;  %v11103_v18 = vld [vmem:[%s13906_s1 + $0xf38] sm:$0xff]  }
 0x1dc   :  { %v12937_v23 = vadd.f32 %v9868_v14, %v7410_v21  ;;  %10149 = vmatpush3.bf16.msra.mxu0 %v11066_v22  ;;  %v625_v38 = vpack.c.bf16 %v317_v33, %v317_v33  ;;  %v11099_v14 = vld [vmem:[%s13906_s1 + $0xf30] sm:$0xff]   ;;  %v31_v19 = vld [vmem:[%s13905_s0 + $0x78] sm:$0xff]  ;;  %v11106_v22 = vld [vmem:[%s13906_s1 + $0x1040] sm:$0xff]  }
 0x1dd   :  { %10150 = vmatprep.subr.bf16.mxu0 %v11068_v24  ;;  %10171 = vmatpush3.bf16.msra.mxu1 %v11067_v25  ;;  %v326_v20 = vrot.slane %v31_v19, %v11521_v41  ;;  %v319_v21 = vcombine.high %v31_v19, %v31_v19  ;;  %v11110_v33 = vld [vmem:[%s13906_s1 + $0x1048] sm:$0xff]   ;;  %v11141_v19 = vld [vmem:[%s13906_s1 + $0x1100] sm:$0xff]  }
 0x1de   :  { %10172 = vmatprep.subr.bf16.mxu1 %v11069_v26  ;;  %7967 = vmatprep.mubr.bf16.mxu0 %v625_v38  ;;  %v11107_v26 = vld [vmem:[%s13906_s1 + $0x10c0] sm:$0xff]   ;;  %v11114_v38 = vld [vmem:[%s13906_s1 + $0x1050] sm:$0xff]  }
 0x1df   :  { %v334_v24 = vcombine.high %v326_v20, %v326_v20  ;;  %v333_v25 = vrot.slane %v319_v21, %v11521_v41 }
 0x1e0   :  { %10151 = vmatpush3.bf16.msra.mxu0 %v11070_v27  ;;  %v628_v27 = vpack.c.bf16 %v326_v20, %v326_v20 }
 0x1e1   :  { %10180 = vmatprep.subr.bf16.mxu0 %v11073_v31  ;;  %10173 = vmatpush3.bf16.msra.mxu1 %v11071_v32  ;;  %v629_v29 = vpack.c.bf16 %v334_v24, %v334_v24  ;;  %v335_v30 = vcombine.high %v333_v25, %v333_v25  ;;  %v11109_v31 = vld [vmem:[%s13906_s1 + $0x1080] sm:$0xff]   ;;  %v630_v32 = vpack.c.bf16 %v333_v25, %v333_v25  ;;  %v11143_v24 = vld [vmem:[%s13906_s1 + $0x1148] sm:$0xff]  }
 0x1e2   :  { %10202 = vmatprep.subr.bf16.mxu1 %v11074_v35  ;;  %v11111_v35 = vld [vmem:[%s13906_s1 + $0x10c8] sm:$0xff]  }
 0x1e3   :  { %7968 = vmatmul.mubr.bf16.vlgmr.msra.gmra.mrb[56].mxu0 %v624_v36  ;;  %v631_v34 = vpack.c.bf16 %v335_v30, %v335_v30  ;;  %v11112_v36 = vld [vmem:[%s13906_s1 + $0x1008] sm:$0xff]   ;;  %v11148_v30 = vld [vmem:[%s13906_s1 + $0x11d0] sm:$0xff]  }
 0x1e4   :  { %10181 = vmatpush3.bf16.msra.mxu0 %v11075_v37  ;;  %8008 = vmatmul.mubr.bf16.vlgmr.msra.gmra.mrb[56].mxu1 %v626_v42  ;;  %v11113_v37 = vld [vmem:[%s13906_s1 + $0x1088] sm:$0xff]   ;;  %v11117_v42 = vld [vmem:[%s13906_s1 + $0x1090] sm:$0xff]  }
 0x1e5   :  { %10182 = vmatprep.subr.bf16.mxu0 %v11077_v43  ;;  %10203 = vmatpush3.bf16.msra.mxu1 %v11076_v40  ;;  %v11116_v40 = vld [vmem:[%s13906_s1 + $0x1010] sm:$0xff]   ;;  %v11118_v43 = vld [vmem:[%s13906_s1 + $0x1058] sm:$0xff]  }
 0x1e6   :  { %10204 = vmatprep.subr.bf16.mxu1 %v11078_v45  ;;  %8047 = vmatprep.mubr.bf16.mxu0 %v629_v29  ;;  %v11120_v45 = vld [vmem:[%s13906_s1 + $0x1018] sm:$0xff]   ;;  %v11147_v29 = vld [vmem:[%s13906_s1 + $0x1150] sm:$0xff]  }
 0x1e7   :  { %8087 = vmatprep.mubr.bf16.mxu1 %v631_v34  ;;  %v11152_v34 = vld [vmem:[%s13906_s1 + $0x11d8] sm:$0xff]  }
 0x1e8   :  { %10183 = vmatpush3.bf16.msra.mxu0 %v11079_v46  ;;  %v11121_v46 = vld [vmem:[%s13906_s1 + $0x1098] sm:$0xff]  }
 0x1e9   :  { %10184 = vmatprep.subr.bf16.mxu0 %v11081_v48  ;;  %10205 = vmatpush3.bf16.msra.mxu1 %v11080_v47  ;;  %v11122_v47 = vld [vmem:[%s13906_s1 + $0x1060] sm:$0xff]  }
 0x1ea   :  { %10206 = vmatprep.subr.bf16.mxu1 %v11082_v49  ;;  %v11123_v48 = vld [vmem:[%s13906_s1 + $0x10e0] sm:$0xff]  }
 0x1eb   :  { %v11124_v49 = vld [vmem:[%s13906_s1 + $0x1020] sm:$0xff]  }
 0x1ec   :  { %10185 = vmatpush3.bf16.msra.mxu0 %v11083_v50  ;;  %v11125_v50 = vld [vmem:[%s13906_s1 + $0x10a0] sm:$0xff]  }
 0x1ed   :  { %10186 = vmatprep.subr.bf16.mxu0 %v11085_v52  ;;  %10207 = vmatpush3.bf16.msra.mxu1 %v11084_v51  ;;  %v11126_v52 = vld [vmem:[%s13906_s1 + $0x1068] sm:$0xff]  }
 0x1ee   :  { %10208 = vmatprep.subr.bf16.mxu1 %v11086_v53 }
 0x1f0   :  { %10187 = vmatpush3.bf16.msra.mxu0 %v11087_v54 }
 0x1f1   :  { %10188 = vmatprep.subr.bf16.mxu0 %v11089_v56  ;;  %10209 = vmatpush3.bf16.msra.mxu1 %v11088_v55  ;;  %v11127_v55 = vld [vmem:[%s13906_s1 + $0x10e8] sm:$0xff]  }
 0x1f2   :  { %10210 = vmatprep.subr.bf16.mxu1 %v11090_v57  ;;  %v11128_v56 = vld [vmem:[%s13906_s1 + $0x1028] sm:$0xff]  }
 0x1f4   :  { %10189 = vmatpush3.bf16.msra.mxu0 %v11091_v58 }
 0x1f5   :  { %10190 = vmatprep.subr.bf16.mxu0 %v11093_v60  ;;  %10211 = vmatpush3.bf16.msra.mxu1 %v11092_v59 }
 0x1f6   :  { %v9888_v61 = vpop.f32.mrb[32].mxu0  ;;  %10212 = vmatprep.subr.bf16.mxu1 %v11094_v63 }
 0x1f7   :  { %v9910_v62 = vpop.f32.mrb[32].mxu1  ;;  %v9889_v1 = vpop.f32.mrb[33].mxu0 }
 0x1f8   :  { %v9911_v2 = vpop.f32.mrb[33].mxu1  ;;  %v9890_v3 = vadd.f32 %v9889_v1, %v9888_v61  ;;  %v9891_v5 = vpop.f32.mrb[34].mxu0  ;;  %10191 = vmatpush3.bf16.msra.mxu0 %v11095_v0  ;;  %v11130_v1 = vld [vmem:[%s13906_s1 + $0x1070] sm:$0xff]  }
 0x1f9   :  { %v9912_v4 = vadd.f32 %v9911_v2, %v9910_v62  ;;  %v9913_v6 = vpop.f32.mrb[34].mxu1  ;;  %v9892_v8 = vpop.f32.mrb[35].mxu0  ;;  %10192 = vmatprep.subr.bf16.mxu0 %v11097_v10  ;;  %10213 = vmatpush3.bf16.msra.mxu1 %v11096_v7  ;;  %v11129_v2 = vld [vmem:[%s13906_s1 + $0x10a8] sm:$0xff]   ;;  %v11132_v5 = vld [vmem:[%s13906_s1 + $0x1030] sm:$0xff]   ;;  %v32_v10 = vld [vmem:[%s13905_s0 + $0x80] sm:$0xff] }
 0x1fa   :  { %v9914_v9 = vpop.f32.mrb[35].mxu1  ;;  %v7490_v11 = vadd.f32 %v9890_v3, %v12937_v23  ;;  %10214 = vmatprep.subr.bf16.mxu1 %v11098_v12  ;;  %v11104_v23 = vld [vmem:[%s13906_s1 + $0xfb8] sm:$0xff]   ;;  %v11133_v7 = vld [vmem:[%s13906_s1 + $0x10b0] sm:$0xff]   ;;  %v336_v12 = vcombine.high %v32_v10, %v32_v10 }
 0x1fb   :  { %v11134_v6 = vld [vmem:[%s13906_s1 + $0x1078] sm:$0xff]  }
 0x1fc   :  { %v13038_v13 = vadd.f32 %v9912_v4, %v7490_v11  ;;  %10193 = vmatpush3.bf16.msra.mxu0 %v11099_v14  ;;  %v11131_v4 = vld [vmem:[%s13906_s1 + $0x10f0] sm:$0xff]   ;;  %v11135_v8 = vld [vmem:[%s13906_s1 + $0x10f8] sm:$0xff]   ;;  %v343_v11 = vrot.slane %v32_v10, %v11521_v41  ;;  %v11174_v10 = vld [vmem:[%s13906_s1 + $0x1200] sm:$0xff]  }
 0x1fd   :  { %10194 = vmatprep.subr.bf16.mxu0 %v11101_v15  ;;  %10215 = vmatpush3.bf16.msra.mxu1 %v11100_v16  ;;  %v11136_v9 = vld [vmem:[%s13906_s1 + $0x1038] sm:$0xff]   ;;  %v350_v16 = vrot.slane %v336_v12, %v11521_v41 }
 0x1fe   :  { %10216 = vmatprep.subr.bf16.mxu1 %v11102_v17  ;;  %v11137_v14 = vld [vmem:[%s13906_s1 + $0x10b8] sm:$0xff]   ;;  %v351_v15 = vcombine.high %v343_v11, %v343_v11  ;;  %v11140_v17 = vld [vmem:[%s13906_s1 + $0x11c0] sm:$0xff]  }
 0x1ff   :  { %v352_v21 = vcombine.high %v350_v16, %v350_v16 }
 0x200   :  { %10195 = vmatpush3.bf16.msra.mxu0 %v11103_v18  ;;  %v632_v18 = vpack.c.bf16 %v343_v11, %v343_v11  ;;  %v633_v20 = vpack.c.bf16 %v351_v15, %v351_v15  ;;  %v11176_v15 = vld [vmem:[%s13906_s1 + $0x1248] sm:$0xff]  }
 0x201   :  { %10224 = vmatprep.subr.bf16.mxu0 %v11106_v22  ;;  %10217 = vmatpush3.bf16.msra.mxu1 %v11104_v23  ;;  %v11142_v22 = vld [vmem:[%s13906_s1 + $0x1180] sm:$0xff]   ;;  %v634_v23 = vpack.c.bf16 %v350_v16, %v350_v16  ;;  %v635_v25 = vpack.c.bf16 %v352_v21, %v352_v21  ;;  %v11181_v21 = vld [vmem:[%s13906_s1 + $0x12d0] sm:$0xff]  }
 0x202   :  { %10246 = vmatprep.subr.bf16.mxu1 %v11107_v26  ;;  %v11144_v26 = vld [vmem:[%s13906_s1 + $0x11c8] sm:$0xff]  }
 0x203   :  { %8048 = vmatmul.mubr.bf16.vlgmr.msra.gmra.mrb[60].mxu0 %v628_v27  ;;  %v11145_v27 = vld [vmem:[%s13906_s1 + $0x1108] sm:$0xff]  }
 0x204   :  { %10225 = vmatpush3.bf16.msra.mxu0 %v11108_v28  ;;  %8088 = vmatmul.mubr.bf16.vlgmr.msra.gmra.mrb[60].mxu1 %v630_v32  ;;  %v11146_v28 = vld [vmem:[%s13906_s1 + $0x1188] sm:$0xff]   ;;  %v11150_v32 = vld [vmem:[%s13906_s1 + $0x1190] sm:$0xff]  }
 0x205   :  { %10226 = vmatprep.subr.bf16.mxu0 %v11110_v33  ;;  %10247 = vmatpush3.bf16.msra.mxu1 %v11109_v31  ;;  %v11149_v31 = vld [vmem:[%s13906_s1 + $0x1110] sm:$0xff]   ;;  %v11151_v33 = vld [vmem:[%s13906_s1 + $0x1158] sm:$0xff]  }
 0x206   :  { %10248 = vmatprep.subr.bf16.mxu1 %v11111_v35  ;;  %8127 = vmatprep.mubr.bf16.mxu0 %v633_v20  ;;  %v11153_v35 = vld [vmem:[%s13906_s1 + $0x1118] sm:$0xff]   ;;  %v11180_v20 = vld [vmem:[%s13906_s1 + $0x1250] sm:$0xff]  }
 0x207   :  { %8167 = vmatprep.mubr.bf16.mxu1 %v635_v25  ;;  %v11185_v25 = vld [vmem:[%s13906_s1 + $0x12d8] sm:$0xff]  }
 0x208   :  { %10227 = vmatpush3.bf16.msra.mxu0 %v11112_v36  ;;  %v11154_v36 = vld [vmem:[%s13906_s1 + $0x1198] sm:$0xff]  }
 0x209   :  { %10228 = vmatprep.subr.bf16.mxu0 %v11114_v38  ;;  %10249 = vmatpush3.bf16.msra.mxu1 %v11113_v37  ;;  %v11155_v37 = vld [vmem:[%s13906_s1 + $0x1160] sm:$0xff]  }
 0x20a   :  { %10250 = vmatprep.subr.bf16.mxu1 %v11115_v39  ;;  %v11156_v38 = vld [vmem:[%s13906_s1 + $0x11e0] sm:$0xff]  }
 0x20b   :  { %v11157_v39 = vld [vmem:[%s13906_s1 + $0x1120] sm:$0xff]  }
 0x20c   :  { %10229 = vmatpush3.bf16.msra.mxu0 %v11116_v40  ;;  %v11158_v40 = vld [vmem:[%s13906_s1 + $0x11a0] sm:$0xff]  }
 0x20d   :  { %10230 = vmatprep.subr.bf16.mxu0 %v11118_v43  ;;  %10251 = vmatpush3.bf16.msra.mxu1 %v11117_v42 }
 0x20e   :  { %10252 = vmatprep.subr.bf16.mxu1 %v11119_v44  ;;  %v11159_v44 = vld [vmem:[%s13906_s1 + $0x1168] sm:$0xff]  }
 0x210   :  { %10231 = vmatpush3.bf16.msra.mxu0 %v11120_v45 }
 0x211   :  { %10232 = vmatprep.subr.bf16.mxu0 %v11122_v47  ;;  %10253 = vmatpush3.bf16.msra.mxu1 %v11121_v46  ;;  %v11160_v47 = vld [vmem:[%s13906_s1 + $0x11e8] sm:$0xff]  }
 0x212   :  { %10254 = vmatprep.subr.bf16.mxu1 %v11123_v48 }
 0x214   :  { %10233 = vmatpush3.bf16.msra.mxu0 %v11124_v49  ;;  %v11161_v49 = vld [vmem:[%s13906_s1 + $0x1128] sm:$0xff]  }
 0x215   :  { %10234 = vmatprep.subr.bf16.mxu0 %v11126_v52  ;;  %10255 = vmatpush3.bf16.msra.mxu1 %v11125_v50 }
 0x216   :  { %v9932_v51 = vpop.f32.mrb[36].mxu0  ;;  %10256 = vmatprep.subr.bf16.mxu1 %v11127_v55  ;;  %v11162_v55 = vld [vmem:[%s13906_s1 + $0x11a8] sm:$0xff]  }
 0x217   :  { %v9954_v53 = vpop.f32.mrb[36].mxu1  ;;  %v9933_v54 = vpop.f32.mrb[37].mxu0 }
 0x218   :  { %v9934_v57 = vadd.f32 %v9933_v54, %v9932_v51  ;;  %v9955_v58 = vpop.f32.mrb[37].mxu1  ;;  %v9935_v59 = vpop.f32.mrb[38].mxu0  ;;  %10235 = vmatpush3.bf16.msra.mxu0 %v11128_v56 }
 0x219   :  { %v9956_v60 = vadd.f32 %v9955_v58, %v9954_v53  ;;  %v9957_v61 = vpop.f32.mrb[38].mxu1  ;;  %v9936_v62 = vpop.f32.mrb[39].mxu0  ;;  %10236 = vmatprep.subr.bf16.mxu0 %v11130_v1  ;;  %10257 = vmatpush3.bf16.msra.mxu1 %v11129_v2  ;;  %v11164_v59 = vld [vmem:[%s13906_s1 + $0x11f0] sm:$0xff]   ;;  %v33_v1 = vld [vmem:[%s13905_s0 + $0x88] sm:$0xff] }
 0x21a   :  { %v7570_v63 = vadd.f32 %v9934_v57, %v13038_v13  ;;  %v9958_v0 = vpop.f32.mrb[39].mxu1  ;;  %10258 = vmatprep.subr.bf16.mxu1 %v11131_v4  ;;  %v11139_v13 = vld [vmem:[%s13906_s1 + $0x1140] sm:$0xff]   ;;  %v11163_v57 = vld [vmem:[%s13906_s1 + $0x1170] sm:$0xff]   ;;  %v11167_v62 = vld [vmem:[%s13906_s1 + $0x1178] sm:$0xff]   ;;  %v360_v2 = vrot.slane %v33_v1, %v11521_v41 }
 0x21b   :  { %v11166_v61 = vld [vmem:[%s13906_s1 + $0x11b0] sm:$0xff]   ;;  %v11169_v0 = vld [vmem:[%s13906_s1 + $0x1138] sm:$0xff]   ;;  %v11172_v4 = vld [vmem:[%s13906_s1 + $0x1240] sm:$0xff]  }
 0x21c   :  { %v13139_v3 = vadd.f32 %v9956_v60, %v7570_v63  ;;  %10237 = vmatpush3.bf16.msra.mxu0 %v11132_v5  ;;  %v11165_v60 = vld [vmem:[%s13906_s1 + $0x1130] sm:$0xff]   ;;  %v11168_v63 = vld [vmem:[%s13906_s1 + $0x11f8] sm:$0xff]  }
 0x21d   :  { %10238 = vmatprep.subr.bf16.mxu0 %v11134_v6  ;;  %10259 = vmatpush3.bf16.msra.mxu1 %v11133_v7  ;;  %v11170_v5 = vld [vmem:[%s13906_s1 + $0x11b8] sm:$0xff]   ;;  %v368_v6 = vcombine.high %v360_v2, %v360_v2 }
 0x21e   :  { %10260 = vmatprep.subr.bf16.mxu1 %v11135_v8  ;;  %v11173_v8 = vld [vmem:[%s13906_s1 + $0x12c0] sm:$0xff]  }
 0x21f   :  { %v637_v11 = vpack.c.bf16 %v368_v6, %v368_v6  ;;  %v11209_v6 = vld [vmem:[%s13906_s1 + $0x1348] sm:$0xff]  }
 0x220   :  { %10239 = vmatpush3.bf16.msra.mxu0 %v11136_v9  ;;  %v636_v9 = vpack.c.bf16 %v360_v2, %v360_v2 }
 0x221   :  { %10268 = vmatprep.subr.bf16.mxu0 %v11139_v13  ;;  %10261 = vmatpush3.bf16.msra.mxu1 %v11137_v14  ;;  %v11175_v13 = vld [vmem:[%s13906_s1 + $0x1280] sm:$0xff]  }
 0x222   :  { %10290 = vmatprep.subr.bf16.mxu1 %v11140_v17  ;;  %v11177_v17 = vld [vmem:[%s13906_s1 + $0x12c8] sm:$0xff]  }
 0x223   :  { %8128 = vmatmul.mubr.bf16.vlgmr.msra.gmra.mrb[64].mxu0 %v632_v18  ;;  %v11178_v18 = vld [vmem:[%s13906_s1 + $0x1208] sm:$0xff]  }
 0x224   :  { %10269 = vmatpush3.bf16.msra.mxu0 %v11141_v19  ;;  %8168 = vmatmul.mubr.bf16.vlgmr.msra.gmra.mrb[64].mxu1 %v634_v23  ;;  %v11179_v19 = vld [vmem:[%s13906_s1 + $0x1288] sm:$0xff]   ;;  %v11183_v23 = vld [vmem:[%s13906_s1 + $0x1290] sm:$0xff]  }
 0x225   :  { %10270 = vmatprep.subr.bf16.mxu0 %v11143_v24  ;;  %10291 = vmatpush3.bf16.msra.mxu1 %v11142_v22  ;;  %v11182_v22 = vld [vmem:[%s13906_s1 + $0x1210] sm:$0xff]   ;;  %v11184_v24 = vld [vmem:[%s13906_s1 + $0x1258] sm:$0xff]  }
 0x226   :  { %10292 = vmatprep.subr.bf16.mxu1 %v11144_v26  ;;  %8207 = vmatprep.mubr.bf16.mxu0 %v637_v11  ;;  %v11186_v26 = vld [vmem:[%s13906_s1 + $0x1218] sm:$0xff]   ;;  %v11213_v11 = vld [vmem:[%s13906_s1 + $0x1350] sm:$0xff]  }
 0x228   :  { %10271 = vmatpush3.bf16.msra.mxu0 %v11145_v27  ;;  %v11187_v27 = vld [vmem:[%s13906_s1 + $0x1298] sm:$0xff]  }
 0x229   :  { %10272 = vmatprep.subr.bf16.mxu0 %v11147_v29  ;;  %10293 = vmatpush3.bf16.msra.mxu1 %v11146_v28  ;;  %v11188_v28 = vld [vmem:[%s13906_s1 + $0x1260] sm:$0xff]  }
 0x22a   :  { %10294 = vmatprep.subr.bf16.mxu1 %v11148_v30  ;;  %v11189_v29 = vld [vmem:[%s13906_s1 + $0x12e0] sm:$0xff]  }
 0x22b   :  { %v11190_v30 = vld [vmem:[%s13906_s1 + $0x1220] sm:$0xff]  }
 0x22c   :  { %10273 = vmatpush3.bf16.msra.mxu0 %v11149_v31  ;;  %v11191_v31 = vld [vmem:[%s13906_s1 + $0x12a0] sm:$0xff]  }
 0x22d   :  { %10274 = vmatprep.subr.bf16.mxu0 %v11151_v33  ;;  %10295 = vmatpush3.bf16.msra.mxu1 %v11150_v32 }
 0x22e   :  { %10296 = vmatprep.subr.bf16.mxu1 %v11152_v34  ;;  %v11192_v34 = vld [vmem:[%s13906_s1 + $0x1268] sm:$0xff]  }
 0x230   :  { %10275 = vmatpush3.bf16.msra.mxu0 %v11153_v35 }
 0x231   :  { %10276 = vmatprep.subr.bf16.mxu0 %v11155_v37  ;;  %10297 = vmatpush3.bf16.msra.mxu1 %v11154_v36  ;;  %v11193_v37 = vld [vmem:[%s13906_s1 + $0x12e8] sm:$0xff]  }
 0x232   :  { %10298 = vmatprep.subr.bf16.mxu1 %v11156_v38 }
 0x234   :  { %10277 = vmatpush3.bf16.msra.mxu0 %v11157_v39  ;;  %v11194_v39 = vld [vmem:[%s13906_s1 + $0x1228] sm:$0xff]  }
 0x235   :  { %10278 = vmatprep.subr.bf16.mxu0 %v11159_v44  ;;  %10299 = vmatpush3.bf16.msra.mxu1 %v11158_v40 }
 0x236   :  { %v9976_v42 = vpop.f32.mrb[40].mxu0  ;;  %10300 = vmatprep.subr.bf16.mxu1 %v11160_v47 }
 0x237   :  { %v9977_v43 = vpop.f32.mrb[41].mxu0  ;;  %v9998_v45 = vpop.f32.mrb[40].mxu1 }
 0x238   :  { %v9978_v46 = vadd.f32 %v9977_v43, %v9976_v42  ;;  %v9979_v48 = vpop.f32.mrb[42].mxu0  ;;  %v9999_v50 = vpop.f32.mrb[41].mxu1  ;;  %10279 = vmatpush3.bf16.msra.mxu0 %v11161_v49 }
 0x239   :  { %v9980_v51 = vpop.f32.mrb[43].mxu0  ;;  %v10000_v53 = vadd.f32 %v9999_v50, %v9998_v45  ;;  %v10001_v54 = vpop.f32.mrb[42].mxu1  ;;  %10280 = vmatprep.subr.bf16.mxu0 %v11163_v57  ;;  %10301 = vmatpush3.bf16.msra.mxu1 %v11162_v55  ;;  %v11196_v48 = vld [vmem:[%s13906_s1 + $0x1270] sm:$0xff]   ;;  %v11202_v55 = vld [vmem:[%s13906_s1 + $0x1238] sm:$0xff]  }
 0x23a   :  { %v7650_v52 = vadd.f32 %v9978_v46, %v13139_v3  ;;  %v10002_v56 = vpop.f32.mrb[43].mxu1  ;;  %10302 = vmatprep.subr.bf16.mxu1 %v11164_v59  ;;  %v353_v3 = vcombine.high %v33_v1, %v33_v1  ;;  %v11195_v46 = vld [vmem:[%s13906_s1 + $0x12a8] sm:$0xff]   ;;  %v11197_v50 = vld [vmem:[%s13906_s1 + $0x12f0] sm:$0xff]   ;;  %v11201_v54 = vld [vmem:[%s13906_s1 + $0x12f8] sm:$0xff]  }
 0x23b   :  { %v11198_v51 = vld [vmem:[%s13906_s1 + $0x1230] sm:$0xff]   ;;  %v11203_v57 = vld [vmem:[%s13906_s1 + $0x12b8] sm:$0xff]   ;;  %v11207_v1 = vld [vmem:[%s13906_s1 + $0x1300] sm:$0xff]  }
 0x23c   :  { %v13243_v58 = vadd.f32 %v10000_v53, %v7650_v52  ;;  %10281 = vmatpush3.bf16.msra.mxu0 %v11165_v60  ;;  %v367_v7 = vrot.slane %v353_v3, %v11521_v41  ;;  %v11199_v52 = vld [vmem:[%s13906_s1 + $0x12b0] sm:$0xff]   ;;  %v11200_v53 = vld [vmem:[%s13906_s1 + $0x1278] sm:$0xff]   ;;  %v11205_v60 = vld [vmem:[%s13906_s1 + $0x1340] sm:$0xff]  }
 0x23d   :  { %10282 = vmatprep.subr.bf16.mxu0 %v11167_v62  ;;  %10303 = vmatpush3.bf16.msra.mxu1 %v11166_v61  ;;  %v34_v56 = vld [vmem:[%s13905_s0 + $0x90] sm:$0xff] }
 0x23e   :  { %10304 = vmatprep.subr.bf16.mxu1 %v11168_v63  ;;  %v369_v12 = vcombine.high %v367_v7, %v367_v7  ;;  %v638_v14 = vpack.c.bf16 %v367_v7, %v367_v7  ;;  %v370_v59 = vcombine.high %v34_v56, %v34_v56  ;;  %v11206_v63 = vld [vmem:[%s13906_s1 + $0x13c0] sm:$0xff]  }
 0x240   :  { %10283 = vmatpush3.bf16.msra.mxu0 %v11169_v0  ;;  %v639_v16 = vpack.c.bf16 %v369_v12, %v369_v12  ;;  %v384_v62 = vrot.slane %v370_v59, %v11521_v41  ;;  %v11214_v12 = vld [vmem:[%s13906_s1 + $0x13d0] sm:$0xff]  }
 0x241   :  { %10312 = vmatprep.subr.bf16.mxu0 %v11172_v4  ;;  %10305 = vmatpush3.bf16.msra.mxu1 %v11170_v5  ;;  %v11208_v4 = vld [vmem:[%s13906_s1 + $0x1380] sm:$0xff]  }
 0x242   :  { %10334 = vmatprep.subr.bf16.mxu1 %v11173_v8  ;;  %8247 = vmatprep.mubr.bf16.mxu1 %v639_v16  ;;  %v386_v3 = vcombine.high %v384_v62, %v384_v62  ;;  %v642_v5 = vpack.c.bf16 %v384_v62, %v384_v62  ;;  %v11210_v8 = vld [vmem:[%s13906_s1 + $0x13c8] sm:$0xff]   ;;  %v11218_v16 = vld [vmem:[%s13906_s1 + $0x13d8] sm:$0xff]   ;;  %v11241_v62 = vld [vmem:[%s13906_s1 + $0x1480] sm:$0xff]  }
 0x243   :  { %8208 = vmatmul.mubr.bf16.vlgmr.msra.gmra.mrb[68].mxu0 %v636_v9  ;;  %v11211_v9 = vld [vmem:[%s13906_s1 + $0x1308] sm:$0xff]  }
 0x244   :  { %10313 = vmatpush3.bf16.msra.mxu0 %v11174_v10  ;;  %8248 = vmatmul.mubr.bf16.vlgmr.msra.gmra.mrb[68].mxu1 %v638_v14  ;;  %v643_v7 = vpack.c.bf16 %v386_v3, %v386_v3  ;;  %v11212_v10 = vld [vmem:[%s13906_s1 + $0x1388] sm:$0xff]   ;;  %v11216_v14 = vld [vmem:[%s13906_s1 + $0x1390] sm:$0xff]  }
 0x245   :  { %10314 = vmatprep.subr.bf16.mxu0 %v11176_v15  ;;  %10335 = vmatpush3.bf16.msra.mxu1 %v11175_v13  ;;  %v11215_v13 = vld [vmem:[%s13906_s1 + $0x1310] sm:$0xff]   ;;  %v11217_v15 = vld [vmem:[%s13906_s1 + $0x1358] sm:$0xff]  }
 0x246   :  { %10336 = vmatprep.subr.bf16.mxu1 %v11177_v17  ;;  %8327 = vmatprep.mubr.bf16.mxu1 %v643_v7  ;;  %v11219_v17 = vld [vmem:[%s13906_s1 + $0x1318] sm:$0xff]   ;;  %v11247_v3 = vld [vmem:[%s13906_s1 + $0x14d0] sm:$0xff]  }
 0x247   :  { %v11251_v7 = vld [vmem:[%s13906_s1 + $0x14d8] sm:$0xff]  }
 0x248   :  { %10315 = vmatpush3.bf16.msra.mxu0 %v11178_v18  ;;  %v11220_v18 = vld [vmem:[%s13906_s1 + $0x1398] sm:$0xff]  }
 0x249   :  { %10316 = vmatprep.subr.bf16.mxu0 %v11180_v20  ;;  %10337 = vmatpush3.bf16.msra.mxu1 %v11179_v19  ;;  %v11221_v19 = vld [vmem:[%s13906_s1 + $0x1360] sm:$0xff]  }
 0x24a   :  { %10338 = vmatprep.subr.bf16.mxu1 %v11181_v21  ;;  %v11222_v20 = vld [vmem:[%s13906_s1 + $0x13e0] sm:$0xff]  }
 0x24b   :  { %v11223_v21 = vld [vmem:[%s13906_s1 + $0x1320] sm:$0xff]  }
 0x24c   :  { %10317 = vmatpush3.bf16.msra.mxu0 %v11182_v22  ;;  %v11224_v22 = vld [vmem:[%s13906_s1 + $0x13a0] sm:$0xff]  }
 0x24d   :  { %10318 = vmatprep.subr.bf16.mxu0 %v11184_v24  ;;  %10339 = vmatpush3.bf16.msra.mxu1 %v11183_v23  ;;  %v11225_v24 = vld [vmem:[%s13906_s1 + $0x1368] sm:$0xff]  }
 0x24e   :  { %10340 = vmatprep.subr.bf16.mxu1 %v11185_v25 }
 0x250   :  { %10319 = vmatpush3.bf16.msra.mxu0 %v11186_v26  ;;  %v11226_v26 = vld [vmem:[%s13906_s1 + $0x13e8] sm:$0xff]  }
 0x251   :  { %10320 = vmatprep.subr.bf16.mxu0 %v11188_v28  ;;  %10341 = vmatpush3.bf16.msra.mxu1 %v11187_v27 }
 0x252   :  { %10342 = vmatprep.subr.bf16.mxu1 %v11189_v29 }
 0x254   :  { %10321 = vmatpush3.bf16.msra.mxu0 %v11190_v30 }
 0x255   :  { %10322 = vmatprep.subr.bf16.mxu0 %v11192_v34  ;;  %10343 = vmatpush3.bf16.msra.mxu1 %v11191_v31  ;;  %v11227_v31 = vld [vmem:[%s13906_s1 + $0x1328] sm:$0xff]  }
 0x256   :  { %v10020_v32 = vpop.f32.mrb[44].mxu0  ;;  %10344 = vmatprep.subr.bf16.mxu1 %v11193_v37  ;;  %v11229_v37 = vld [vmem:[%s13906_s1 + $0x1370] sm:$0xff]  }
 0x257   :  { %v10021_v33 = vpop.f32.mrb[45].mxu0  ;;  %v10042_v35 = vpop.f32.mrb[44].mxu1 }
 0x258   :  { %v10022_v36 = vadd.f32 %v10021_v33, %v10020_v32  ;;  %v10023_v38 = vpop.f32.mrb[46].mxu0  ;;  %v10043_v40 = vpop.f32.mrb[45].mxu1  ;;  %10323 = vmatpush3.bf16.msra.mxu0 %v11194_v39  ;;  %v11228_v32 = vld [vmem:[%s13906_s1 + $0x13a8] sm:$0xff]   ;;  %v11230_v39 = vld [vmem:[%s13906_s1 + $0x13f0] sm:$0xff]  }
 0x259   :  { %v10024_v42 = vpop.f32.mrb[47].mxu0  ;;  %v10044_v44 = vadd.f32 %v10043_v40, %v10042_v35  ;;  %v10045_v45 = vpop.f32.mrb[46].mxu1  ;;  %10324 = vmatprep.subr.bf16.mxu0 %v11196_v48  ;;  %10345 = vmatpush3.bf16.msra.mxu1 %v11195_v46  ;;  %v11235_v46 = vld [vmem:[%s13906_s1 + $0x1338] sm:$0xff]  }
 0x25a   :  { %v7730_v43 = vadd.f32 %v10022_v36, %v13243_v58  ;;  %v10046_v47 = vpop.f32.mrb[47].mxu1  ;;  %10346 = vmatprep.subr.bf16.mxu1 %v11197_v50  ;;  %v377_v58 = vrot.slane %v34_v56, %v11521_v41  ;;  %v11231_v42 = vld [vmem:[%s13906_s1 + $0x1330] sm:$0xff]   ;;  %v11234_v45 = vld [vmem:[%s13906_s1 + $0x13f8] sm:$0xff]   ;;  %v11238_v50 = vld [vmem:[%s13906_s1 + $0x1440] sm:$0xff]  }
 0x25b   :  { %v35_v47 = vld [vmem:[%s13905_s0 + $0x98] sm:$0xff] }
 0x25c   :  { %v13347_v49 = vadd.f32 %v10044_v44, %v7730_v43  ;;  %10325 = vmatpush3.bf16.msra.mxu0 %v11198_v51  ;;  %v385_v61 = vcombine.high %v377_v58, %v377_v58  ;;  %v640_v0 = vpack.c.bf16 %v377_v58, %v377_v58  ;;  %v11233_v43 = vld [vmem:[%s13906_s1 + $0x1378] sm:$0xff]   ;;  %v11232_v44 = vld [vmem:[%s13906_s1 + $0x13b0] sm:$0xff]   ;;  %v394_v48 = vrot.slane %v35_v47, %v11521_v41  ;;  %v11240_v58 = vld [vmem:[%s13906_s1 + $0x1400] sm:$0xff]  }
 0x25d   :  { %10326 = vmatprep.subr.bf16.mxu0 %v11200_v53  ;;  %10347 = vmatpush3.bf16.msra.mxu1 %v11199_v52  ;;  %v11236_v51 = vld [vmem:[%s13906_s1 + $0x13b8] sm:$0xff]  }
 0x25e   :  { %10348 = vmatprep.subr.bf16.mxu1 %v11201_v54  ;;  %v641_v2 = vpack.c.bf16 %v385_v61, %v385_v61  ;;  %v402_v52 = vcombine.high %v394_v48, %v394_v48  ;;  %v11239_v54 = vld [vmem:[%s13906_s1 + $0x14c0] sm:$0xff]  }
 0x260   :  { %10327 = vmatpush3.bf16.msra.mxu0 %v11202_v55  ;;  %8287 = vmatprep.mubr.bf16.mxu0 %v641_v2  ;;  %v644_v55 = vpack.c.bf16 %v394_v48, %v394_v48  ;;  %v645_v56 = vpack.c.bf16 %v402_v52, %v402_v52  ;;  %v11245_v2 = vld [vmem:[%s13906_s1 + $0x1488] sm:$0xff]  }
 0x261   :  { %10356 = vmatprep.subr.bf16.mxu0 %v11205_v60  ;;  %10349 = vmatpush3.bf16.msra.mxu1 %v11203_v57  ;;  %v11242_v60 = vld [vmem:[%s13906_s1 + $0x1448] sm:$0xff]  }
 0x262   :  { %10378 = vmatprep.subr.bf16.mxu1 %v11206_v63  ;;  %v11243_v63 = vld [vmem:[%s13906_s1 + $0x14c8] sm:$0xff]  }
 0x263   :  { %8288 = vmatmul.mubr.bf16.vlgmr.msra.gmra.mrb[72].mxu0 %v640_v0  ;;  %v11244_v0 = vld [vmem:[%s13906_s1 + $0x1408] sm:$0xff]  }
 0x264   :  { %10357 = vmatpush3.bf16.msra.mxu0 %v11207_v1  ;;  %8328 = vmatmul.mubr.bf16.vlgmr.msra.gmra.mrb[72].mxu1 %v642_v5  ;;  %v11246_v1 = vld [vmem:[%s13906_s1 + $0x1450] sm:$0xff]   ;;  %v11250_v5 = vld [vmem:[%s13906_s1 + $0x1458] sm:$0xff]  }
 0x265   :  { %10358 = vmatprep.subr.bf16.mxu0 %v11209_v6  ;;  %10379 = vmatpush3.bf16.msra.mxu1 %v11208_v4  ;;  %v11248_v4 = vld [vmem:[%s13906_s1 + $0x1410] sm:$0xff]  }
 0x266   :  { %10380 = vmatprep.subr.bf16.mxu1 %v11210_v8  ;;  %8367 = vmatprep.mubr.bf16.mxu0 %v645_v56  ;;  %v11249_v6 = vld [vmem:[%s13906_s1 + $0x1490] sm:$0xff]   ;;  %v11252_v8 = vld [vmem:[%s13906_s1 + $0x1418] sm:$0xff]  }
 0x267   :  { %v11279_v56 = vld [vmem:[%s13906_s1 + $0x1550] sm:$0xff]  }
 0x268   :  { %10359 = vmatpush3.bf16.msra.mxu0 %v11211_v9  ;;  %v11254_v9 = vld [vmem:[%s13906_s1 + $0x1460] sm:$0xff]  }
 0x269   :  { %10360 = vmatprep.subr.bf16.mxu0 %v11213_v11  ;;  %10381 = vmatpush3.bf16.msra.mxu1 %v11212_v10  ;;  %v11253_v10 = vld [vmem:[%s13906_s1 + $0x1498] sm:$0xff]   ;;  %v11255_v11 = vld [vmem:[%s13906_s1 + $0x14e0] sm:$0xff]  }
 0x26a   :  { %10382 = vmatprep.subr.bf16.mxu1 %v11214_v12  ;;  %v11256_v12 = vld [vmem:[%s13906_s1 + $0x1420] sm:$0xff]  }
 0x26c   :  { %10361 = vmatpush3.bf16.msra.mxu0 %v11215_v13 }
 0x26d   :  { %10362 = vmatprep.subr.bf16.mxu0 %v11217_v15  ;;  %10383 = vmatpush3.bf16.msra.mxu1 %v11216_v14  ;;  %v11258_v14 = vld [vmem:[%s13906_s1 + $0x1468] sm:$0xff]   ;;  %v11257_v15 = vld [vmem:[%s13906_s1 + $0x14a0] sm:$0xff]  }
 0x26e   :  { %10384 = vmatprep.subr.bf16.mxu1 %v11218_v16 }
 0x270   :  { %10363 = vmatpush3.bf16.msra.mxu0 %v11219_v17 }
 0x271   :  { %10364 = vmatprep.subr.bf16.mxu0 %v11221_v19  ;;  %10385 = vmatpush3.bf16.msra.mxu1 %v11220_v18  ;;  %v11259_v19 = vld [vmem:[%s13906_s1 + $0x14e8] sm:$0xff]  }
 0x272   :  { %10386 = vmatprep.subr.bf16.mxu1 %v11222_v20 }
 0x274   :  { %10365 = vmatpush3.bf16.msra.mxu0 %v11223_v21  ;;  %v11260_v21 = vld [vmem:[%s13906_s1 + $0x1428] sm:$0xff]  }
 0x275   :  { %10366 = vmatprep.subr.bf16.mxu0 %v11225_v24  ;;  %10387 = vmatpush3.bf16.msra.mxu1 %v11224_v22 }
 0x276   :  { %v10064_v23 = vpop.f32.mrb[48].mxu0  ;;  %10388 = vmatprep.subr.bf16.mxu1 %v11226_v26 }
 0x277   :  { %v10065_v25 = vpop.f32.mrb[49].mxu0  ;;  %v10086_v27 = vpop.f32.mrb[48].mxu1 }
 0x278   :  { %v10066_v28 = vadd.f32 %v10065_v25, %v10064_v23  ;;  %v10067_v29 = vpop.f32.mrb[50].mxu0  ;;  %v10087_v30 = vpop.f32.mrb[49].mxu1  ;;  %10367 = vmatpush3.bf16.msra.mxu0 %v11227_v31  ;;  %v11261_v23 = vld [vmem:[%s13906_s1 + $0x14a8] sm:$0xff]  }
 0x279   :  { %v10068_v33 = vpop.f32.mrb[51].mxu0  ;;  %v10088_v35 = vadd.f32 %v10087_v30, %v10086_v27  ;;  %v10089_v36 = vpop.f32.mrb[50].mxu1  ;;  %10368 = vmatprep.subr.bf16.mxu0 %v11229_v37  ;;  %10389 = vmatpush3.bf16.msra.mxu1 %v11228_v32  ;;  %v11263_v30 = vld [vmem:[%s13906_s1 + $0x14f0] sm:$0xff]   ;;  %v36_v37 = vld [vmem:[%s13905_s0 + $0xa0] sm:$0xff] }
 0x27a   :  { %v7810_v34 = vadd.f32 %v10066_v28, %v13347_v49  ;;  %v10090_v38 = vpop.f32.mrb[51].mxu1  ;;  %10390 = vmatprep.subr.bf16.mxu1 %v11230_v39  ;;  %v387_v49 = vcombine.high %v35_v47, %v35_v47  ;;  %v11262_v28 = vld [vmem:[%s13906_s1 + $0x1470] sm:$0xff]   ;;  %v11268_v36 = vld [vmem:[%s13906_s1 + $0x1438] sm:$0xff]   ;;  %v404_v39 = vcombine.high %v36_v37, %v36_v37 }
 0x27b   :  { %v11264_v32 = vld [vmem:[%s13906_s1 + $0x1430] sm:$0xff]   ;;  %v411_v38 = vrot.slane %v36_v37, %v11521_v41  ;;  %v11306_v37 = vld [vmem:[%s13906_s1 + $0x1600] sm:$0xff]  }
 0x27c   :  { %v13454_v40 = vadd.f32 %v10088_v35, %v7810_v34  ;;  %10369 = vmatpush3.bf16.msra.mxu0 %v11231_v42  ;;  %v401_v53 = vrot.slane %v387_v49, %v11521_v41  ;;  %v11265_v33 = vld [vmem:[%s13906_s1 + $0x14b0] sm:$0xff]   ;;  %v11266_v34 = vld [vmem:[%s13906_s1 + $0x1478] sm:$0xff]   ;;  %v11273_v49 = vld [vmem:[%s13906_s1 + $0x1500] sm:$0xff]  }
 0x27d   :  { %10370 = vmatprep.subr.bf16.mxu0 %v11233_v43  ;;  %10391 = vmatpush3.bf16.msra.mxu1 %v11232_v44  ;;  %v11267_v35 = vld [vmem:[%s13906_s1 + $0x14f8] sm:$0xff]   ;;  %v419_v43 = vcombine.high %v411_v38, %v411_v38  ;;  %v418_v44 = vrot.slane %v404_v39, %v11521_v41 }
 0x27e   :  { %10392 = vmatprep.subr.bf16.mxu1 %v11234_v45  ;;  %v403_v57 = vcombine.high %v401_v53, %v401_v53  ;;  %v646_v59 = vpack.c.bf16 %v401_v53, %v401_v53  ;;  %v11269_v42 = vld [vmem:[%s13906_s1 + $0x14b8] sm:$0xff]   ;;  %v11272_v45 = vld [vmem:[%s13906_s1 + $0x15c0] sm:$0xff]  }
 0x27f   :  { %v649_v47 = vpack.c.bf16 %v419_v43, %v419_v43  ;;  %v420_v48 = vcombine.high %v418_v44, %v418_v44  ;;  %v11274_v53 = vld [vmem:[%s13906_s1 + $0x1580] sm:$0xff]   ;;  %v11308_v43 = vld [vmem:[%s13906_s1 + $0x1648] sm:$0xff]  }
 0x280   :  { %10371 = vmatpush3.bf16.msra.mxu0 %v11235_v46  ;;  %v647_v61 = vpack.c.bf16 %v403_v57, %v403_v57  ;;  %v648_v46 = vpack.c.bf16 %v411_v38, %v411_v38  ;;  %v11278_v57 = vld [vmem:[%s13906_s1 + $0x1588] sm:$0xff]  }
 0x281   :  { %10400 = vmatprep.subr.bf16.mxu0 %v11238_v50  ;;  %10393 = vmatpush3.bf16.msra.mxu1 %v11236_v51  ;;  %v650_v50 = vpack.c.bf16 %v418_v44, %v418_v44  ;;  %v11275_v51 = vld [vmem:[%s13906_s1 + $0x1548] sm:$0xff]   ;;  %v651_v52 = vpack.c.bf16 %v420_v48, %v420_v48  ;;  %v11312_v48 = vld [vmem:[%s13906_s1 + $0x1650] sm:$0xff]  }
 0x282   :  { %10422 = vmatprep.subr.bf16.mxu1 %v11239_v54  ;;  %8407 = vmatprep.mubr.bf16.mxu1 %v647_v61  ;;  %v11276_v54 = vld [vmem:[%s13906_s1 + $0x15c8] sm:$0xff]   ;;  %v11282_v61 = vld [vmem:[%s13906_s1 + $0x1590] sm:$0xff]  }
 0x283   :  { %8368 = vmatmul.mubr.bf16.vlgmr.msra.gmra.mrb[76].mxu0 %v644_v55  ;;  %v11277_v55 = vld [vmem:[%s13906_s1 + $0x1508] sm:$0xff]  }
 0x284   :  { %10401 = vmatpush3.bf16.msra.mxu0 %v11240_v58  ;;  %8408 = vmatmul.mubr.bf16.vlgmr.msra.gmra.mrb[76].mxu1 %v646_v59  ;;  %v11280_v58 = vld [vmem:[%s13906_s1 + $0x15d0] sm:$0xff]  }
 0x285   :  { %10402 = vmatprep.subr.bf16.mxu0 %v11242_v60  ;;  %10423 = vmatpush3.bf16.msra.mxu1 %v11241_v62  ;;  %v11281_v59 = vld [vmem:[%s13906_s1 + $0x1510] sm:$0xff]   ;;  %v11283_v60 = vld [vmem:[%s13906_s1 + $0x1558] sm:$0xff]  }
 0x286   :  { %10424 = vmatprep.subr.bf16.mxu1 %v11243_v63  ;;  %8447 = vmatprep.mubr.bf16.mxu0 %v649_v47  ;;  %v11284_v62 = vld [vmem:[%s13906_s1 + $0x15d8] sm:$0xff]   ;;  %v11311_v47 = vld [vmem:[%s13906_s1 + $0x1688] sm:$0xff]  }
 0x287   :  { %8487 = vmatprep.mubr.bf16.mxu1 %v651_v52  ;;  %v11285_v63 = vld [vmem:[%s13906_s1 + $0x1518] sm:$0xff]  }
 0x288   :  { %10403 = vmatpush3.bf16.msra.mxu0 %v11244_v0  ;;  %v11287_v0 = vld [vmem:[%s13906_s1 + $0x1560] sm:$0xff]   ;;  %v11316_v52 = vld [vmem:[%s13906_s1 + $0x1658] sm:$0xff]  }
 0x289   :  { %10404 = vmatprep.subr.bf16.mxu0 %v11246_v1  ;;  %10425 = vmatpush3.bf16.msra.mxu1 %v11245_v2  ;;  %v11286_v1 = vld [vmem:[%s13906_s1 + $0x1598] sm:$0xff]   ;;  %v11288_v2 = vld [vmem:[%s13906_s1 + $0x15e0] sm:$0xff]  }
 0x28a   :  { %10426 = vmatprep.subr.bf16.mxu1 %v11247_v3  ;;  %v11289_v3 = vld [vmem:[%s13906_s1 + $0x1520] sm:$0xff]  }
 0x28c   :  { %10405 = vmatpush3.bf16.msra.mxu0 %v11248_v4 }
 0x28d   :  { %10406 = vmatprep.subr.bf16.mxu0 %v11250_v5  ;;  %10427 = vmatpush3.bf16.msra.mxu1 %v11249_v6  ;;  %v11291_v5 = vld [vmem:[%s13906_s1 + $0x1568] sm:$0xff]   ;;  %v11290_v6 = vld [vmem:[%s13906_s1 + $0x15a0] sm:$0xff]  }
 0x28e   :  { %10428 = vmatprep.subr.bf16.mxu1 %v11251_v7 }
 0x290   :  { %10407 = vmatpush3.bf16.msra.mxu0 %v11252_v8 }
 0x291   :  { %10408 = vmatprep.subr.bf16.mxu0 %v11254_v9  ;;  %10429 = vmatpush3.bf16.msra.mxu1 %v11253_v10  ;;  %v11292_v10 = vld [vmem:[%s13906_s1 + $0x15e8] sm:$0xff]  }
 0x292   :  { %10430 = vmatprep.subr.bf16.mxu1 %v11255_v11 }
 0x294   :  { %10409 = vmatpush3.bf16.msra.mxu0 %v11256_v12  ;;  %v11293_v12 = vld [vmem:[%s13906_s1 + $0x1528] sm:$0xff]  }
 0x295   :  { %10410 = vmatprep.subr.bf16.mxu0 %v11258_v14  ;;  %10431 = vmatpush3.bf16.msra.mxu1 %v11257_v15  ;;  %v11294_v14 = vld [vmem:[%s13906_s1 + $0x15a8] sm:$0xff]  }
 0x296   :  { %v10108_v13 = vpop.f32.mrb[52].mxu0  ;;  %10432 = vmatprep.subr.bf16.mxu1 %v11259_v19  ;;  %v11295_v19 = vld [vmem:[%s13906_s1 + $0x1570] sm:$0xff]  }
 0x297   :  { %v10109_v16 = vpop.f32.mrb[53].mxu0  ;;  %v10130_v17 = vpop.f32.mrb[52].mxu1 }
 0x298   :  { %v10110_v18 = vadd.f32 %v10109_v16, %v10108_v13  ;;  %v10111_v20 = vpop.f32.mrb[54].mxu0  ;;  %v10131_v22 = vpop.f32.mrb[53].mxu1  ;;  %10411 = vmatpush3.bf16.msra.mxu0 %v11260_v21  ;;  %v11296_v21 = vld [vmem:[%s13906_s1 + $0x15f0] sm:$0xff]  }
 0x299   :  { %v10112_v24 = vpop.f32.mrb[55].mxu0  ;;  %v10132_v26 = vadd.f32 %v10131_v22, %v10130_v17  ;;  %v10133_v27 = vpop.f32.mrb[54].mxu1  ;;  %10412 = vmatprep.subr.bf16.mxu0 %v11262_v28  ;;  %10433 = vmatpush3.bf16.msra.mxu1 %v11261_v23  ;;  %v11297_v23 = vld [vmem:[%s13906_s1 + $0x1530] sm:$0xff]   ;;  %v37_v28 = vld [vmem:[%s13905_s0 + $0xa8] sm:$0xff] }
 0x29a   :  { %v7890_v25 = vadd.f32 %v10110_v18, %v13454_v40  ;;  %v10134_v29 = vpop.f32.mrb[55].mxu1  ;;  %10434 = vmatprep.subr.bf16.mxu1 %v11263_v30  ;;  %v11271_v40 = vld [vmem:[%s13906_s1 + $0x1540] sm:$0xff]   ;;  %v11298_v24 = vld [vmem:[%s13906_s1 + $0x15b0] sm:$0xff]   ;;  %v11301_v27 = vld [vmem:[%s13906_s1 + $0x1538] sm:$0xff]   ;;  %v428_v30 = vrot.slane %v37_v28, %v11521_v41 }
 0x29b   :  { %v11302_v29 = vld [vmem:[%s13906_s1 + $0x15b8] sm:$0xff]  }
 0x29c   :  { %v13558_v31 = vadd.f32 %v10132_v26, %v7890_v25  ;;  %10413 = vmatpush3.bf16.msra.mxu0 %v11264_v32  ;;  %v11299_v25 = vld [vmem:[%s13906_s1 + $0x1578] sm:$0xff]   ;;  %v11304_v32 = vld [vmem:[%s13906_s1 + $0x1640] sm:$0xff]  }
 0x29d   :  { %10414 = vmatprep.subr.bf16.mxu0 %v11266_v34  ;;  %10435 = vmatpush3.bf16.msra.mxu1 %v11265_v33  ;;  %v11300_v26 = vld [vmem:[%s13906_s1 + $0x15f8] sm:$0xff]   ;;  %v436_v33 = vcombine.high %v428_v30, %v428_v30 }
 0x29e   :  { %10436 = vmatprep.subr.bf16.mxu1 %v11267_v35  ;;  %v11305_v35 = vld [vmem:[%s13906_s1 + $0x16c0] sm:$0xff]  }
 0x29f   :  { %v653_v38 = vpack.c.bf16 %v436_v33, %v436_v33 }
 0x2a0   :  { %10415 = vmatpush3.bf16.msra.mxu0 %v11268_v36  ;;  %v652_v36 = vpack.c.bf16 %v428_v30, %v428_v30  ;;  %v11339_v30 = vld [vmem:[%s13906_s1 + $0x1700] sm:$0xff]  }
 0x2a1   :  { %10444 = vmatprep.subr.bf16.mxu0 %v11271_v40  ;;  %10437 = vmatpush3.bf16.msra.mxu1 %v11269_v42  ;;  %v11307_v40 = vld [vmem:[%s13906_s1 + $0x1680] sm:$0xff]  }
 0x2a2   :  { %10466 = vmatprep.subr.bf16.mxu1 %v11272_v45  ;;  %v11309_v45 = vld [vmem:[%s13906_s1 + $0x16c8] sm:$0xff]  }
 0x2a3   :  { %8448 = vmatmul.mubr.bf16.vlgmr.msra.gmra.mrb[80].mxu0 %v648_v46  ;;  %v11310_v46 = vld [vmem:[%s13906_s1 + $0x1608] sm:$0xff]  }
 0x2a4   :  { %10445 = vmatpush3.bf16.msra.mxu0 %v11273_v49  ;;  %8488 = vmatmul.mubr.bf16.vlgmr.msra.gmra.mrb[80].mxu1 %v650_v50  ;;  %v11313_v49 = vld [vmem:[%s13906_s1 + $0x16d0] sm:$0xff]  }
 0x2a5   :  { %10446 = vmatprep.subr.bf16.mxu0 %v11275_v51  ;;  %10467 = vmatpush3.bf16.msra.mxu1 %v11274_v53  ;;  %v11314_v50 = vld [vmem:[%s13906_s1 + $0x1610] sm:$0xff]   ;;  %v11317_v53 = vld [vmem:[%s13906_s1 + $0x16d8] sm:$0xff]  }
 0x2a6   :  { %10468 = vmatprep.subr.bf16.mxu1 %v11276_v54  ;;  %8527 = vmatprep.mubr.bf16.mxu0 %v653_v38  ;;  %v11315_v51 = vld [vmem:[%s13906_s1 + $0x1690] sm:$0xff]   ;;  %v11318_v54 = vld [vmem:[%s13906_s1 + $0x1618] sm:$0xff]   ;;  %v11344_v38 = vld [vmem:[%s13906_s1 + $0x1788] sm:$0xff]  }
 0x2a8   :  { %10447 = vmatpush3.bf16.msra.mxu0 %v11277_v55  ;;  %v11319_v55 = vld [vmem:[%s13906_s1 + $0x1698] sm:$0xff]  }
 0x2a9   :  { %10448 = vmatprep.subr.bf16.mxu0 %v11279_v56  ;;  %10469 = vmatpush3.bf16.msra.mxu1 %v11278_v57  ;;  %v11320_v56 = vld [vmem:[%s13906_s1 + $0x1660] sm:$0xff]  }
 0x2aa   :  { %10470 = vmatprep.subr.bf16.mxu1 %v11280_v58  ;;  %v11321_v57 = vld [vmem:[%s13906_s1 + $0x16e0] sm:$0xff]  }
 0x2ab   :  { %v11322_v58 = vld [vmem:[%s13906_s1 + $0x1620] sm:$0xff]  }
 0x2ac   :  { %10449 = vmatpush3.bf16.msra.mxu0 %v11281_v59  ;;  %v11323_v59 = vld [vmem:[%s13906_s1 + $0x16a0] sm:$0xff]  }
 0x2ad   :  { %10450 = vmatprep.subr.bf16.mxu0 %v11283_v60  ;;  %10471 = vmatpush3.bf16.msra.mxu1 %v11282_v61  ;;  %v11324_v60 = vld [vmem:[%s13906_s1 + $0x1668] sm:$0xff]  }
 0x2ae   :  { %10472 = vmatprep.subr.bf16.mxu1 %v11284_v62  ;;  %v11325_v62 = vld [vmem:[%s13906_s1 + $0x16e8] sm:$0xff]  }
 0x2b0   :  { %10451 = vmatpush3.bf16.msra.mxu0 %v11285_v63 }
 0x2b1   :  { %10452 = vmatprep.subr.bf16.mxu0 %v11287_v0  ;;  %10473 = vmatpush3.bf16.msra.mxu1 %v11286_v1  ;;  %v11326_v0 = vld [vmem:[%s13906_s1 + $0x1628] sm:$0xff]  }
 0x2b2   :  { %10474 = vmatprep.subr.bf16.mxu1 %v11288_v2 }
 0x2b4   :  { %10453 = vmatpush3.bf16.msra.mxu0 %v11289_v3 }
 0x2b5   :  { %10454 = vmatprep.subr.bf16.mxu0 %v11291_v5  ;;  %10475 = vmatpush3.bf16.msra.mxu1 %v11290_v6  ;;  %v11327_v5 = vld [vmem:[%s13906_s1 + $0x16a8] sm:$0xff]  }
 0x2b6   :  { %v10152_v4 = vpop.f32.mrb[56].mxu0  ;;  %10476 = vmatprep.subr.bf16.mxu1 %v11292_v10 }
 0x2b7   :  { %v10153_v7 = vpop.f32.mrb[57].mxu0  ;;  %v10174_v8 = vpop.f32.mrb[56].mxu1 }
 0x2b8   :  { %v10154_v9 = vadd.f32 %v10153_v7, %v10152_v4  ;;  %v10155_v11 = vpop.f32.mrb[58].mxu0  ;;  %v10175_v13 = vpop.f32.mrb[57].mxu1  ;;  %10455 = vmatpush3.bf16.msra.mxu0 %v11293_v12  ;;  %v11328_v7 = vld [vmem:[%s13906_s1 + $0x1670] sm:$0xff]  }
 0x2b9   :  { %v10156_v15 = vpop.f32.mrb[59].mxu0  ;;  %v10176_v17 = vadd.f32 %v10175_v13, %v10174_v8  ;;  %v10177_v18 = vpop.f32.mrb[58].mxu1  ;;  %10456 = vmatprep.subr.bf16.mxu0 %v11295_v19  ;;  %10477 = vmatpush3.bf16.msra.mxu1 %v11294_v14  ;;  %v11329_v11 = vld [vmem:[%s13906_s1 + $0x16f0] sm:$0xff]  }
 0x2ba   :  { %v7970_v16 = vadd.f32 %v10154_v9, %v13558_v31  ;;  %v10178_v20 = vpop.f32.mrb[59].mxu1  ;;  %10478 = vmatprep.subr.bf16.mxu1 %v11296_v21  ;;  %v421_v31 = vcombine.high %v37_v28, %v37_v28  ;;  %v11330_v13 = vld [vmem:[%s13906_s1 + $0x1630] sm:$0xff]   ;;  %v11332_v15 = vld [vmem:[%s13906_s1 + $0x1678] sm:$0xff]  }
 0x2bb   :  { %v11334_v18 = vld [vmem:[%s13906_s1 + $0x1638] sm:$0xff]   ;;  %v38_v19 = vld [vmem:[%s13905_s0 + $0xb0] sm:$0xff] }
 0x2bc   :  { %v13662_v22 = vadd.f32 %v10176_v17, %v7970_v16  ;;  %10457 = vmatpush3.bf16.msra.mxu0 %v11297_v23  ;;  %v435_v34 = vrot.slane %v421_v31, %v11521_v41  ;;  %v11331_v16 = vld [vmem:[%s13906_s1 + $0x16b0] sm:$0xff]   ;;  %v11333_v17 = vld [vmem:[%s13906_s1 + $0x16f8] sm:$0xff]   ;;  %v445_v20 = vrot.slane %v38_v19, %v11521_v41  ;;  %v438_v21 = vcombine.high %v38_v19, %v38_v19 }
 0x2bd   :  { %10458 = vmatprep.subr.bf16.mxu0 %v11299_v25  ;;  %10479 = vmatpush3.bf16.msra.mxu1 %v11298_v24  ;;  %v11335_v23 = vld [vmem:[%s13906_s1 + $0x16b8] sm:$0xff]  }
 0x2be   :  { %10480 = vmatprep.subr.bf16.mxu1 %v11300_v26  ;;  %v437_v39 = vcombine.high %v435_v34, %v435_v34  ;;  %v654_v42 = vpack.c.bf16 %v435_v34, %v435_v34  ;;  %v453_v24 = vcombine.high %v445_v20, %v445_v20  ;;  %v452_v25 = vrot.slane %v438_v21, %v11521_v41  ;;  %v11338_v26 = vld [vmem:[%s13906_s1 + $0x17c0] sm:$0xff]  }
 0x2bf   :  { %v11340_v34 = vld [vmem:[%s13906_s1 + $0x1780] sm:$0xff]  }
 0x2c0   :  { %10459 = vmatpush3.bf16.msra.mxu0 %v11301_v27  ;;  %v655_v44 = vpack.c.bf16 %v437_v39, %v437_v39  ;;  %v656_v27 = vpack.c.bf16 %v445_v20, %v445_v20  ;;  %v657_v28 = vpack.c.bf16 %v453_v24, %v453_v24  ;;  %v658_v31 = vpack.c.bf16 %v452_v25, %v452_v25  ;;  %v11346_v39 = vld [vmem:[%s13906_s1 + $0x17d0] sm:$0xff]  }
 0x2c1   :  { %10488 = vmatprep.subr.bf16.mxu0 %v11304_v32  ;;  %10481 = vmatpush3.bf16.msra.mxu1 %v11302_v29  ;;  %v454_v29 = vcombine.high %v452_v25, %v452_v25  ;;  %v11341_v32 = vld [vmem:[%s13906_s1 + $0x1748] sm:$0xff]  }
 0x2c2   :  { %10510 = vmatprep.subr.bf16.mxu1 %v11305_v35  ;;  %8567 = vmatprep.mubr.bf16.mxu1 %v655_v44  ;;  %v11342_v35 = vld [vmem:[%s13906_s1 + $0x17c8] sm:$0xff]   ;;  %v11350_v44 = vld [vmem:[%s13906_s1 + $0x17d8] sm:$0xff]  }
 0x2c3   :  { %8528 = vmatmul.mubr.bf16.vlgmr.msra.gmra.mrb[84].mxu0 %v652_v36  ;;  %v659_v33 = vpack.c.bf16 %v454_v29, %v454_v29  ;;  %v11343_v36 = vld [vmem:[%s13906_s1 + $0x1708] sm:$0xff]  }
 0x2c4   :  { %10489 = vmatpush3.bf16.msra.mxu0 %v11306_v37  ;;  %8568 = vmatmul.mubr.bf16.vlgmr.msra.gmra.mrb[84].mxu1 %v654_v42  ;;  %v11345_v37 = vld [vmem:[%s13906_s1 + $0x1750] sm:$0xff]   ;;  %v11349_v42 = vld [vmem:[%s13906_s1 + $0x1758] sm:$0xff]  }
 0x2c5   :  { %10490 = vmatprep.subr.bf16.mxu0 %v11308_v43  ;;  %10511 = vmatpush3.bf16.msra.mxu1 %v11307_v40  ;;  %v11347_v40 = vld [vmem:[%s13906_s1 + $0x1710] sm:$0xff]  }
 0x2c6   :  { %10512 = vmatprep.subr.bf16.mxu1 %v11309_v45  ;;  %8607 = vmatprep.mubr.bf16.mxu0 %v657_v28  ;;  %v11348_v43 = vld [vmem:[%s13906_s1 + $0x1790] sm:$0xff]   ;;  %v11351_v45 = vld [vmem:[%s13906_s1 + $0x1718] sm:$0xff]  }
 0x2c7   :  { %8647 = vmatprep.mubr.bf16.mxu1 %v659_v33 }
 0x2c8   :  { %10491 = vmatpush3.bf16.msra.mxu0 %v11310_v46  ;;  %v11353_v46 = vld [vmem:[%s13906_s1 + $0x1760] sm:$0xff]  }
 0x2c9   :  { %10492 = vmatprep.subr.bf16.mxu0 %v11312_v48  ;;  %10513 = vmatpush3.bf16.msra.mxu1 %v11311_v47  ;;  %v11352_v47 = vld [vmem:[%s13906_s1 + $0x1798] sm:$0xff]   ;;  %v11354_v48 = vld [vmem:[%s13906_s1 + $0x17e0] sm:$0xff]  }
 0x2ca   :  { %10514 = vmatprep.subr.bf16.mxu1 %v11313_v49  ;;  %v11355_v49 = vld [vmem:[%s13906_s1 + $0x1720] sm:$0xff]  }
 0x2cc   :  { %10493 = vmatpush3.bf16.msra.mxu0 %v11314_v50  ;;  %v11357_v50 = vld [vmem:[%s13906_s1 + $0x1768] sm:$0xff]  }
 0x2cd   :  { %10494 = vmatprep.subr.bf16.mxu0 %v11316_v52  ;;  %10515 = vmatpush3.bf16.msra.mxu1 %v11315_v51  ;;  %v11356_v51 = vld [vmem:[%s13906_s1 + $0x17a0] sm:$0xff]  }
 0x2ce   :  { %10516 = vmatprep.subr.bf16.mxu1 %v11317_v53 }
 0x2d0   :  { %10495 = vmatpush3.bf16.msra.mxu0 %v11318_v54  ;;  %v11358_v54 = vld [vmem:[%s13906_s1 + $0x17e8] sm:$0xff]  }
 0x2d1   :  { %10496 = vmatprep.subr.bf16.mxu0 %v11320_v56  ;;  %10517 = vmatpush3.bf16.msra.mxu1 %v11319_v55 }
 0x2d2   :  { %10518 = vmatprep.subr.bf16.mxu1 %v11321_v57 }
 0x2d4   :  { %10497 = vmatpush3.bf16.msra.mxu0 %v11322_v58  ;;  %v11359_v58 = vld [vmem:[%s13906_s1 + $0x1728] sm:$0xff]  }
 0x2d5   :  { %10498 = vmatprep.subr.bf16.mxu0 %v11324_v60  ;;  %10519 = vmatpush3.bf16.msra.mxu1 %v11323_v59  ;;  %v11361_v59 = vld [vmem:[%s13906_s1 + $0x1770] sm:$0xff]  }
 0x2d6   :  { %v10196_v61 = vpop.f32.mrb[60].mxu0  ;;  %10520 = vmatprep.subr.bf16.mxu1 %v11325_v62 }
 0x2d7   :  { %v10197_v63 = vpop.f32.mrb[61].mxu0  ;;  %v10218_v1 = vpop.f32.mrb[60].mxu1 }
 0x2d8   :  { %v10198_v2 = vadd.f32 %v10197_v63, %v10196_v61  ;;  %v10199_v3 = vpop.f32.mrb[62].mxu0  ;;  %v10219_v4 = vpop.f32.mrb[61].mxu1  ;;  %10499 = vmatpush3.bf16.msra.mxu0 %v11326_v0 }
 0x2d9   :  { %v10200_v6 = vpop.f32.mrb[63].mxu0  ;;  %v10220_v9 = vadd.f32 %v10219_v4, %v10218_v1  ;;  %v10221_v10 = vpop.f32.mrb[62].mxu1  ;;  %10500 = vmatprep.subr.bf16.mxu0 %v11328_v7  ;;  %10521 = vmatpush3.bf16.msra.mxu1 %v11327_v5  ;;  %v11360_v1 = vld [vmem:[%s13906_s1 + $0x17a8] sm:$0xff]   ;;  %v11362_v3 = vld [vmem:[%s13906_s1 + $0x17f0] sm:$0xff]  }
 0x2da   :  { %v8050_v8 = vadd.f32 %v10198_v2, %v13662_v22  ;;  %v10222_v12 = vpop.f32.mrb[63].mxu1  ;;  %10522 = vmatprep.subr.bf16.mxu1 %v11329_v11  ;;  %v11337_v22 = vld [vmem:[%s13906_s1 + $0x1740] sm:$0xff]   ;;  %v11363_v5 = vld [vmem:[%s13906_s1 + $0x1730] sm:$0xff]   ;;  %v11365_v6 = vld [vmem:[%s13906_s1 + $0x1778] sm:$0xff]  }
 0x2db   :  { %v11364_v7 = vld [vmem:[%s13906_s1 + $0x17b0] sm:$0xff]   ;;  %v39_v10 = vld [vmem:[%s13905_s0 + $0xb8] sm:$0xff] }
 0x2dc   :  { %v13769_v14 = vadd.f32 %v10220_v9, %v8050_v8  ;;  %10501 = vmatpush3.bf16.msra.mxu0 %v11330_v13  ;;  %v11366_v8 = vld [vmem:[%s13906_s1 + $0x17f8] sm:$0xff]  }
 0x2dd   :  { %10502 = vmatprep.subr.bf16.mxu0 %v11332_v15  ;;  %10523 = vmatpush3.bf16.msra.mxu1 %v11331_v16  ;;  %v11367_v9 = vld [vmem:[%s13906_s1 + $0x1738] sm:$0xff]  }
 0x2de   :  { %10524 = vmatprep.subr.bf16.mxu1 %v11333_v17 }
 0x2e0   :  { %10503 = vmatpush3.bf16.msra.mxu0 %v11334_v18 }
 0x2e1   :  { %10532 = vmatprep.subr.bf16.mxu0 %v11337_v22  ;;  %10525 = vmatpush3.bf16.msra.mxu1 %v11335_v23 }
 0x2e2   :  { %10554 = vmatprep.subr.bf16.mxu1 %v11338_v26 }
 0x2e3   :  { %8608 = vmatmul.mubr.bf16.vlgmr.msra.gmra.mrb[88].mxu0 %v656_v27 }
 0x2e4   :  { %10533 = vmatpush3.bf16.msra.mxu0 %v11339_v30  ;;  %8648 = vmatmul.mubr.bf16.vlgmr.msra.gmra.mrb[88].mxu1 %v658_v31 }
 0x2e5   :  { %10534 = vmatprep.subr.bf16.mxu0 %v11341_v32  ;;  %10555 = vmatpush3.bf16.msra.mxu1 %v11340_v34 }
 0x2e6   :  { %10556 = vmatprep.subr.bf16.mxu1 %v11342_v35 }
 0x2e8   :  { %10535 = vmatpush3.bf16.msra.mxu0 %v11343_v36 }
 0x2e9   :  { %10536 = vmatprep.subr.bf16.mxu0 %v11345_v37  ;;  %10557 = vmatpush3.bf16.msra.mxu1 %v11344_v38 }
 0x2ea   :  { %10558 = vmatprep.subr.bf16.mxu1 %v11346_v39 }
 0x2ec   :  { %10537 = vmatpush3.bf16.msra.mxu0 %v11347_v40 }
 0x2ed   :  { %10538 = vmatprep.subr.bf16.mxu0 %v11349_v42  ;;  %10559 = vmatpush3.bf16.msra.mxu1 %v11348_v43 }
 0x2ee   :  { %10560 = vmatprep.subr.bf16.mxu1 %v11350_v44 }
 0x2f0   :  { %10539 = vmatpush3.bf16.msra.mxu0 %v11351_v45 }
 0x2f1   :  { %10540 = vmatprep.subr.bf16.mxu0 %v11353_v46  ;;  %10561 = vmatpush3.bf16.msra.mxu1 %v11352_v47 }
 0x2f2   :  { %10562 = vmatprep.subr.bf16.mxu1 %v11354_v48 }
 0x2f4   :  { %10541 = vmatpush3.bf16.msra.mxu0 %v11355_v49 }
 0x2f5   :  { %10542 = vmatprep.subr.bf16.mxu0 %v11357_v50  ;;  %10563 = vmatpush3.bf16.msra.mxu1 %v11356_v51 }
 0x2f6   :  { %v10240_v52 = vpop.f32.mrb[64].mxu0  ;;  %10564 = vmatprep.subr.bf16.mxu1 %v11358_v54 }
 0x2f7   :  { %v10241_v53 = vpop.f32.mrb[65].mxu0  ;;  %v10262_v55 = vpop.f32.mrb[64].mxu1 }
 0x2f8   :  { %v10242_v56 = vadd.f32 %v10241_v53, %v10240_v52  ;;  %v10243_v57 = vpop.f32.mrb[66].mxu0  ;;  %v10263_v60 = vpop.f32.mrb[65].mxu1  ;;  %10543 = vmatpush3.bf16.msra.mxu0 %v11359_v58 }
 0x2f9   :  { %v10244_v61 = vpop.f32.mrb[67].mxu0  ;;  %v10264_v63 = vadd.f32 %v10263_v60, %v10262_v55  ;;  %v10265_v0 = vpop.f32.mrb[66].mxu1  ;;  %10544 = vmatprep.subr.bf16.mxu0 %v11361_v59  ;;  %10565 = vmatpush3.bf16.msra.mxu1 %v11360_v1 }
 0x2fa   :  { %v8130_v62 = vadd.f32 %v10242_v56, %v13769_v14  ;;  %v10266_v2 = vpop.f32.mrb[67].mxu1  ;;  %10566 = vmatprep.subr.bf16.mxu1 %v11362_v3 }
 0x2fc   :  { %v8170_v4 = vadd.f32 %v10264_v63, %v8130_v62  ;;  %10545 = vmatpush3.bf16.msra.mxu0 %v11363_v5 }
 0x2fd   :  { %8 = vsyncpa [#allocation3], 0  ;;  %10546 = vmatprep.subr.bf16.mxu0 %v11365_v6  ;;  %v462_v11 = vrot.slane %v39_v10, %v11521_v41  ;;  %v455_v12 = vcombine.high %v39_v10, %v39_v10  ;;  %10567 = vmatpush3.bf16.msra.mxu1 %v11364_v7  ;;  %v11368_v13 = vld [vmem:[%s13906_s1 + $0x17b8] sm:$0xff]   ;;  %s11395_s0 = smov [#allocation2]   ;;  %vm8735_vm0 = vcmask 254976  }
 0x2fe   :  { %10568 = vmatprep.subr.bf16.mxu1 %v11366_v8  ;;  %s8743_s1 = sshll.u32 %s11395_s0, 4  ;;  %s8744_s1 = int_to_ptr.vmem [resolvable:$true] %s8743_s1 }
 0x2ff   :  { %v470_v14 = vcombine.high %v462_v11, %v462_v11  ;;  %v469_v15 = vrot.slane %v455_v12, %v11521_v41  ;;  %v660_v16 = vpack.c.bf16 %v462_v11, %v462_v11  ;;  %s11370_s20 = scalar_lea.vmem %s8744_s1, 32  ;;  %p11375_p1 = scmp.lt.s32.totalorder %s8744_s1, %s8744_s1 }
 0x300   :  { %10547 = vmatpush3.bf16.msra.mxu0 %v11367_v9  ;;  %p11371_p0 = scmp.ne.s32.totalorder %s8744_s1, %s11370_s20  ;;  %p11376_p2 = scmp.lt.s32.totalorder %s11370_s20, %s11370_s20 }
 0x301   :  { %v661_v17 = vpack.c.bf16 %v470_v14, %v470_v14  ;;  %v471_v18 = vcombine.high %v469_v15, %v469_v15  ;;  %10569 = vmatpush3.bf16.msra.mxu1 %v11368_v13  ;;  %v662_v19 = vpack.c.bf16 %v469_v15, %v469_v15 }
 0x302   :  { %p11377_p3 = por %p11376_p2, %p11375_p1 }
 0x303   :  { %8687 = vmatprep.mubr.bf16.mxu0 %v661_v17  ;;  %v663_v20 = vpack.c.bf16 %v471_v18, %v471_v18 }
 0x304   :  { %8688 = vmatmul.mubr.bf16.vlgmr.msra.gmra.mrb[92].mxu0 %v660_v16  ;;  %p11378_p4 = pnand %p11377_p3, %p11371_p0 }
 0x305   :  { %8727 = vmatprep.mubr.bf16.mxu1 %v663_v20 }
 0x306   :  { %8728 = vmatmul.mubr.bf16.vlgmr.msra.gmra.mrb[92].mxu1 %v662_v19 }
 0x316   :  { %v10284_v21 = vpop.f32.mrb[68].mxu0 }
 0x317   :  { %v10285_v22 = vpop.f32.mrb[69].mxu0  ;;  %v10306_v23 = vpop.f32.mrb[68].mxu1 }
 0x318   :  { %v10286_v24 = vadd.f32 %v10285_v22, %v10284_v21  ;;  %v10287_v25 = vpop.f32.mrb[70].mxu0  ;;  %v10307_v26 = vpop.f32.mrb[69].mxu1 }
 0x319   :  { %v10288_v27 = vpop.f32.mrb[71].mxu0  ;;  %v10308_v41 = vadd.f32 %v10307_v26, %v10306_v23  ;;  %v10309_v29 = vpop.f32.mrb[70].mxu1 }
 0x31a   :  { %v8210_v28 = vadd.f32 %v10286_v24, %v8170_v4  ;;  %v10310_v30 = vpop.f32.mrb[71].mxu1 }
 0x31c   :  { %v8250_v31 = vadd.f32 %v10308_v41, %v8210_v28 }
 0x336   :  { %v10328_v32 = vpop.f32.mrb[72].mxu0 }
 0x337   :  { %v10329_v33 = vpop.f32.mrb[73].mxu0  ;;  %v10350_v34 = vpop.f32.mrb[72].mxu1 }
 0x338   :  { %v10330_v35 = vadd.f32 %v10329_v33, %v10328_v32  ;;  %v10331_v36 = vpop.f32.mrb[74].mxu0  ;;  %v10351_v37 = vpop.f32.mrb[73].mxu1 }
 0x339   :  { %v10332_v38 = vpop.f32.mrb[75].mxu0  ;;  %v10352_v40 = vadd.f32 %v10351_v37, %v10350_v34  ;;  %v10353_v42 = vpop.f32.mrb[74].mxu1 }
 0x33a   :  { %v8290_v39 = vadd.f32 %v10330_v35, %v8250_v31  ;;  %v10354_v43 = vpop.f32.mrb[75].mxu1 }
 0x33c   :  { %v8330_v44 = vadd.f32 %v10352_v40, %v8290_v39 }
 0x356   :  { %v10372_v45 = vpop.f32.mrb[76].mxu0 }
 0x357   :  { %v10373_v46 = vpop.f32.mrb[77].mxu0  ;;  %v10394_v47 = vpop.f32.mrb[76].mxu1 }
 0x358   :  { %v10374_v48 = vadd.f32 %v10373_v46, %v10372_v45  ;;  %v10375_v49 = vpop.f32.mrb[78].mxu0  ;;  %v10395_v50 = vpop.f32.mrb[77].mxu1 }
 0x359   :  { %v10376_v51 = vpop.f32.mrb[79].mxu0  ;;  %v10396_v53 = vadd.f32 %v10395_v50, %v10394_v47  ;;  %v10397_v54 = vpop.f32.mrb[78].mxu1 }
 0x35a   :  { %v8370_v52 = vadd.f32 %v10374_v48, %v8330_v44  ;;  %v10398_v55 = vpop.f32.mrb[79].mxu1 }
 0x35c   :  { %v8410_v56 = vadd.f32 %v10396_v53, %v8370_v52 }
 0x376   :  { %v10416_v57 = vpop.f32.mrb[80].mxu0 }
 0x377   :  { %v10417_v58 = vpop.f32.mrb[81].mxu0  ;;  %v10438_v59 = vpop.f32.mrb[80].mxu1 }
 0x378   :  { %v10418_v60 = vadd.f32 %v10417_v58, %v10416_v57  ;;  %v10419_v61 = vpop.f32.mrb[82].mxu0  ;;  %v10439_v62 = vpop.f32.mrb[81].mxu1 }
 0x379   :  { %v10420_v63 = vpop.f32.mrb[83].mxu0  ;;  %v10440_v1 = vadd.f32 %v10439_v62, %v10438_v59  ;;  %v10441_v2 = vpop.f32.mrb[82].mxu1 }
 0x37a   :  { %v8450_v0 = vadd.f32 %v10418_v60, %v8410_v56  ;;  %v10442_v3 = vpop.f32.mrb[83].mxu1 }
 0x37c   :  { %v8490_v4 = vadd.f32 %v10440_v1, %v8450_v0 }
 0x396   :  { %v10460_v5 = vpop.f32.mrb[84].mxu0 }
 0x397   :  { %v10461_v6 = vpop.f32.mrb[85].mxu0  ;;  %v10482_v7 = vpop.f32.mrb[84].mxu1 }
 0x398   :  { %v10462_v8 = vadd.f32 %v10461_v6, %v10460_v5  ;;  %v10463_v9 = vpop.f32.mrb[86].mxu0  ;;  %v10483_v10 = vpop.f32.mrb[85].mxu1 }
 0x399   :  { %v10464_v11 = vpop.f32.mrb[87].mxu0  ;;  %v10484_v13 = vadd.f32 %v10483_v10, %v10482_v7  ;;  %v10485_v14 = vpop.f32.mrb[86].mxu1 }
 0x39a   :  { %v8530_v12 = vadd.f32 %v10462_v8, %v8490_v4  ;;  %v10486_v15 = vpop.f32.mrb[87].mxu1 }
 0x39c   :  { %v8570_v16 = vadd.f32 %v10484_v13, %v8530_v12 }
 0x3b6   :  { %v10504_v17 = vpop.f32.mrb[88].mxu0 }
 0x3b7   :  { %v10505_v18 = vpop.f32.mrb[89].mxu0  ;;  %v10526_v19 = vpop.f32.mrb[88].mxu1 }
 0x3b8   :  { %v10506_v20 = vadd.f32 %v10505_v18, %v10504_v17  ;;  %v10507_v21 = vpop.f32.mrb[90].mxu0  ;;  %v10527_v22 = vpop.f32.mrb[89].mxu1 }
 0x3b9   :  { %v10508_v23 = vpop.f32.mrb[91].mxu0  ;;  %v10528_v25 = vadd.f32 %v10527_v22, %v10526_v19  ;;  %v10529_v26 = vpop.f32.mrb[90].mxu1 }
 0x3ba   :  { %v8610_v24 = vadd.f32 %v10506_v20, %v8570_v16  ;;  %v10530_v27 = vpop.f32.mrb[91].mxu1 }
 0x3bc   :  { %v8650_v28 = vadd.f32 %v10528_v25, %v8610_v24 }
 0x3d7   :  { %v10548_v41 = vpop.f32.mrb[92].mxu0 }
 0x3d8   :  { %v10549_v29 = vpop.f32.mrb[93].mxu0 }
 0x3d9   :  { %v10570_v30 = vpop.f32.mrb[92].mxu1  ;;  %v10550_v31 = vadd.f32 %v10549_v29, %v10548_v41  ;;  %v10551_v32 = vpop.f32.mrb[94].mxu0 }
 0x3da   :  { %v10571_v33 = vpop.f32.mrb[93].mxu1  ;;  %v10552_v34 = vpop.f32.mrb[95].mxu0 }
 0x3db   :  { %v8690_v35 = vadd.f32 %v10550_v31, %v8650_v28  ;;  %v10572_v36 = vadd.f32 %v10571_v33, %v10570_v30  ;;  %v10573_v37 = vpop.f32.mrb[94].mxu1 }
 0x3dc   :  { %v10574_v38 = vpop.f32.mrb[95].mxu1 }
 0x3dd   :  { %v8730_v39 = vadd.f32 %v10572_v36, %v8690_v35 }
 0x3df   :  { %8736 = vst.msk [vmem:[#allocation2] sm:$0x3] %vm8735_vm0, %v8730_v39 }
 0x3e0   :  { %11381 = shalt.err (!%p11378_p4)
}
 0x3e1   :  { %s11382_s23 = scalar_lea.hbm %s13908_s3, 32 }
 0x3e2   :  { %p11383_p5 = scmp.ne.s32.totalorder %s13908_s3, %s11382_s23  ;;  %p11386_p6 = scmp.lt.u32.totalorder %s11382_s23, %s13908_s3 }
 0x3e4   :  { %p11388_p7 = pnand %p11386_p6, %p11383_p5 }
 0x3e6   :  { %11391 = shalt.err (!%p11388_p7)
}
 0x3e7   :  { %8746 = dma.vmem_to_hbm [thread:$0]  %s8744_s1, 32, %s13908_s3, [#allocation3]  }
 0x3e8   :  { %11392 = dma.done.wait [#allocation3], 32  }
 0x3e9   :  { %11393 = vsyncadd [#allocation3], 4294967264 }
 0x3ea   :  { %8750 = vsyncpa [#allocation3], 1 }

</bundles_post_ra>
